<compile_context>
chip_gen: v6e
topology: v6e:2x2x1
jax: 0.10.0
libtpu: 0.0.40
codegen_flags: <defaults>
</compile_context>

<pallas_src>
import jax
import jax.numpy as jnp
import numpy as np
from jax import lax
from jax.experimental import pallas as pl
from jax.experimental.pallas import tpu as pltpu


# ------------------------------ fused kernel ---------------------------------

def _basic_conv_kernel(p1_ref, w1_ref, b1_ref, w2_ref, b2_ref,
                       f1w_ref, f1b_ref, f2w_ref, f2b_ref,
                       o_ref, y1_scr):
    BT = o_ref.shape[0]

    # ---- conv1: one im2col matmul covering all 4 pooling corners -------------
    pats = p1_ref[...]                                    # (4, BT, 144, 25)
    z1 = jnp.dot(pats.reshape(4 * BT * 144, 25), w1_ref[...],
                 preferred_element_type=jnp.float32)      # (4*BT*144, 10)
    z1 = z1.reshape(4, BT * 144, 10)
    # maxpool2x2 == max over the corner axis; per-channel bias commutes with it.
    y1 = jnp.maximum(jnp.max(z1, axis=0) + b1_ref[...], 0.0)   # (BT*144, 10)
    y1 = y1.reshape(BT, 144, 10)

    # Stage pooled conv1 output as NHWC (BT, 12, 12, 10) in VMEM scratch.
    for ph in range(12):
        y1_scr[:, ph, :, :] = y1[:, ph * 12:(ph + 1) * 12, :]

    # ---- conv2: in-kernel im2col as 25 shifted-window matmuls ---------------
    acc2 = jnp.zeros((BT * 64, 20), jnp.float32)
    for i in range(5):
        for j in range(5):
            win = y1_scr[:, i:i + 8, j:j + 8, :]          # (BT, 8, 8, 10)
            acc2 = acc2 + jnp.dot(win.reshape(BT * 64, 10), w2_ref[i * 5 + j],
                                  preferred_element_type=jnp.float32)
    z2 = acc2 + b2_ref[...]                               # (BT*64, 20)
    # TODO(synk): Dropout2d / F.dropout implemented as eval-mode identities (no RNG mask).

    # ---- maxpool2x2 + relu + flatten fused with fc1 --------------------------
    z2 = z2.reshape(BT, 8, 8, 20)                         # (b, oh, ow, co)
    h = jnp.zeros((BT, 50), jnp.float32)
    for p in range(4):
        rows = jnp.maximum(z2[:, 2 * p, :, :], z2[:, 2 * p + 1, :, :])  # (BT, 8, 20)
        for q in range(4):
            v = jnp.maximum(rows[:, 2 * q, :], rows[:, 2 * q + 1, :])   # (BT, 20)
            v = jnp.maximum(v, 0.0)                                     # relu
            h = h + jnp.dot(v, f1w_ref[p * 4 + q],
                            preferred_element_type=jnp.float32)
    h = jnp.maximum(h + f1b_ref[...], 0.0)                # fc1 bias + relu

    # ---- fc2 + log_softmax ----------------------------------------------------
    z = jnp.dot(h, f2w_ref[...], preferred_element_type=jnp.float32) + f2b_ref[...]
    m = jnp.max(z, axis=-1, keepdims=True)
    lse = jnp.log(jnp.sum(jnp.exp(z - m), axis=-1, keepdims=True)) + m
    o_ref[...] = z - lse


# ------------------------------- host glue -----------------------------------

def _conv1_pool_patches(x, n_pad):
    """(N,1,28,28) -> (4, n_pad, 144, 25), rows ordered (dy*2+dx, n, ph*12+pw, i*5+j)."""
    n = x.shape[0]
    xs = x[:, 0]                                          # (N, 28, 28)
    taps = [xs[:, i:i + 24, j:j + 24] for i in range(5) for j in range(5)]
    p = jnp.stack(taps, axis=-1)                          # (N, 24, 24, 25): (n, oh, ow, k)
    p = p.reshape(n, 12, 2, 12, 2, 25)                    # (n, ph, dy, pw, dx, k)
    p = jnp.transpose(p, (2, 4, 0, 1, 3, 5))              # (dy, dx, n, ph, pw, k)
    p = p.reshape(4, n, 144, 25)
    if n_pad != n:
        p = jnp.pad(p, ((0, 0), (0, n_pad - n), (0, 0), (0, 0)))
    return p


def basic_conv_forward(x, params, block_batch=8):
    w1, b1, w2, b2, fc1_w, fc1_b, fc2_w, fc2_b = params
    n = x.shape[0]
    bt = min(block_batch, n)
    n_pad = ((n + bt - 1) // bt) * bt

    p1 = _conv1_pool_patches(x.astype(jnp.float32), n_pad)
    # Weight prep (host, once): layouts matched to the in-kernel decompositions.
    w1_mat = w1.reshape(10, 25).T                                      # (25, 10)
    w2_taps = jnp.transpose(w2, (2, 3, 1, 0)).reshape(25, 10, 20)      # [i*5+j, ci, co]
    f1w = jnp.transpose(fc1_w.reshape(50, 20, 4, 4), (2, 3, 1, 0)).reshape(16, 20, 50)

    out = pl.pallas_call(
        _basic_conv_kernel,
        out_shape=jax.ShapeDtypeStruct((n_pad, 10), jnp.float32),
        grid=(n_pad // bt,),
        in_specs=[
            pl.BlockSpec((4, bt, 144, 25), lambda i: (0, i, 0, 0)),
            pl.BlockSpec((25, 10), lambda i: (0, 0)),
            pl.BlockSpec((1, 10), lambda i: (0, 0)),
            pl.BlockSpec((25, 10, 20), lambda i: (0, 0, 0)),
            pl.BlockSpec((1, 20), lambda i: (0, 0)),
            pl.BlockSpec((16, 20, 50), lambda i: (0, 0, 0)),
            pl.BlockSpec((1, 50), lambda i: (0, 0)),
            pl.BlockSpec((50, 10), lambda i: (0, 0)),
            pl.BlockSpec((1, 10), lambda i: (0, 0)),
        ],
        out_specs=pl.BlockSpec((bt, 10), lambda i: (i, 0)),
        scratch_shapes=[pltpu.VMEM((bt, 12, 12, 10), jnp.float32)],
        compiler_params=pltpu.CompilerParams(
            dimension_semantics=("parallel",)),
    )(p1, w1_mat, b1.reshape(1, -1), w2_taps, b2.reshape(1, -1),
      f1w, fc1_b.reshape(1, -1), fc2_w.T, fc2_b.reshape(1, -1))
    return out[:n]


# --------------------------- params / reference ------------------------------

def init_params(key):
    ks = jax.random.split(key, 8)

    def u(k, shape, fan_in):
        bound = 1.0 / float(np.sqrt(fan_in))
        return jax.random.uniform(k, shape, jnp.float32, -bound, bound)

    w1 = u(ks[0], (10, 1, 5, 5), 25);    b1 = u(ks[1], (10,), 25)
    w2 = u(ks[2], (20, 10, 5, 5), 250);  b2 = u(ks[3], (20,), 250)
    fc1_w = u(ks[4], (50, 320), 320);    fc1_b = u(ks[5], (50,), 320)
    fc2_w = u(ks[6], (10, 50), 50);      fc2_b = u(ks[7], (10,), 50)
    return (w1, b1, w2, b2, fc1_w, fc1_b, fc2_w, fc2_b)


def reference_forward(x, params):
    (w1, b1, w2, b2, fc1_w, fc1_b, fc2_w, fc2_b) = params
    dn = ("NCHW", "OIHW", "NCHW")
    y = lax.conv_general_dilated(x, w1, (1, 1), "VALID", dimension_numbers=dn)
    y = y + b1[None, :, None, None]
    y = lax.reduce_window(y, -jnp.inf, lax.max, (1, 1, 2, 2), (1, 1, 2, 2), "VALID")
    y = jnp.maximum(y, 0.0)
    y = lax.conv_general_dilated(y, w2, (1, 1), "VALID", dimension_numbers=dn)
    y = y + b2[None, :, None, None]
    y = lax.reduce_window(y, -jnp.inf, lax.max, (1, 1, 2, 2), (1, 1, 2, 2), "VALID")
    y = jnp.maximum(y, 0.0)
    y = y.reshape(y.shape[0], -1)
    y = jnp.maximum(y @ fc1_w.T + fc1_b, 0.0)
    y = y @ fc2_w.T + fc2_b
    return jax.nn.log_softmax(y, axis=-1)


if __name__ == "__main__":
    key = jax.random.PRNGKey(0)
    pkey, xkey = jax.random.split(key)
    params = init_params(pkey)
    # Input shape implied by fc1(320): 1x28x28 images (MNIST-style).
    x = jax.random.normal(xkey, (2, 1, 28, 28), jnp.float32)

    fwd = jax.jit(basic_conv_forward)
    out = jax.block_until_ready(fwd(x, params))
    ref = jax.block_until_ready(reference_forward(x, params))

    assert out.shape == (2, 10), out.shape
    np.testing.assert_allclose(np.asarray(out), np.asarray(ref), atol=1e-4, rtol=1e-4)
    print("KERNEL_OK")
</pallas_src>

<mosaic_0001>
module attributes {stable_mosaic.version = 11 : i64} {
  func.func @_basic_conv_kernel(%arg0: i32, %arg1: memref<4x2x144x25xf32, #tpu.memory_space<vmem>>, %arg2: memref<25x10xf32, #tpu.memory_space<vmem>>, %arg3: memref<1x10xf32, #tpu.memory_space<vmem>>, %arg4: memref<25x10x20xf32, #tpu.memory_space<vmem>>, %arg5: memref<1x20xf32, #tpu.memory_space<vmem>>, %arg6: memref<16x20x50xf32, #tpu.memory_space<vmem>>, %arg7: memref<1x50xf32, #tpu.memory_space<vmem>>, %arg8: memref<50x10xf32, #tpu.memory_space<vmem>>, %arg9: memref<1x10xf32, #tpu.memory_space<vmem>>, %arg10: memref<2x10xf32, #tpu.memory_space<vmem>>, %arg11: memref<2x12x12x10xf32, #tpu.memory_space<vmem>>) attributes {dimension_semantics = [#tpu.dimension_semantics<parallel>], iteration_bounds = array<i64: 1>, scalar_prefetch = 0 : i64, scratch_operands = 1 : i64, tpu.core_type = #tpu.core_type<tc>, window_params = [{transform_indices = @transform_0, window_bounds = array<i64: 4, 2, 144, 25>}, {pipeline_mode = #tpu.pipeline_mode<synchronous>, transform_indices = @transform_1, window_bounds = array<i64: 25, 10>}, {pipeline_mode = #tpu.pipeline_mode<synchronous>, transform_indices = @transform_2, window_bounds = array<i64: 1, 10>}, {pipeline_mode = #tpu.pipeline_mode<synchronous>, transform_indices = @transform_3, window_bounds = array<i64: 25, 10, 20>}, {pipeline_mode = #tpu.pipeline_mode<synchronous>, transform_indices = @transform_4, window_bounds = array<i64: 1, 20>}, {pipeline_mode = #tpu.pipeline_mode<synchronous>, transform_indices = @transform_5, window_bounds = array<i64: 16, 20, 50>}, {pipeline_mode = #tpu.pipeline_mode<synchronous>, transform_indices = @transform_6, window_bounds = array<i64: 1, 50>}, {pipeline_mode = #tpu.pipeline_mode<synchronous>, transform_indices = @transform_7, window_bounds = array<i64: 50, 10>}, {pipeline_mode = #tpu.pipeline_mode<synchronous>, transform_indices = @transform_8, window_bounds = array<i64: 1, 10>}, {transform_indices = @transform_9, window_bounds = array<i64: 2, 10>}]} {
    %c0 = arith.constant 0 : index
    %c0_0 = arith.constant 0 : index
    %c0_1 = arith.constant 0 : index
    %c0_2 = arith.constant 0 : index
    %0 = vector.load %arg1[%c0, %c0_0, %c0_1, %c0_2] : memref<4x2x144x25xf32, #tpu.memory_space<vmem>>, vector<4x2x144x25xf32>
    %1 = vector.shape_cast %0 : vector<4x2x144x25xf32> to vector<1152x25xf32>
    %c0_3 = arith.constant 0 : index
    %c0_4 = arith.constant 0 : index
    %2 = vector.load %arg2[%c0_3, %c0_4] : memref<25x10xf32, #tpu.memory_space<vmem>>, vector<25x10xf32>
    %cst = arith.constant dense<0.000000e+00> : vector<1152x10xf32>
    %3 = tpu.matmul %1, %2, %cst {dimension_numbers = #tpu.dot_dimension_numbers<[1], [0], [0], [1], [0, 0, 1, 1], [], []>} : vector<1152x25xf32>, vector<25x10xf32>, vector<1152x10xf32> -> vector<1152x10xf32>
    %4 = vector.shape_cast %3 : vector<1152x10xf32> to vector<4x288x10xf32>
    %cst_5 = arith.constant dense<0xFF800000> : vector<288x10xf32>
    %5 = vector.multi_reduction <maximumf>, %4, %cst_5 [0] : vector<4x288x10xf32> to vector<288x10xf32>
    %c0_6 = arith.constant 0 : index
    %c0_7 = arith.constant 0 : index
    %6 = vector.load %arg3[%c0_6, %c0_7] : memref<1x10xf32, #tpu.memory_space<vmem>>, vector<1x10xf32>
    %7 = vector.broadcast %6 : vector<1x10xf32> to vector<288x10xf32>
    %8 = arith.addf %5, %7 : vector<288x10xf32>
    %cst_8 = arith.constant 0.000000e+00 : f32
    %9 = vector.broadcast %cst_8 : f32 to vector<288x10xf32>
    %10 = arith.maximumf %8, %9 : vector<288x10xf32>
    %11 = vector.shape_cast %10 : vector<288x10xf32> to vector<2x144x10xf32>
    %12 = vector.extract_strided_slice %11 {offsets = [0, 0, 0], sizes = [2, 12, 10], strides = [1, 1, 1]} : vector<2x144x10xf32> to vector<2x12x10xf32>
    %c0_9 = arith.constant 0 : index
    %c0_10 = arith.constant 0 : index
    %c0_11 = arith.constant 0 : index
    %c0_12 = arith.constant 0 : index
    %13 = vector.load %arg11[%c0_9, %c0_10, %c0_11, %c0_12] : memref<2x12x12x10xf32, #tpu.memory_space<vmem>>, vector<2x1x12x10xf32>
    %14 = vector.shape_cast %13 : vector<2x1x12x10xf32> to vector<2x12x10xf32>
    %15 = vector.shape_cast %12 : vector<2x12x10xf32> to vector<2x1x12x10xf32>
    tpu.vector_store %arg11[%c0_9, %c0_10, %c0_11, %c0_12], %15 {strides = array<i32>} : memref<2x12x12x10xf32, #tpu.memory_space<vmem>>, vector<2x1x12x10xf32>,
    %16 = vector.extract_strided_slice %11 {offsets = [0, 12, 0], sizes = [2, 12, 10], strides = [1, 1, 1]} : vector<2x144x10xf32> to vector<2x12x10xf32>
    %c0_13 = arith.constant 0 : index
    %c1 = arith.constant 1 : index
    %c0_14 = arith.constant 0 : index
    %c0_15 = arith.constant 0 : index
    %17 = vector.load %arg11[%c0_13, %c1, %c0_14, %c0_15] : memref<2x12x12x10xf32, #tpu.memory_space<vmem>>, vector<2x1x12x10xf32>
    %18 = vector.shape_cast %17 : vector<2x1x12x10xf32> to vector<2x12x10xf32>
    %19 = vector.shape_cast %16 : vector<2x12x10xf32> to vector<2x1x12x10xf32>
    tpu.vector_store %arg11[%c0_13, %c1, %c0_14, %c0_15], %19 {strides = array<i32>} : memref<2x12x12x10xf32, #tpu.memory_space<vmem>>, vector<2x1x12x10xf32>,
    %20 = vector.extract_strided_slice %11 {offsets = [0, 24, 0], sizes = [2, 12, 10], strides = [1, 1, 1]} : vector<2x144x10xf32> to vector<2x12x10xf32>
    %c0_16 = arith.constant 0 : index
    %c2 = arith.constant 2 : index
    %c0_17 = arith.constant 0 : index
    %c0_18 = arith.constant 0 : index
    %21 = vector.load %arg11[%c0_16, %c2, %c0_17, %c0_18] : memref<2x12x12x10xf32, #tpu.memory_space<vmem>>, vector<2x1x12x10xf32>
    %22 = vector.shape_cast %21 : vector<2x1x12x10xf32> to vector<2x12x10xf32>
    %23 = vector.shape_cast %20 : vector<2x12x10xf32> to vector<2x1x12x10xf32>
    tpu.vector_store %arg11[%c0_16, %c2, %c0_17, %c0_18], %23 {strides = array<i32>} : memref<2x12x12x10xf32, #tpu.memory_space<vmem>>, vector<2x1x12x10xf32>,
    %24 = vector.extract_strided_slice %11 {offsets = [0, 36, 0], sizes = [2, 12, 10], strides = [1, 1, 1]} : vector<2x144x10xf32> to vector<2x12x10xf32>
    %c0_19 = arith.constant 0 : index
    %c3 = arith.constant 3 : index
    %c0_20 = arith.constant 0 : index
    %c0_21 = arith.constant 0 : index
    %25 = vector.load %arg11[%c0_19, %c3, %c0_20, %c0_21] : memref<2x12x12x10xf32, #tpu.memory_space<vmem>>, vector<2x1x12x10xf32>
    %26 = vector.shape_cast %25 : vector<2x1x12x10xf32> to vector<2x12x10xf32>
    %27 = vector.shape_cast %24 : vector<2x12x10xf32> to vector<2x1x12x10xf32>
    tpu.vector_store %arg11[%c0_19, %c3, %c0_20, %c0_21], %27 {strides = array<i32>} : memref<2x12x12x10xf32, #tpu.memory_space<vmem>>, vector<2x1x12x10xf32>,
    %28 = vector.extract_strided_slice %11 {offsets = [0, 48, 0], sizes = [2, 12, 10], strides = [1, 1, 1]} : vector<2x144x10xf32> to vector<2x12x10xf32>
    %c0_22 = arith.constant 0 : index
    %c4 = arith.constant 4 : index
    %c0_23 = arith.constant 0 : index
    %c0_24 = arith.constant 0 : index
    %29 = vector.load %arg11[%c0_22, %c4, %c0_23, %c0_24] : memref<2x12x12x10xf32, #tpu.memory_space<vmem>>, vector<2x1x12x10xf32>
    %30 = vector.shape_cast %29 : vector<2x1x12x10xf32> to vector<2x12x10xf32>
    %31 = vector.shape_cast %28 : vector<2x12x10xf32> to vector<2x1x12x10xf32>
    tpu.vector_store %arg11[%c0_22, %c4, %c0_23, %c0_24], %31 {strides = array<i32>} : memref<2x12x12x10xf32, #tpu.memory_space<vmem>>, vector<2x1x12x10xf32>,
    %32 = vector.extract_strided_slice %11 {offsets = [0, 60, 0], sizes = [2, 12, 10], strides = [1, 1, 1]} : vector<2x144x10xf32> to vector<2x12x10xf32>
    %c0_25 = arith.constant 0 : index
    %c5 = arith.constant 5 : index
    %c0_26 = arith.constant 0 : index
    %c0_27 = arith.constant 0 : index
    %33 = vector.load %arg11[%c0_25, %c5, %c0_26, %c0_27] : memref<2x12x12x10xf32, #tpu.memory_space<vmem>>, vector<2x1x12x10xf32>
    %34 = vector.shape_cast %33 : vector<2x1x12x10xf32> to vector<2x12x10xf32>
    %35 = vector.shape_cast %32 : vector<2x12x10xf32> to vector<2x1x12x10xf32>
    tpu.vector_store %arg11[%c0_25, %c5, %c0_26, %c0_27], %35 {strides = array<i32>} : memref<2x12x12x10xf32, #tpu.memory_space<vmem>>, vector<2x1x12x10xf32>,
    %36 = vector.extract_strided_slice %11 {offsets = [0, 72, 0], sizes = [2, 12, 10], strides = [1, 1, 1]} : vector<2x144x10xf32> to vector<2x12x10xf32>
    %c0_28 = arith.constant 0 : index
    %c6 = arith.constant 6 : index
    %c0_29 = arith.constant 0 : index
    %c0_30 = arith.constant 0 : index
    %37 = vector.load %arg11[%c0_28, %c6, %c0_29, %c0_30] : memref<2x12x12x10xf32, #tpu.memory_space<vmem>>, vector<2x1x12x10xf32>
    %38 = vector.shape_cast %37 : vector<2x1x12x10xf32> to vector<2x12x10xf32>
    %39 = vector.shape_cast %36 : vector<2x12x10xf32> to vector<2x1x12x10xf32>
    tpu.vector_store %arg11[%c0_28, %c6, %c0_29, %c0_30], %39 {strides = array<i32>} : memref<2x12x12x10xf32, #tpu.memory_space<vmem>>, vector<2x1x12x10xf32>,
    %40 = vector.extract_strided_slice %11 {offsets = [0, 84, 0], sizes = [2, 12, 10], strides = [1, 1, 1]} : vector<2x144x10xf32> to vector<2x12x10xf32>
    %c0_31 = arith.constant 0 : index
    %c7 = arith.constant 7 : index
    %c0_32 = arith.constant 0 : index
    %c0_33 = arith.constant 0 : index
    %41 = vector.load %arg11[%c0_31, %c7, %c0_32, %c0_33] : memref<2x12x12x10xf32, #tpu.memory_space<vmem>>, vector<2x1x12x10xf32>
    %42 = vector.shape_cast %41 : vector<2x1x12x10xf32> to vector<2x12x10xf32>
    %43 = vector.shape_cast %40 : vector<2x12x10xf32> to vector<2x1x12x10xf32>
    tpu.vector_store %arg11[%c0_31, %c7, %c0_32, %c0_33], %43 {strides = array<i32>} : memref<2x12x12x10xf32, #tpu.memory_space<vmem>>, vector<2x1x12x10xf32>,
    %44 = vector.extract_strided_slice %11 {offsets = [0, 96, 0], sizes = [2, 12, 10], strides = [1, 1, 1]} : vector<2x144x10xf32> to vector<2x12x10xf32>
    %c0_34 = arith.constant 0 : index
    %c8 = arith.constant 8 : index
    %c0_35 = arith.constant 0 : index
    %c0_36 = arith.constant 0 : index
    %45 = vector.load %arg11[%c0_34, %c8, %c0_35, %c0_36] : memref<2x12x12x10xf32, #tpu.memory_space<vmem>>, vector<2x1x12x10xf32>
    %46 = vector.shape_cast %45 : vector<2x1x12x10xf32> to vector<2x12x10xf32>
    %47 = vector.shape_cast %44 : vector<2x12x10xf32> to vector<2x1x12x10xf32>
    tpu.vector_store %arg11[%c0_34, %c8, %c0_35, %c0_36], %47 {strides = array<i32>} : memref<2x12x12x10xf32, #tpu.memory_space<vmem>>, vector<2x1x12x10xf32>,
    %48 = vector.extract_strided_slice %11 {offsets = [0, 108, 0], sizes = [2, 12, 10], strides = [1, 1, 1]} : vector<2x144x10xf32> to vector<2x12x10xf32>
    %c0_37 = arith.constant 0 : index
    %c9 = arith.constant 9 : index
    %c0_38 = arith.constant 0 : index
    %c0_39 = arith.constant 0 : index
    %49 = vector.load %arg11[%c0_37, %c9, %c0_38, %c0_39] : memref<2x12x12x10xf32, #tpu.memory_space<vmem>>, vector<2x1x12x10xf32>
    %50 = vector.shape_cast %49 : vector<2x1x12x10xf32> to vector<2x12x10xf32>
    %51 = vector.shape_cast %48 : vector<2x12x10xf32> to vector<2x1x12x10xf32>
    tpu.vector_store %arg11[%c0_37, %c9, %c0_38, %c0_39], %51 {strides = array<i32>} : memref<2x12x12x10xf32, #tpu.memory_space<vmem>>, vector<2x1x12x10xf32>,
    %52 = vector.extract_strided_slice %11 {offsets = [0, 120, 0], sizes = [2, 12, 10], strides = [1, 1, 1]} : vector<2x144x10xf32> to vector<2x12x10xf32>
    %c0_40 = arith.constant 0 : index
    %c10 = arith.constant 10 : index
    %c0_41 = arith.constant 0 : index
    %c0_42 = arith.constant 0 : index
    %53 = vector.load %arg11[%c0_40, %c10, %c0_41, %c0_42] : memref<2x12x12x10xf32, #tpu.memory_space<vmem>>, vector<2x1x12x10xf32>
    %54 = vector.shape_cast %53 : vector<2x1x12x10xf32> to vector<2x12x10xf32>
    %55 = vector.shape_cast %52 : vector<2x12x10xf32> to vector<2x1x12x10xf32>
    tpu.vector_store %arg11[%c0_40, %c10, %c0_41, %c0_42], %55 {strides = array<i32>} : memref<2x12x12x10xf32, #tpu.memory_space<vmem>>, vector<2x1x12x10xf32>,
    %56 = vector.extract_strided_slice %11 {offsets = [0, 132, 0], sizes = [2, 12, 10], strides = [1, 1, 1]} : vector<2x144x10xf32> to vector<2x12x10xf32>
    %c0_43 = arith.constant 0 : index
    %c11 = arith.constant 11 : index
    %c0_44 = arith.constant 0 : index
    %c0_45 = arith.constant 0 : index
    %57 = vector.load %arg11[%c0_43, %c11, %c0_44, %c0_45] : memref<2x12x12x10xf32, #tpu.memory_space<vmem>>, vector<2x1x12x10xf32>
    %58 = vector.shape_cast %57 : vector<2x1x12x10xf32> to vector<2x12x10xf32>
    %59 = vector.shape_cast %56 : vector<2x12x10xf32> to vector<2x1x12x10xf32>
    tpu.vector_store %arg11[%c0_43, %c11, %c0_44, %c0_45], %59 {strides = array<i32>} : memref<2x12x12x10xf32, #tpu.memory_space<vmem>>, vector<2x1x12x10xf32>,
    %cst_46 = arith.constant 0.000000e+00 : f32
    %60 = vector.broadcast %cst_46 : f32 to vector<128x20xf32>
    %c0_47 = arith.constant 0 : index
    %c0_48 = arith.constant 0 : index
    %c0_49 = arith.constant 0 : index
    %c0_50 = arith.constant 0 : index
    %61 = vector.load %arg11[%c0_47, %c0_48, %c0_49, %c0_50] : memref<2x12x12x10xf32, #tpu.memory_space<vmem>>, vector<2x8x8x10xf32>
    %62 = vector.shape_cast %61 : vector<2x8x8x10xf32> to vector<128x10xf32>
    %c0_51 = arith.constant 0 : index
    %c0_52 = arith.constant 0 : index
    %c0_53 = arith.constant 0 : index
    %63 = vector.load %arg4[%c0_51, %c0_52, %c0_53] : memref<25x10x20xf32, #tpu.memory_space<vmem>>, vector<1x10x20xf32>
    %64 = vector.shape_cast %63 : vector<1x10x20xf32> to vector<10x20xf32>
    %cst_54 = arith.constant dense<0.000000e+00> : vector<128x20xf32>
    %65 = tpu.matmul %62, %64, %cst_54 {dimension_numbers = #tpu.dot_dimension_numbers<[1], [0], [0], [1], [0, 0, 1, 1], [], []>} : vector<128x10xf32>, vector<10x20xf32>, vector<128x20xf32> -> vector<128x20xf32>
    %66 = arith.addf %60, %65 : vector<128x20xf32>
    %c0_55 = arith.constant 0 : index
    %c0_56 = arith.constant 0 : index
    %c1_57 = arith.constant 1 : index
    %c0_58 = arith.constant 0 : index
    %67 = vector.load %arg11[%c0_55, %c0_56, %c1_57, %c0_58] : memref<2x12x12x10xf32, #tpu.memory_space<vmem>>, vector<2x8x8x10xf32>
    %68 = vector.shape_cast %67 : vector<2x8x8x10xf32> to vector<128x10xf32>
    %c1_59 = arith.constant 1 : index
    %c0_60 = arith.constant 0 : index
    %c0_61 = arith.constant 0 : index
    %69 = vector.load %arg4[%c1_59, %c0_60, %c0_61] : memref<25x10x20xf32, #tpu.memory_space<vmem>>, vector<1x10x20xf32>
    %70 = vector.shape_cast %69 : vector<1x10x20xf32> to vector<10x20xf32>
    %cst_62 = arith.constant dense<0.000000e+00> : vector<128x20xf32>
    %71 = tpu.matmul %68, %70, %cst_62 {dimension_numbers = #tpu.dot_dimension_numbers<[1], [0], [0], [1], [0, 0, 1, 1], [], []>} : vector<128x10xf32>, vector<10x20xf32>, vector<128x20xf32> -> vector<128x20xf32>
    %72 = arith.addf %66, %71 : vector<128x20xf32>
    %c0_63 = arith.constant 0 : index
    %c0_64 = arith.constant 0 : index
    %c2_65 = arith.constant 2 : index
    %c0_66 = arith.constant 0 : index
    %73 = vector.load %arg11[%c0_63, %c0_64, %c2_65, %c0_66] : memref<2x12x12x10xf32, #tpu.memory_space<vmem>>, vector<2x8x8x10xf32>
    %74 = vector.shape_cast %73 : vector<2x8x8x10xf32> to vector<128x10xf32>
    %c2_67 = arith.constant 2 : index
    %c0_68 = arith.constant 0 : index
    %c0_69 = arith.constant 0 : index
    %75 = vector.load %arg4[%c2_67, %c0_68, %c0_69] : memref<25x10x20xf32, #tpu.memory_space<vmem>>, vector<1x10x20xf32>
    %76 = vector.shape_cast %75 : vector<1x10x20xf32> to vector<10x20xf32>
    %cst_70 = arith.constant dense<0.000000e+00> : vector<128x20xf32>
    %77 = tpu.matmul %74, %76, %cst_70 {dimension_numbers = #tpu.dot_dimension_numbers<[1], [0], [0], [1], [0, 0, 1, 1], [], []>} : vector<128x10xf32>, vector<10x20xf32>, vector<128x20xf32> -> vector<128x20xf32>
    %78 = arith.addf %72, %77 : vector<128x20xf32>
    %c0_71 = arith.constant 0 : index
    %c0_72 = arith.constant 0 : index
    %c3_73 = arith.constant 3 : index
    %c0_74 = arith.constant 0 : index
    %79 = vector.load %arg11[%c0_71, %c0_72, %c3_73, %c0_74] : memref<2x12x12x10xf32, #tpu.memory_space<vmem>>, vector<2x8x8x10xf32>
    %80 = vector.shape_cast %79 : vector<2x8x8x10xf32> to vector<128x10xf32>
    %c3_75 = arith.constant 3 : index
    %c0_76 = arith.constant 0 : index
    %c0_77 = arith.constant 0 : index
    %81 = vector.load %arg4[%c3_75, %c0_76, %c0_77] : memref<25x10x20xf32, #tpu.memory_space<vmem>>, vector<1x10x20xf32>
    %82 = vector.shape_cast %81 : vector<1x10x20xf32> to vector<10x20xf32>
    %cst_78 = arith.constant dense<0.000000e+00> : vector<128x20xf32>
    %83 = tpu.matmul %80, %82, %cst_78 {dimension_numbers = #tpu.dot_dimension_numbers<[1], [0], [0], [1], [0, 0, 1, 1], [], []>} : vector<128x10xf32>, vector<10x20xf32>, vector<128x20xf32> -> vector<128x20xf32>
    %84 = arith.addf %78, %83 : vector<128x20xf32>
    %c0_79 = arith.constant 0 : index
    %c0_80 = arith.constant 0 : index
    %c4_81 = arith.constant 4 : index
    %c0_82 = arith.constant 0 : index
    %85 = vector.load %arg11[%c0_79, %c0_80, %c4_81, %c0_82] : memref<2x12x12x10xf32, #tpu.memory_space<vmem>>, vector<2x8x8x10xf32>
    %86 = vector.shape_cast %85 : vector<2x8x8x10xf32> to vector<128x10xf32>
    %c4_83 = arith.constant 4 : index
    %c0_84 = arith.constant 0 : index
    %c0_85 = arith.constant 0 : index
    %87 = vector.load %arg4[%c4_83, %c0_84, %c0_85] : memref<25x10x20xf32, #tpu.memory_space<vmem>>, vector<1x10x20xf32>
    %88 = vector.shape_cast %87 : vector<1x10x20xf32> to vector<10x20xf32>
    %cst_86 = arith.constant dense<0.000000e+00> : vector<128x20xf32>
    %89 = tpu.matmul %86, %88, %cst_86 {dimension_numbers = #tpu.dot_dimension_numbers<[1], [0], [0], [1], [0, 0, 1, 1], [], []>} : vector<128x10xf32>, vector<10x20xf32>, vector<128x20xf32> -> vector<128x20xf32>
    %90 = arith.addf %84, %89 : vector<128x20xf32>
    %c0_87 = arith.constant 0 : index
    %c1_88 = arith.constant 1 : index
    %c0_89 = arith.constant 0 : index
    %c0_90 = arith.constant 0 : index
    %91 = vector.load %arg11[%c0_87, %c1_88, %c0_89, %c0_90] : memref<2x12x12x10xf32, #tpu.memory_space<vmem>>, vector<2x8x8x10xf32>
    %92 = vector.shape_cast %91 : vector<2x8x8x10xf32> to vector<128x10xf32>
    %c5_91 = arith.constant 5 : index
    %c0_92 = arith.constant 0 : index
    %c0_93 = arith.constant 0 : index
    %93 = vector.load %arg4[%c5_91, %c0_92, %c0_93] : memref<25x10x20xf32, #tpu.memory_space<vmem>>, vector<1x10x20xf32>
    %94 = vector.shape_cast %93 : vector<1x10x20xf32> to vector<10x20xf32>
    %cst_94 = arith.constant dense<0.000000e+00> : vector<128x20xf32>
    %95 = tpu.matmul %92, %94, %cst_94 {dimension_numbers = #tpu.dot_dimension_numbers<[1], [0], [0], [1], [0, 0, 1, 1], [], []>} : vector<128x10xf32>, vector<10x20xf32>, vector<128x20xf32> -> vector<128x20xf32>
    %96 = arith.addf %90, %95 : vector<128x20xf32>
    %c0_95 = arith.constant 0 : index
    %c1_96 = arith.constant 1 : index
    %c1_97 = arith.constant 1 : index
    %c0_98 = arith.constant 0 : index
    %97 = vector.load %arg11[%c0_95, %c1_96, %c1_97, %c0_98] : memref<2x12x12x10xf32, #tpu.memory_space<vmem>>, vector<2x8x8x10xf32>
    %98 = vector.shape_cast %97 : vector<2x8x8x10xf32> to vector<128x10xf32>
    %c6_99 = arith.constant 6 : index
    %c0_100 = arith.constant 0 : index
    %c0_101 = arith.constant 0 : index
    %99 = vector.load %arg4[%c6_99, %c0_100, %c0_101] : memref<25x10x20xf32, #tpu.memory_space<vmem>>, vector<1x10x20xf32>
    %100 = vector.shape_cast %99 : vector<1x10x20xf32> to vector<10x20xf32>
    %cst_102 = arith.constant dense<0.000000e+00> : vector<128x20xf32>
    %101 = tpu.matmul %98, %100, %cst_102 {dimension_numbers = #tpu.dot_dimension_numbers<[1], [0], [0], [1], [0, 0, 1, 1], [], []>} : vector<128x10xf32>, vector<10x20xf32>, vector<128x20xf32> -> vector<128x20xf32>
    %102 = arith.addf %96, %101 : vector<128x20xf32>
    %c0_103 = arith.constant 0 : index
    %c1_104 = arith.constant 1 : index
    %c2_105 = arith.constant 2 : index
    %c0_106 = arith.constant 0 : index
    %103 = vector.load %arg11[%c0_103, %c1_104, %c2_105, %c0_106] : memref<2x12x12x10xf32, #tpu.memory_space<vmem>>, vector<2x8x8x10xf32>
    %104 = vector.shape_cast %103 : vector<2x8x8x10xf32> to vector<128x10xf32>
    %c7_107 = arith.constant 7 : index
    %c0_108 = arith.constant 0 : index
    %c0_109 = arith.constant 0 : index
    %105 = vector.load %arg4[%c7_107, %c0_108, %c0_109] : memref<25x10x20xf32, #tpu.memory_space<vmem>>, vector<1x10x20xf32>
    %106 = vector.shape_cast %105 : vector<1x10x20xf32> to vector<10x20xf32>
    %cst_110 = arith.constant dense<0.000000e+00> : vector<128x20xf32>
    %107 = tpu.matmul %104, %106, %cst_110 {dimension_numbers = #tpu.dot_dimension_numbers<[1], [0], [0], [1], [0, 0, 1, 1], [], []>} : vector<128x10xf32>, vector<10x20xf32>, vector<128x20xf32> -> vector<128x20xf32>
    %108 = arith.addf %102, %107 : vector<128x20xf32>
    %c0_111 = arith.constant 0 : index
    %c1_112 = arith.constant 1 : index
    %c3_113 = arith.constant 3 : index
    %c0_114 = arith.constant 0 : index
    %109 = vector.load %arg11[%c0_111, %c1_112, %c3_113, %c0_114] : memref<2x12x12x10xf32, #tpu.memory_space<vmem>>, vector<2x8x8x10xf32>
    %110 = vector.shape_cast %109 : vector<2x8x8x10xf32> to vector<128x10xf32>
    %c8_115 = arith.constant 8 : index
    %c0_116 = arith.constant 0 : index
    %c0_117 = arith.constant 0 : index
    %111 = vector.load %arg4[%c8_115, %c0_116, %c0_117] : memref<25x10x20xf32, #tpu.memory_space<vmem>>, vector<1x10x20xf32>
    %112 = vector.shape_cast %111 : vector<1x10x20xf32> to vector<10x20xf32>
    %cst_118 = arith.constant dense<0.000000e+00> : vector<128x20xf32>
    %113 = tpu.matmul %110, %112, %cst_118 {dimension_numbers = #tpu.dot_dimension_numbers<[1], [0], [0], [1], [0, 0, 1, 1], [], []>} : vector<128x10xf32>, vector<10x20xf32>, vector<128x20xf32> -> vector<128x20xf32>
    %114 = arith.addf %108, %113 : vector<128x20xf32>
    %c0_119 = arith.constant 0 : index
    %c1_120 = arith.constant 1 : index
    %c4_121 = arith.constant 4 : index
    %c0_122 = arith.constant 0 : index
    %115 = vector.load %arg11[%c0_119, %c1_120, %c4_121, %c0_122] : memref<2x12x12x10xf32, #tpu.memory_space<vmem>>, vector<2x8x8x10xf32>
    %116 = vector.shape_cast %115 : vector<2x8x8x10xf32> to vector<128x10xf32>
    %c9_123 = arith.constant 9 : index
    %c0_124 = arith.constant 0 : index
    %c0_125 = arith.constant 0 : index
    %117 = vector.load %arg4[%c9_123, %c0_124, %c0_125] : memref<25x10x20xf32, #tpu.memory_space<vmem>>, vector<1x10x20xf32>
    %118 = vector.shape_cast %117 : vector<1x10x20xf32> to vector<10x20xf32>
    %cst_126 = arith.constant dense<0.000000e+00> : vector<128x20xf32>
    %119 = tpu.matmul %116, %118, %cst_126 {dimension_numbers = #tpu.dot_dimension_numbers<[1], [0], [0], [1], [0, 0, 1, 1], [], []>} : vector<128x10xf32>, vector<10x20xf32>, vector<128x20xf32> -> vector<128x20xf32>
    %120 = arith.addf %114, %119 : vector<128x20xf32>
    %c0_127 = arith.constant 0 : index
    %c2_128 = arith.constant 2 : index
    %c0_129 = arith.constant 0 : index
    %c0_130 = arith.constant 0 : index
    %121 = vector.load %arg11[%c0_127, %c2_128, %c0_129, %c0_130] : memref<2x12x12x10xf32, #tpu.memory_space<vmem>>, vector<2x8x8x10xf32>
    %122 = vector.shape_cast %121 : vector<2x8x8x10xf32> to vector<128x10xf32>
    %c10_131 = arith.constant 10 : index
    %c0_132 = arith.constant 0 : index
    %c0_133 = arith.constant 0 : index
    %123 = vector.load %arg4[%c10_131, %c0_132, %c0_133] : memref<25x10x20xf32, #tpu.memory_space<vmem>>, vector<1x10x20xf32>
    %124 = vector.shape_cast %123 : vector<1x10x20xf32> to vector<10x20xf32>
    %cst_134 = arith.constant dense<0.000000e+00> : vector<128x20xf32>
    %125 = tpu.matmul %122, %124, %cst_134 {dimension_numbers = #tpu.dot_dimension_numbers<[1], [0], [0], [1], [0, 0, 1, 1], [], []>} : vector<128x10xf32>, vector<10x20xf32>, vector<128x20xf32> -> vector<128x20xf32>
    %126 = arith.addf %120, %125 : vector<128x20xf32>
    %c0_135 = arith.constant 0 : index
    %c2_136 = arith.constant 2 : index
    %c1_137 = arith.constant 1 : index
    %c0_138 = arith.constant 0 : index
    %127 = vector.load %arg11[%c0_135, %c2_136, %c1_137, %c0_138] : memref<2x12x12x10xf32, #tpu.memory_space<vmem>>, vector<2x8x8x10xf32>
    %128 = vector.shape_cast %127 : vector<2x8x8x10xf32> to vector<128x10xf32>
    %c11_139 = arith.constant 11 : index
    %c0_140 = arith.constant 0 : index
    %c0_141 = arith.constant 0 : index
    %129 = vector.load %arg4[%c11_139, %c0_140, %c0_141] : memref<25x10x20xf32, #tpu.memory_space<vmem>>, vector<1x10x20xf32>
    %130 = vector.shape_cast %129 : vector<1x10x20xf32> to vector<10x20xf32>
    %cst_142 = arith.constant dense<0.000000e+00> : vector<128x20xf32>
    %131 = tpu.matmul %128, %130, %cst_142 {dimension_numbers = #tpu.dot_dimension_numbers<[1], [0], [0], [1], [0, 0, 1, 1], [], []>} : vector<128x10xf32>, vector<10x20xf32>, vector<128x20xf32> -> vector<128x20xf32>
    %132 = arith.addf %126, %131 : vector<128x20xf32>
    %c0_143 = arith.constant 0 : index
    %c2_144 = arith.constant 2 : index
    %c2_145 = arith.constant 2 : index
    %c0_146 = arith.constant 0 : index
    %133 = vector.load %arg11[%c0_143, %c2_144, %c2_145, %c0_146] : memref<2x12x12x10xf32, #tpu.memory_space<vmem>>, vector<2x8x8x10xf32>
    %134 = vector.shape_cast %133 : vector<2x8x8x10xf32> to vector<128x10xf32>
    %c12 = arith.constant 12 : index
    %c0_147 = arith.constant 0 : index
    %c0_148 = arith.constant 0 : index
    %135 = vector.load %arg4[%c12, %c0_147, %c0_148] : memref<25x10x20xf32, #tpu.memory_space<vmem>>, vector<1x10x20xf32>
    %136 = vector.shape_cast %135 : vector<1x10x20xf32> to vector<10x20xf32>
    %cst_149 = arith.constant dense<0.000000e+00> : vector<128x20xf32>
    %137 = tpu.matmul %134, %136, %cst_149 {dimension_numbers = #tpu.dot_dimension_numbers<[1], [0], [0], [1], [0, 0, 1, 1], [], []>} : vector<128x10xf32>, vector<10x20xf32>, vector<128x20xf32> -> vector<128x20xf32>
    %138 = arith.addf %132, %137 : vector<128x20xf32>
    %c0_150 = arith.constant 0 : index
    %c2_151 = arith.constant 2 : index
    %c3_152 = arith.constant 3 : index
    %c0_153 = arith.constant 0 : index
    %139 = vector.load %arg11[%c0_150, %c2_151, %c3_152, %c0_153] : memref<2x12x12x10xf32, #tpu.memory_space<vmem>>, vector<2x8x8x10xf32>
    %140 = vector.shape_cast %139 : vector<2x8x8x10xf32> to vector<128x10xf32>
    %c13 = arith.constant 13 : index
    %c0_154 = arith.constant 0 : index
    %c0_155 = arith.constant 0 : index
    %141 = vector.load %arg4[%c13, %c0_154, %c0_155] : memref<25x10x20xf32, #tpu.memory_space<vmem>>, vector<1x10x20xf32>
    %142 = vector.shape_cast %141 : vector<1x10x20xf32> to vector<10x20xf32>
    %cst_156 = arith.constant dense<0.000000e+00> : vector<128x20xf32>
    %143 = tpu.matmul %140, %142, %cst_156 {dimension_numbers = #tpu.dot_dimension_numbers<[1], [0], [0], [1], [0, 0, 1, 1], [], []>} : vector<128x10xf32>, vector<10x20xf32>, vector<128x20xf32> -> vector<128x20xf32>
    %144 = arith.addf %138, %143 : vector<128x20xf32>
    %c0_157 = arith.constant 0 : index
    %c2_158 = arith.constant 2 : index
    %c4_159 = arith.constant 4 : index
    %c0_160 = arith.constant 0 : index
    %145 = vector.load %arg11[%c0_157, %c2_158, %c4_159, %c0_160] : memref<2x12x12x10xf32, #tpu.memory_space<vmem>>, vector<2x8x8x10xf32>
    %146 = vector.shape_cast %145 : vector<2x8x8x10xf32> to vector<128x10xf32>
    %c14 = arith.constant 14 : index
    %c0_161 = arith.constant 0 : index
    %c0_162 = arith.constant 0 : index
    %147 = vector.load %arg4[%c14, %c0_161, %c0_162] : memref<25x10x20xf32, #tpu.memory_space<vmem>>, vector<1x10x20xf32>
    %148 = vector.shape_cast %147 : vector<1x10x20xf32> to vector<10x20xf32>
    %cst_163 = arith.constant dense<0.000000e+00> : vector<128x20xf32>
    %149 = tpu.matmul %146, %148, %cst_163 {dimension_numbers = #tpu.dot_dimension_numbers<[1], [0], [0], [1], [0, 0, 1, 1], [], []>} : vector<128x10xf32>, vector<10x20xf32>, vector<128x20xf32> -> vector<128x20xf32>
    %150 = arith.addf %144, %149 : vector<128x20xf32>
    %c0_164 = arith.constant 0 : index
    %c3_165 = arith.constant 3 : index
    %c0_166 = arith.constant 0 : index
    %c0_167 = arith.constant 0 : index
    %151 = vector.load %arg11[%c0_164, %c3_165, %c0_166, %c0_167] : memref<2x12x12x10xf32, #tpu.memory_space<vmem>>, vector<2x8x8x10xf32>
    %152 = vector.shape_cast %151 : vector<2x8x8x10xf32> to vector<128x10xf32>
    %c15 = arith.constant 15 : index
    %c0_168 = arith.constant 0 : index
    %c0_169 = arith.constant 0 : index
    %153 = vector.load %arg4[%c15, %c0_168, %c0_169] : memref<25x10x20xf32, #tpu.memory_space<vmem>>, vector<1x10x20xf32>
    %154 = vector.shape_cast %153 : vector<1x10x20xf32> to vector<10x20xf32>
    %cst_170 = arith.constant dense<0.000000e+00> : vector<128x20xf32>
    %155 = tpu.matmul %152, %154, %cst_170 {dimension_numbers = #tpu.dot_dimension_numbers<[1], [0], [0], [1], [0, 0, 1, 1], [], []>} : vector<128x10xf32>, vector<10x20xf32>, vector<128x20xf32> -> vector<128x20xf32>
    %156 = arith.addf %150, %155 : vector<128x20xf32>
    %c0_171 = arith.constant 0 : index
    %c3_172 = arith.constant 3 : index
    %c1_173 = arith.constant 1 : index
    %c0_174 = arith.constant 0 : index
    %157 = vector.load %arg11[%c0_171, %c3_172, %c1_173, %c0_174] : memref<2x12x12x10xf32, #tpu.memory_space<vmem>>, vector<2x8x8x10xf32>
    %158 = vector.shape_cast %157 : vector<2x8x8x10xf32> to vector<128x10xf32>
    %c16 = arith.constant 16 : index
    %c0_175 = arith.constant 0 : index
    %c0_176 = arith.constant 0 : index
    %159 = vector.load %arg4[%c16, %c0_175, %c0_176] : memref<25x10x20xf32, #tpu.memory_space<vmem>>, vector<1x10x20xf32>
    %160 = vector.shape_cast %159 : vector<1x10x20xf32> to vector<10x20xf32>
    %cst_177 = arith.constant dense<0.000000e+00> : vector<128x20xf32>
    %161 = tpu.matmul %158, %160, %cst_177 {dimension_numbers = #tpu.dot_dimension_numbers<[1], [0], [0], [1], [0, 0, 1, 1], [], []>} : vector<128x10xf32>, vector<10x20xf32>, vector<128x20xf32> -> vector<128x20xf32>
    %162 = arith.addf %156, %161 : vector<128x20xf32>
    %c0_178 = arith.constant 0 : index
    %c3_179 = arith.constant 3 : index
    %c2_180 = arith.constant 2 : index
    %c0_181 = arith.constant 0 : index
    %163 = vector.load %arg11[%c0_178, %c3_179, %c2_180, %c0_181] : memref<2x12x12x10xf32, #tpu.memory_space<vmem>>, vector<2x8x8x10xf32>
    %164 = vector.shape_cast %163 : vector<2x8x8x10xf32> to vector<128x10xf32>
    %c17 = arith.constant 17 : index
    %c0_182 = arith.constant 0 : index
    %c0_183 = arith.constant 0 : index
    %165 = vector.load %arg4[%c17, %c0_182, %c0_183] : memref<25x10x20xf32, #tpu.memory_space<vmem>>, vector<1x10x20xf32>
    %166 = vector.shape_cast %165 : vector<1x10x20xf32> to vector<10x20xf32>
    %cst_184 = arith.constant dense<0.000000e+00> : vector<128x20xf32>
    %167 = tpu.matmul %164, %166, %cst_184 {dimension_numbers = #tpu.dot_dimension_numbers<[1], [0], [0], [1], [0, 0, 1, 1], [], []>} : vector<128x10xf32>, vector<10x20xf32>, vector<128x20xf32> -> vector<128x20xf32>
    %168 = arith.addf %162, %167 : vector<128x20xf32>
    %c0_185 = arith.constant 0 : index
    %c3_186 = arith.constant 3 : index
    %c3_187 = arith.constant 3 : index
    %c0_188 = arith.constant 0 : index
    %169 = vector.load %arg11[%c0_185, %c3_186, %c3_187, %c0_188] : memref<2x12x12x10xf32, #tpu.memory_space<vmem>>, vector<2x8x8x10xf32>
    %170 = vector.shape_cast %169 : vector<2x8x8x10xf32> to vector<128x10xf32>
    %c18 = arith.constant 18 : index
    %c0_189 = arith.constant 0 : index
    %c0_190 = arith.constant 0 : index
    %171 = vector.load %arg4[%c18, %c0_189, %c0_190] : memref<25x10x20xf32, #tpu.memory_space<vmem>>, vector<1x10x20xf32>
    %172 = vector.shape_cast %171 : vector<1x10x20xf32> to vector<10x20xf32>
    %cst_191 = arith.constant dense<0.000000e+00> : vector<128x20xf32>
    %173 = tpu.matmul %170, %172, %cst_191 {dimension_numbers = #tpu.dot_dimension_numbers<[1], [0], [0], [1], [0, 0, 1, 1], [], []>} : vector<128x10xf32>, vector<10x20xf32>, vector<128x20xf32> -> vector<128x20xf32>
    %174 = arith.addf %168, %173 : vector<128x20xf32>
    %c0_192 = arith.constant 0 : index
    %c3_193 = arith.constant 3 : index
    %c4_194 = arith.constant 4 : index
    %c0_195 = arith.constant 0 : index
    %175 = vector.load %arg11[%c0_192, %c3_193, %c4_194, %c0_195] : memref<2x12x12x10xf32, #tpu.memory_space<vmem>>, vector<2x8x8x10xf32>
    %176 = vector.shape_cast %175 : vector<2x8x8x10xf32> to vector<128x10xf32>
    %c19 = arith.constant 19 : index
    %c0_196 = arith.constant 0 : index
    %c0_197 = arith.constant 0 : index
    %177 = vector.load %arg4[%c19, %c0_196, %c0_197] : memref<25x10x20xf32, #tpu.memory_space<vmem>>, vector<1x10x20xf32>
    %178 = vector.shape_cast %177 : vector<1x10x20xf32> to vector<10x20xf32>
    %cst_198 = arith.constant dense<0.000000e+00> : vector<128x20xf32>
    %179 = tpu.matmul %176, %178, %cst_198 {dimension_numbers = #tpu.dot_dimension_numbers<[1], [0], [0], [1], [0, 0, 1, 1], [], []>} : vector<128x10xf32>, vector<10x20xf32>, vector<128x20xf32> -> vector<128x20xf32>
    %180 = arith.addf %174, %179 : vector<128x20xf32>
    %c0_199 = arith.constant 0 : index
    %c4_200 = arith.constant 4 : index
    %c0_201 = arith.constant 0 : index
    %c0_202 = arith.constant 0 : index
    %181 = vector.load %arg11[%c0_199, %c4_200, %c0_201, %c0_202] : memref<2x12x12x10xf32, #tpu.memory_space<vmem>>, vector<2x8x8x10xf32>
    %182 = vector.shape_cast %181 : vector<2x8x8x10xf32> to vector<128x10xf32>
    %c20 = arith.constant 20 : index
    %c0_203 = arith.constant 0 : index
    %c0_204 = arith.constant 0 : index
    %183 = vector.load %arg4[%c20, %c0_203, %c0_204] : memref<25x10x20xf32, #tpu.memory_space<vmem>>, vector<1x10x20xf32>
    %184 = vector.shape_cast %183 : vector<1x10x20xf32> to vector<10x20xf32>
    %cst_205 = arith.constant dense<0.000000e+00> : vector<128x20xf32>
    %185 = tpu.matmul %182, %184, %cst_205 {dimension_numbers = #tpu.dot_dimension_numbers<[1], [0], [0], [1], [0, 0, 1, 1], [], []>} : vector<128x10xf32>, vector<10x20xf32>, vector<128x20xf32> -> vector<128x20xf32>
    %186 = arith.addf %180, %185 : vector<128x20xf32>
    %c0_206 = arith.constant 0 : index
    %c4_207 = arith.constant 4 : index
    %c1_208 = arith.constant 1 : index
    %c0_209 = arith.constant 0 : index
    %187 = vector.load %arg11[%c0_206, %c4_207, %c1_208, %c0_209] : memref<2x12x12x10xf32, #tpu.memory_space<vmem>>, vector<2x8x8x10xf32>
    %188 = vector.shape_cast %187 : vector<2x8x8x10xf32> to vector<128x10xf32>
    %c21 = arith.constant 21 : index
    %c0_210 = arith.constant 0 : index
    %c0_211 = arith.constant 0 : index
    %189 = vector.load %arg4[%c21, %c0_210, %c0_211] : memref<25x10x20xf32, #tpu.memory_space<vmem>>, vector<1x10x20xf32>
    %190 = vector.shape_cast %189 : vector<1x10x20xf32> to vector<10x20xf32>
    %cst_212 = arith.constant dense<0.000000e+00> : vector<128x20xf32>
    %191 = tpu.matmul %188, %190, %cst_212 {dimension_numbers = #tpu.dot_dimension_numbers<[1], [0], [0], [1], [0, 0, 1, 1], [], []>} : vector<128x10xf32>, vector<10x20xf32>, vector<128x20xf32> -> vector<128x20xf32>
    %192 = arith.addf %186, %191 : vector<128x20xf32>
    %c0_213 = arith.constant 0 : index
    %c4_214 = arith.constant 4 : index
    %c2_215 = arith.constant 2 : index
    %c0_216 = arith.constant 0 : index
    %193 = vector.load %arg11[%c0_213, %c4_214, %c2_215, %c0_216] : memref<2x12x12x10xf32, #tpu.memory_space<vmem>>, vector<2x8x8x10xf32>
    %194 = vector.shape_cast %193 : vector<2x8x8x10xf32> to vector<128x10xf32>
    %c22 = arith.constant 22 : index
    %c0_217 = arith.constant 0 : index
    %c0_218 = arith.constant 0 : index
    %195 = vector.load %arg4[%c22, %c0_217, %c0_218] : memref<25x10x20xf32, #tpu.memory_space<vmem>>, vector<1x10x20xf32>
    %196 = vector.shape_cast %195 : vector<1x10x20xf32> to vector<10x20xf32>
    %cst_219 = arith.constant dense<0.000000e+00> : vector<128x20xf32>
    %197 = tpu.matmul %194, %196, %cst_219 {dimension_numbers = #tpu.dot_dimension_numbers<[1], [0], [0], [1], [0, 0, 1, 1], [], []>} : vector<128x10xf32>, vector<10x20xf32>, vector<128x20xf32> -> vector<128x20xf32>
    %198 = arith.addf %192, %197 : vector<128x20xf32>
    %c0_220 = arith.constant 0 : index
    %c4_221 = arith.constant 4 : index
    %c3_222 = arith.constant 3 : index
    %c0_223 = arith.constant 0 : index
    %199 = vector.load %arg11[%c0_220, %c4_221, %c3_222, %c0_223] : memref<2x12x12x10xf32, #tpu.memory_space<vmem>>, vector<2x8x8x10xf32>
    %200 = vector.shape_cast %199 : vector<2x8x8x10xf32> to vector<128x10xf32>
    %c23 = arith.constant 23 : index
    %c0_224 = arith.constant 0 : index
    %c0_225 = arith.constant 0 : index
    %201 = vector.load %arg4[%c23, %c0_224, %c0_225] : memref<25x10x20xf32, #tpu.memory_space<vmem>>, vector<1x10x20xf32>
    %202 = vector.shape_cast %201 : vector<1x10x20xf32> to vector<10x20xf32>
    %cst_226 = arith.constant dense<0.000000e+00> : vector<128x20xf32>
    %203 = tpu.matmul %200, %202, %cst_226 {dimension_numbers = #tpu.dot_dimension_numbers<[1], [0], [0], [1], [0, 0, 1, 1], [], []>} : vector<128x10xf32>, vector<10x20xf32>, vector<128x20xf32> -> vector<128x20xf32>
    %204 = arith.addf %198, %203 : vector<128x20xf32>
    %c0_227 = arith.constant 0 : index
    %c4_228 = arith.constant 4 : index
    %c4_229 = arith.constant 4 : index
    %c0_230 = arith.constant 0 : index
    %205 = vector.load %arg11[%c0_227, %c4_228, %c4_229, %c0_230] : memref<2x12x12x10xf32, #tpu.memory_space<vmem>>, vector<2x8x8x10xf32>
    %206 = vector.shape_cast %205 : vector<2x8x8x10xf32> to vector<128x10xf32>
    %c24 = arith.constant 24 : index
    %c0_231 = arith.constant 0 : index
    %c0_232 = arith.constant 0 : index
    %207 = vector.load %arg4[%c24, %c0_231, %c0_232] : memref<25x10x20xf32, #tpu.memory_space<vmem>>, vector<1x10x20xf32>
    %208 = vector.shape_cast %207 : vector<1x10x20xf32> to vector<10x20xf32>
    %cst_233 = arith.constant dense<0.000000e+00> : vector<128x20xf32>
    %209 = tpu.matmul %206, %208, %cst_233 {dimension_numbers = #tpu.dot_dimension_numbers<[1], [0], [0], [1], [0, 0, 1, 1], [], []>} : vector<128x10xf32>, vector<10x20xf32>, vector<128x20xf32> -> vector<128x20xf32>
    %210 = arith.addf %204, %209 : vector<128x20xf32>
    %c0_234 = arith.constant 0 : index
    %c0_235 = arith.constant 0 : index
    %211 = vector.load %arg5[%c0_234, %c0_235] : memref<1x20xf32, #tpu.memory_space<vmem>>, vector<1x20xf32>
    %212 = vector.broadcast %211 : vector<1x20xf32> to vector<128x20xf32>
    %213 = arith.addf %210, %212 : vector<128x20xf32>
    %214 = vector.shape_cast %213 : vector<128x20xf32> to vector<2x8x8x20xf32>
    %cst_236 = arith.constant 0.000000e+00 : f32
    %215 = vector.broadcast %cst_236 : f32 to vector<2x50xf32>
    %216 = vector.extract_strided_slice %214 {offsets = [0, 0, 0, 0], sizes = [2, 1, 8, 20], strides = [1, 1, 1, 1]} : vector<2x8x8x20xf32> to vector<2x1x8x20xf32>
    %217 = vector.shape_cast %216 : vector<2x1x8x20xf32> to vector<2x8x20xf32>
    %218 = vector.extract_strided_slice %214 {offsets = [0, 1, 0, 0], sizes = [2, 1, 8, 20], strides = [1, 1, 1, 1]} : vector<2x8x8x20xf32> to vector<2x1x8x20xf32>
    %219 = vector.shape_cast %218 : vector<2x1x8x20xf32> to vector<2x8x20xf32>
    %220 = arith.maximumf %217, %219 : vector<2x8x20xf32>
    %221 = vector.extract_strided_slice %220 {offsets = [0, 0, 0], sizes = [2, 1, 20], strides = [1, 1, 1]} : vector<2x8x20xf32> to vector<2x1x20xf32>
    %222 = vector.shape_cast %221 : vector<2x1x20xf32> to vector<2x20xf32>
    %223 = vector.extract_strided_slice %220 {offsets = [0, 1, 0], sizes = [2, 1, 20], strides = [1, 1, 1]} : vector<2x8x20xf32> to vector<2x1x20xf32>
    %224 = vector.shape_cast %223 : vector<2x1x20xf32> to vector<2x20xf32>
    %225 = arith.maximumf %222, %224 : vector<2x20xf32>
    %cst_237 = arith.constant 0.000000e+00 : f32
    %226 = vector.broadcast %cst_237 : f32 to vector<2x20xf32>
    %227 = arith.maximumf %225, %226 : vector<2x20xf32>
    %c0_238 = arith.constant 0 : index
    %c0_239 = arith.constant 0 : index
    %c0_240 = arith.constant 0 : index
    %228 = vector.load %arg6[%c0_238, %c0_239, %c0_240] : memref<16x20x50xf32, #tpu.memory_space<vmem>>, vector<1x20x50xf32>
    %229 = vector.shape_cast %228 : vector<1x20x50xf32> to vector<20x50xf32>
    %cst_241 = arith.constant dense<0.000000e+00> : vector<2x50xf32>
    %230 = tpu.matmul %227, %229, %cst_241 {dimension_numbers = #tpu.dot_dimension_numbers<[1], [0], [0], [1], [0, 0, 1, 1], [], []>} : vector<2x20xf32>, vector<20x50xf32>, vector<2x50xf32> -> vector<2x50xf32>
    %231 = arith.addf %215, %230 : vector<2x50xf32>
    %232 = vector.extract_strided_slice %220 {offsets = [0, 2, 0], sizes = [2, 1, 20], strides = [1, 1, 1]} : vector<2x8x20xf32> to vector<2x1x20xf32>
    %233 = vector.shape_cast %232 : vector<2x1x20xf32> to vector<2x20xf32>
    %234 = vector.extract_strided_slice %220 {offsets = [0, 3, 0], sizes = [2, 1, 20], strides = [1, 1, 1]} : vector<2x8x20xf32> to vector<2x1x20xf32>
    %235 = vector.shape_cast %234 : vector<2x1x20xf32> to vector<2x20xf32>
    %236 = arith.maximumf %233, %235 : vector<2x20xf32>
    %cst_242 = arith.constant 0.000000e+00 : f32
    %237 = vector.broadcast %cst_242 : f32 to vector<2x20xf32>
    %238 = arith.maximumf %236, %237 : vector<2x20xf32>
    %c1_243 = arith.constant 1 : index
    %c0_244 = arith.constant 0 : index
    %c0_245 = arith.constant 0 : index
    %239 = vector.load %arg6[%c1_243, %c0_244, %c0_245] : memref<16x20x50xf32, #tpu.memory_space<vmem>>, vector<1x20x50xf32>
    %240 = vector.shape_cast %239 : vector<1x20x50xf32> to vector<20x50xf32>
    %cst_246 = arith.constant dense<0.000000e+00> : vector<2x50xf32>
    %241 = tpu.matmul %238, %240, %cst_246 {dimension_numbers = #tpu.dot_dimension_numbers<[1], [0], [0], [1], [0, 0, 1, 1], [], []>} : vector<2x20xf32>, vector<20x50xf32>, vector<2x50xf32> -> vector<2x50xf32>
    %242 = arith.addf %231, %241 : vector<2x50xf32>
    %243 = vector.extract_strided_slice %220 {offsets = [0, 4, 0], sizes = [2, 1, 20], strides = [1, 1, 1]} : vector<2x8x20xf32> to vector<2x1x20xf32>
    %244 = vector.shape_cast %243 : vector<2x1x20xf32> to vector<2x20xf32>
    %245 = vector.extract_strided_slice %220 {offsets = [0, 5, 0], sizes = [2, 1, 20], strides = [1, 1, 1]} : vector<2x8x20xf32> to vector<2x1x20xf32>
    %246 = vector.shape_cast %245 : vector<2x1x20xf32> to vector<2x20xf32>
    %247 = arith.maximumf %244, %246 : vector<2x20xf32>
    %cst_247 = arith.constant 0.000000e+00 : f32
    %248 = vector.broadcast %cst_247 : f32 to vector<2x20xf32>
    %249 = arith.maximumf %247, %248 : vector<2x20xf32>
    %c2_248 = arith.constant 2 : index
    %c0_249 = arith.constant 0 : index
    %c0_250 = arith.constant 0 : index
    %250 = vector.load %arg6[%c2_248, %c0_249, %c0_250] : memref<16x20x50xf32, #tpu.memory_space<vmem>>, vector<1x20x50xf32>
    %251 = vector.shape_cast %250 : vector<1x20x50xf32> to vector<20x50xf32>
    %cst_251 = arith.constant dense<0.000000e+00> : vector<2x50xf32>
    %252 = tpu.matmul %249, %251, %cst_251 {dimension_numbers = #tpu.dot_dimension_numbers<[1], [0], [0], [1], [0, 0, 1, 1], [], []>} : vector<2x20xf32>, vector<20x50xf32>, vector<2x50xf32> -> vector<2x50xf32>
    %253 = arith.addf %242, %252 : vector<2x50xf32>
    %254 = vector.extract_strided_slice %220 {offsets = [0, 6, 0], sizes = [2, 1, 20], strides = [1, 1, 1]} : vector<2x8x20xf32> to vector<2x1x20xf32>
    %255 = vector.shape_cast %254 : vector<2x1x20xf32> to vector<2x20xf32>
    %256 = vector.extract_strided_slice %220 {offsets = [0, 7, 0], sizes = [2, 1, 20], strides = [1, 1, 1]} : vector<2x8x20xf32> to vector<2x1x20xf32>
    %257 = vector.shape_cast %256 : vector<2x1x20xf32> to vector<2x20xf32>
    %258 = arith.maximumf %255, %257 : vector<2x20xf32>
    %cst_252 = arith.constant 0.000000e+00 : f32
    %259 = vector.broadcast %cst_252 : f32 to vector<2x20xf32>
    %260 = arith.maximumf %258, %259 : vector<2x20xf32>
    %c3_253 = arith.constant 3 : index
    %c0_254 = arith.constant 0 : index
    %c0_255 = arith.constant 0 : index
    %261 = vector.load %arg6[%c3_253, %c0_254, %c0_255] : memref<16x20x50xf32, #tpu.memory_space<vmem>>, vector<1x20x50xf32>
    %262 = vector.shape_cast %261 : vector<1x20x50xf32> to vector<20x50xf32>
    %cst_256 = arith.constant dense<0.000000e+00> : vector<2x50xf32>
    %263 = tpu.matmul %260, %262, %cst_256 {dimension_numbers = #tpu.dot_dimension_numbers<[1], [0], [0], [1], [0, 0, 1, 1], [], []>} : vector<2x20xf32>, vector<20x50xf32>, vector<2x50xf32> -> vector<2x50xf32>
    %264 = arith.addf %253, %263 : vector<2x50xf32>
    %265 = vector.extract_strided_slice %214 {offsets = [0, 2, 0, 0], sizes = [2, 1, 8, 20], strides = [1, 1, 1, 1]} : vector<2x8x8x20xf32> to vector<2x1x8x20xf32>
    %266 = vector.shape_cast %265 : vector<2x1x8x20xf32> to vector<2x8x20xf32>
    %267 = vector.extract_strided_slice %214 {offsets = [0, 3, 0, 0], sizes = [2, 1, 8, 20], strides = [1, 1, 1, 1]} : vector<2x8x8x20xf32> to vector<2x1x8x20xf32>
    %268 = vector.shape_cast %267 : vector<2x1x8x20xf32> to vector<2x8x20xf32>
    %269 = arith.maximumf %266, %268 : vector<2x8x20xf32>
    %270 = vector.extract_strided_slice %269 {offsets = [0, 0, 0], sizes = [2, 1, 20], strides = [1, 1, 1]} : vector<2x8x20xf32> to vector<2x1x20xf32>
    %271 = vector.shape_cast %270 : vector<2x1x20xf32> to vector<2x20xf32>
    %272 = vector.extract_strided_slice %269 {offsets = [0, 1, 0], sizes = [2, 1, 20], strides = [1, 1, 1]} : vector<2x8x20xf32> to vector<2x1x20xf32>
    %273 = vector.shape_cast %272 : vector<2x1x20xf32> to vector<2x20xf32>
    %274 = arith.maximumf %271, %273 : vector<2x20xf32>
    %cst_257 = arith.constant 0.000000e+00 : f32
    %275 = vector.broadcast %cst_257 : f32 to vector<2x20xf32>
    %276 = arith.maximumf %274, %275 : vector<2x20xf32>
    %c4_258 = arith.constant 4 : index
    %c0_259 = arith.constant 0 : index
    %c0_260 = arith.constant 0 : index
    %277 = vector.load %arg6[%c4_258, %c0_259, %c0_260] : memref<16x20x50xf32, #tpu.memory_space<vmem>>, vector<1x20x50xf32>
    %278 = vector.shape_cast %277 : vector<1x20x50xf32> to vector<20x50xf32>
    %cst_261 = arith.constant dense<0.000000e+00> : vector<2x50xf32>
    %279 = tpu.matmul %276, %278, %cst_261 {dimension_numbers = #tpu.dot_dimension_numbers<[1], [0], [0], [1], [0, 0, 1, 1], [], []>} : vector<2x20xf32>, vector<20x50xf32>, vector<2x50xf32> -> vector<2x50xf32>
    %280 = arith.addf %264, %279 : vector<2x50xf32>
    %281 = vector.extract_strided_slice %269 {offsets = [0, 2, 0], sizes = [2, 1, 20], strides = [1, 1, 1]} : vector<2x8x20xf32> to vector<2x1x20xf32>
    %282 = vector.shape_cast %281 : vector<2x1x20xf32> to vector<2x20xf32>
    %283 = vector.extract_strided_slice %269 {offsets = [0, 3, 0], sizes = [2, 1, 20], strides = [1, 1, 1]} : vector<2x8x20xf32> to vector<2x1x20xf32>
    %284 = vector.shape_cast %283 : vector<2x1x20xf32> to vector<2x20xf32>
    %285 = arith.maximumf %282, %284 : vector<2x20xf32>
    %cst_262 = arith.constant 0.000000e+00 : f32
    %286 = vector.broadcast %cst_262 : f32 to vector<2x20xf32>
    %287 = arith.maximumf %285, %286 : vector<2x20xf32>
    %c5_263 = arith.constant 5 : index
    %c0_264 = arith.constant 0 : index
    %c0_265 = arith.constant 0 : index
    %288 = vector.load %arg6[%c5_263, %c0_264, %c0_265] : memref<16x20x50xf32, #tpu.memory_space<vmem>>, vector<1x20x50xf32>
    %289 = vector.shape_cast %288 : vector<1x20x50xf32> to vector<20x50xf32>
    %cst_266 = arith.constant dense<0.000000e+00> : vector<2x50xf32>
    %290 = tpu.matmul %287, %289, %cst_266 {dimension_numbers = #tpu.dot_dimension_numbers<[1], [0], [0], [1], [0, 0, 1, 1], [], []>} : vector<2x20xf32>, vector<20x50xf32>, vector<2x50xf32> -> vector<2x50xf32>
    %291 = arith.addf %280, %290 : vector<2x50xf32>
    %292 = vector.extract_strided_slice %269 {offsets = [0, 4, 0], sizes = [2, 1, 20], strides = [1, 1, 1]} : vector<2x8x20xf32> to vector<2x1x20xf32>
    %293 = vector.shape_cast %292 : vector<2x1x20xf32> to vector<2x20xf32>
    %294 = vector.extract_strided_slice %269 {offsets = [0, 5, 0], sizes = [2, 1, 20], strides = [1, 1, 1]} : vector<2x8x20xf32> to vector<2x1x20xf32>
    %295 = vector.shape_cast %294 : vector<2x1x20xf32> to vector<2x20xf32>
    %296 = arith.maximumf %293, %295 : vector<2x20xf32>
    %cst_267 = arith.constant 0.000000e+00 : f32
    %297 = vector.broadcast %cst_267 : f32 to vector<2x20xf32>
    %298 = arith.maximumf %296, %297 : vector<2x20xf32>
    %c6_268 = arith.constant 6 : index
    %c0_269 = arith.constant 0 : index
    %c0_270 = arith.constant 0 : index
    %299 = vector.load %arg6[%c6_268, %c0_269, %c0_270] : memref<16x20x50xf32, #tpu.memory_space<vmem>>, vector<1x20x50xf32>
    %300 = vector.shape_cast %299 : vector<1x20x50xf32> to vector<20x50xf32>
    %cst_271 = arith.constant dense<0.000000e+00> : vector<2x50xf32>
    %301 = tpu.matmul %298, %300, %cst_271 {dimension_numbers = #tpu.dot_dimension_numbers<[1], [0], [0], [1], [0, 0, 1, 1], [], []>} : vector<2x20xf32>, vector<20x50xf32>, vector<2x50xf32> -> vector<2x50xf32>
    %302 = arith.addf %291, %301 : vector<2x50xf32>
    %303 = vector.extract_strided_slice %269 {offsets = [0, 6, 0], sizes = [2, 1, 20], strides = [1, 1, 1]} : vector<2x8x20xf32> to vector<2x1x20xf32>
    %304 = vector.shape_cast %303 : vector<2x1x20xf32> to vector<2x20xf32>
    %305 = vector.extract_strided_slice %269 {offsets = [0, 7, 0], sizes = [2, 1, 20], strides = [1, 1, 1]} : vector<2x8x20xf32> to vector<2x1x20xf32>
    %306 = vector.shape_cast %305 : vector<2x1x20xf32> to vector<2x20xf32>
    %307 = arith.maximumf %304, %306 : vector<2x20xf32>
    %cst_272 = arith.constant 0.000000e+00 : f32
    %308 = vector.broadcast %cst_272 : f32 to vector<2x20xf32>
    %309 = arith.maximumf %307, %308 : vector<2x20xf32>
    %c7_273 = arith.constant 7 : index
    %c0_274 = arith.constant 0 : index
    %c0_275 = arith.constant 0 : index
    %310 = vector.load %arg6[%c7_273, %c0_274, %c0_275] : memref<16x20x50xf32, #tpu.memory_space<vmem>>, vector<1x20x50xf32>
    %311 = vector.shape_cast %310 : vector<1x20x50xf32> to vector<20x50xf32>
    %cst_276 = arith.constant dense<0.000000e+00> : vector<2x50xf32>
    %312 = tpu.matmul %309, %311, %cst_276 {dimension_numbers = #tpu.dot_dimension_numbers<[1], [0], [0], [1], [0, 0, 1, 1], [], []>} : vector<2x20xf32>, vector<20x50xf32>, vector<2x50xf32> -> vector<2x50xf32>
    %313 = arith.addf %302, %312 : vector<2x50xf32>
    %314 = vector.extract_strided_slice %214 {offsets = [0, 4, 0, 0], sizes = [2, 1, 8, 20], strides = [1, 1, 1, 1]} : vector<2x8x8x20xf32> to vector<2x1x8x20xf32>
    %315 = vector.shape_cast %314 : vector<2x1x8x20xf32> to vector<2x8x20xf32>
    %316 = vector.extract_strided_slice %214 {offsets = [0, 5, 0, 0], sizes = [2, 1, 8, 20], strides = [1, 1, 1, 1]} : vector<2x8x8x20xf32> to vector<2x1x8x20xf32>
    %317 = vector.shape_cast %316 : vector<2x1x8x20xf32> to vector<2x8x20xf32>
    %318 = arith.maximumf %315, %317 : vector<2x8x20xf32>
    %319 = vector.extract_strided_slice %318 {offsets = [0, 0, 0], sizes = [2, 1, 20], strides = [1, 1, 1]} : vector<2x8x20xf32> to vector<2x1x20xf32>
    %320 = vector.shape_cast %319 : vector<2x1x20xf32> to vector<2x20xf32>
    %321 = vector.extract_strided_slice %318 {offsets = [0, 1, 0], sizes = [2, 1, 20], strides = [1, 1, 1]} : vector<2x8x20xf32> to vector<2x1x20xf32>
    %322 = vector.shape_cast %321 : vector<2x1x20xf32> to vector<2x20xf32>
    %323 = arith.maximumf %320, %322 : vector<2x20xf32>
    %cst_277 = arith.constant 0.000000e+00 : f32
    %324 = vector.broadcast %cst_277 : f32 to vector<2x20xf32>
    %325 = arith.maximumf %323, %324 : vector<2x20xf32>
    %c8_278 = arith.constant 8 : index
    %c0_279 = arith.constant 0 : index
    %c0_280 = arith.constant 0 : index
    %326 = vector.load %arg6[%c8_278, %c0_279, %c0_280] : memref<16x20x50xf32, #tpu.memory_space<vmem>>, vector<1x20x50xf32>
    %327 = vector.shape_cast %326 : vector<1x20x50xf32> to vector<20x50xf32>
    %cst_281 = arith.constant dense<0.000000e+00> : vector<2x50xf32>
    %328 = tpu.matmul %325, %327, %cst_281 {dimension_numbers = #tpu.dot_dimension_numbers<[1], [0], [0], [1], [0, 0, 1, 1], [], []>} : vector<2x20xf32>, vector<20x50xf32>, vector<2x50xf32> -> vector<2x50xf32>
    %329 = arith.addf %313, %328 : vector<2x50xf32>
    %330 = vector.extract_strided_slice %318 {offsets = [0, 2, 0], sizes = [2, 1, 20], strides = [1, 1, 1]} : vector<2x8x20xf32> to vector<2x1x20xf32>
    %331 = vector.shape_cast %330 : vector<2x1x20xf32> to vector<2x20xf32>
    %332 = vector.extract_strided_slice %318 {offsets = [0, 3, 0], sizes = [2, 1, 20], strides = [1, 1, 1]} : vector<2x8x20xf32> to vector<2x1x20xf32>
    %333 = vector.shape_cast %332 : vector<2x1x20xf32> to vector<2x20xf32>
    %334 = arith.maximumf %331, %333 : vector<2x20xf32>
    %cst_282 = arith.constant 0.000000e+00 : f32
    %335 = vector.broadcast %cst_282 : f32 to vector<2x20xf32>
    %336 = arith.maximumf %334, %335 : vector<2x20xf32>
    %c9_283 = arith.constant 9 : index
    %c0_284 = arith.constant 0 : index
    %c0_285 = arith.constant 0 : index
    %337 = vector.load %arg6[%c9_283, %c0_284, %c0_285] : memref<16x20x50xf32, #tpu.memory_space<vmem>>, vector<1x20x50xf32>
    %338 = vector.shape_cast %337 : vector<1x20x50xf32> to vector<20x50xf32>
    %cst_286 = arith.constant dense<0.000000e+00> : vector<2x50xf32>
    %339 = tpu.matmul %336, %338, %cst_286 {dimension_numbers = #tpu.dot_dimension_numbers<[1], [0], [0], [1], [0, 0, 1, 1], [], []>} : vector<2x20xf32>, vector<20x50xf32>, vector<2x50xf32> -> vector<2x50xf32>
    %340 = arith.addf %329, %339 : vector<2x50xf32>
    %341 = vector.extract_strided_slice %318 {offsets = [0, 4, 0], sizes = [2, 1, 20], strides = [1, 1, 1]} : vector<2x8x20xf32> to vector<2x1x20xf32>
    %342 = vector.shape_cast %341 : vector<2x1x20xf32> to vector<2x20xf32>
    %343 = vector.extract_strided_slice %318 {offsets = [0, 5, 0], sizes = [2, 1, 20], strides = [1, 1, 1]} : vector<2x8x20xf32> to vector<2x1x20xf32>
    %344 = vector.shape_cast %343 : vector<2x1x20xf32> to vector<2x20xf32>
    %345 = arith.maximumf %342, %344 : vector<2x20xf32>
    %cst_287 = arith.constant 0.000000e+00 : f32
    %346 = vector.broadcast %cst_287 : f32 to vector<2x20xf32>
    %347 = arith.maximumf %345, %346 : vector<2x20xf32>
    %c10_288 = arith.constant 10 : index
    %c0_289 = arith.constant 0 : index
    %c0_290 = arith.constant 0 : index
    %348 = vector.load %arg6[%c10_288, %c0_289, %c0_290] : memref<16x20x50xf32, #tpu.memory_space<vmem>>, vector<1x20x50xf32>
    %349 = vector.shape_cast %348 : vector<1x20x50xf32> to vector<20x50xf32>
    %cst_291 = arith.constant dense<0.000000e+00> : vector<2x50xf32>
    %350 = tpu.matmul %347, %349, %cst_291 {dimension_numbers = #tpu.dot_dimension_numbers<[1], [0], [0], [1], [0, 0, 1, 1], [], []>} : vector<2x20xf32>, vector<20x50xf32>, vector<2x50xf32> -> vector<2x50xf32>
    %351 = arith.addf %340, %350 : vector<2x50xf32>
    %352 = vector.extract_strided_slice %318 {offsets = [0, 6, 0], sizes = [2, 1, 20], strides = [1, 1, 1]} : vector<2x8x20xf32> to vector<2x1x20xf32>
    %353 = vector.shape_cast %352 : vector<2x1x20xf32> to vector<2x20xf32>
    %354 = vector.extract_strided_slice %318 {offsets = [0, 7, 0], sizes = [2, 1, 20], strides = [1, 1, 1]} : vector<2x8x20xf32> to vector<2x1x20xf32>
    %355 = vector.shape_cast %354 : vector<2x1x20xf32> to vector<2x20xf32>
    %356 = arith.maximumf %353, %355 : vector<2x20xf32>
    %cst_292 = arith.constant 0.000000e+00 : f32
    %357 = vector.broadcast %cst_292 : f32 to vector<2x20xf32>
    %358 = arith.maximumf %356, %357 : vector<2x20xf32>
    %c11_293 = arith.constant 11 : index
    %c0_294 = arith.constant 0 : index
    %c0_295 = arith.constant 0 : index
    %359 = vector.load %arg6[%c11_293, %c0_294, %c0_295] : memref<16x20x50xf32, #tpu.memory_space<vmem>>, vector<1x20x50xf32>
    %360 = vector.shape_cast %359 : vector<1x20x50xf32> to vector<20x50xf32>
    %cst_296 = arith.constant dense<0.000000e+00> : vector<2x50xf32>
    %361 = tpu.matmul %358, %360, %cst_296 {dimension_numbers = #tpu.dot_dimension_numbers<[1], [0], [0], [1], [0, 0, 1, 1], [], []>} : vector<2x20xf32>, vector<20x50xf32>, vector<2x50xf32> -> vector<2x50xf32>
    %362 = arith.addf %351, %361 : vector<2x50xf32>
    %363 = vector.extract_strided_slice %214 {offsets = [0, 6, 0, 0], sizes = [2, 1, 8, 20], strides = [1, 1, 1, 1]} : vector<2x8x8x20xf32> to vector<2x1x8x20xf32>
    %364 = vector.shape_cast %363 : vector<2x1x8x20xf32> to vector<2x8x20xf32>
    %365 = vector.extract_strided_slice %214 {offsets = [0, 7, 0, 0], sizes = [2, 1, 8, 20], strides = [1, 1, 1, 1]} : vector<2x8x8x20xf32> to vector<2x1x8x20xf32>
    %366 = vector.shape_cast %365 : vector<2x1x8x20xf32> to vector<2x8x20xf32>
    %367 = arith.maximumf %364, %366 : vector<2x8x20xf32>
    %368 = vector.extract_strided_slice %367 {offsets = [0, 0, 0], sizes = [2, 1, 20], strides = [1, 1, 1]} : vector<2x8x20xf32> to vector<2x1x20xf32>
    %369 = vector.shape_cast %368 : vector<2x1x20xf32> to vector<2x20xf32>
    %370 = vector.extract_strided_slice %367 {offsets = [0, 1, 0], sizes = [2, 1, 20], strides = [1, 1, 1]} : vector<2x8x20xf32> to vector<2x1x20xf32>
    %371 = vector.shape_cast %370 : vector<2x1x20xf32> to vector<2x20xf32>
    %372 = arith.maximumf %369, %371 : vector<2x20xf32>
    %cst_297 = arith.constant 0.000000e+00 : f32
    %373 = vector.broadcast %cst_297 : f32 to vector<2x20xf32>
    %374 = arith.maximumf %372, %373 : vector<2x20xf32>
    %c12_298 = arith.constant 12 : index
    %c0_299 = arith.constant 0 : index
    %c0_300 = arith.constant 0 : index
    %375 = vector.load %arg6[%c12_298, %c0_299, %c0_300] : memref<16x20x50xf32, #tpu.memory_space<vmem>>, vector<1x20x50xf32>
    %376 = vector.shape_cast %375 : vector<1x20x50xf32> to vector<20x50xf32>
    %cst_301 = arith.constant dense<0.000000e+00> : vector<2x50xf32>
    %377 = tpu.matmul %374, %376, %cst_301 {dimension_numbers = #tpu.dot_dimension_numbers<[1], [0], [0], [1], [0, 0, 1, 1], [], []>} : vector<2x20xf32>, vector<20x50xf32>, vector<2x50xf32> -> vector<2x50xf32>
    %378 = arith.addf %362, %377 : vector<2x50xf32>
    %379 = vector.extract_strided_slice %367 {offsets = [0, 2, 0], sizes = [2, 1, 20], strides = [1, 1, 1]} : vector<2x8x20xf32> to vector<2x1x20xf32>
    %380 = vector.shape_cast %379 : vector<2x1x20xf32> to vector<2x20xf32>
    %381 = vector.extract_strided_slice %367 {offsets = [0, 3, 0], sizes = [2, 1, 20], strides = [1, 1, 1]} : vector<2x8x20xf32> to vector<2x1x20xf32>
    %382 = vector.shape_cast %381 : vector<2x1x20xf32> to vector<2x20xf32>
    %383 = arith.maximumf %380, %382 : vector<2x20xf32>
    %cst_302 = arith.constant 0.000000e+00 : f32
    %384 = vector.broadcast %cst_302 : f32 to vector<2x20xf32>
    %385 = arith.maximumf %383, %384 : vector<2x20xf32>
    %c13_303 = arith.constant 13 : index
    %c0_304 = arith.constant 0 : index
    %c0_305 = arith.constant 0 : index
    %386 = vector.load %arg6[%c13_303, %c0_304, %c0_305] : memref<16x20x50xf32, #tpu.memory_space<vmem>>, vector<1x20x50xf32>
    %387 = vector.shape_cast %386 : vector<1x20x50xf32> to vector<20x50xf32>
    %cst_306 = arith.constant dense<0.000000e+00> : vector<2x50xf32>
    %388 = tpu.matmul %385, %387, %cst_306 {dimension_numbers = #tpu.dot_dimension_numbers<[1], [0], [0], [1], [0, 0, 1, 1], [], []>} : vector<2x20xf32>, vector<20x50xf32>, vector<2x50xf32> -> vector<2x50xf32>
    %389 = arith.addf %378, %388 : vector<2x50xf32>
    %390 = vector.extract_strided_slice %367 {offsets = [0, 4, 0], sizes = [2, 1, 20], strides = [1, 1, 1]} : vector<2x8x20xf32> to vector<2x1x20xf32>
    %391 = vector.shape_cast %390 : vector<2x1x20xf32> to vector<2x20xf32>
    %392 = vector.extract_strided_slice %367 {offsets = [0, 5, 0], sizes = [2, 1, 20], strides = [1, 1, 1]} : vector<2x8x20xf32> to vector<2x1x20xf32>
    %393 = vector.shape_cast %392 : vector<2x1x20xf32> to vector<2x20xf32>
    %394 = arith.maximumf %391, %393 : vector<2x20xf32>
    %cst_307 = arith.constant 0.000000e+00 : f32
    %395 = vector.broadcast %cst_307 : f32 to vector<2x20xf32>
    %396 = arith.maximumf %394, %395 : vector<2x20xf32>
    %c14_308 = arith.constant 14 : index
    %c0_309 = arith.constant 0 : index
    %c0_310 = arith.constant 0 : index
    %397 = vector.load %arg6[%c14_308, %c0_309, %c0_310] : memref<16x20x50xf32, #tpu.memory_space<vmem>>, vector<1x20x50xf32>
    %398 = vector.shape_cast %397 : vector<1x20x50xf32> to vector<20x50xf32>
    %cst_311 = arith.constant dense<0.000000e+00> : vector<2x50xf32>
    %399 = tpu.matmul %396, %398, %cst_311 {dimension_numbers = #tpu.dot_dimension_numbers<[1], [0], [0], [1], [0, 0, 1, 1], [], []>} : vector<2x20xf32>, vector<20x50xf32>, vector<2x50xf32> -> vector<2x50xf32>
    %400 = arith.addf %389, %399 : vector<2x50xf32>
    %401 = vector.extract_strided_slice %367 {offsets = [0, 6, 0], sizes = [2, 1, 20], strides = [1, 1, 1]} : vector<2x8x20xf32> to vector<2x1x20xf32>
    %402 = vector.shape_cast %401 : vector<2x1x20xf32> to vector<2x20xf32>
    %403 = vector.extract_strided_slice %367 {offsets = [0, 7, 0], sizes = [2, 1, 20], strides = [1, 1, 1]} : vector<2x8x20xf32> to vector<2x1x20xf32>
    %404 = vector.shape_cast %403 : vector<2x1x20xf32> to vector<2x20xf32>
    %405 = arith.maximumf %402, %404 : vector<2x20xf32>
    %cst_312 = arith.constant 0.000000e+00 : f32
    %406 = vector.broadcast %cst_312 : f32 to vector<2x20xf32>
    %407 = arith.maximumf %405, %406 : vector<2x20xf32>
    %c15_313 = arith.constant 15 : index
    %c0_314 = arith.constant 0 : index
    %c0_315 = arith.constant 0 : index
    %408 = vector.load %arg6[%c15_313, %c0_314, %c0_315] : memref<16x20x50xf32, #tpu.memory_space<vmem>>, vector<1x20x50xf32>
    %409 = vector.shape_cast %408 : vector<1x20x50xf32> to vector<20x50xf32>
    %cst_316 = arith.constant dense<0.000000e+00> : vector<2x50xf32>
    %410 = tpu.matmul %407, %409, %cst_316 {dimension_numbers = #tpu.dot_dimension_numbers<[1], [0], [0], [1], [0, 0, 1, 1], [], []>} : vector<2x20xf32>, vector<20x50xf32>, vector<2x50xf32> -> vector<2x50xf32>
    %411 = arith.addf %400, %410 : vector<2x50xf32>
    %c0_317 = arith.constant 0 : index
    %c0_318 = arith.constant 0 : index
    %412 = vector.load %arg7[%c0_317, %c0_318] : memref<1x50xf32, #tpu.memory_space<vmem>>, vector<1x50xf32>
    %413 = vector.broadcast %412 : vector<1x50xf32> to vector<2x50xf32>
    %414 = arith.addf %411, %413 : vector<2x50xf32>
    %cst_319 = arith.constant 0.000000e+00 : f32
    %415 = vector.broadcast %cst_319 : f32 to vector<2x50xf32>
    %416 = arith.maximumf %414, %415 : vector<2x50xf32>
    %c0_320 = arith.constant 0 : index
    %c0_321 = arith.constant 0 : index
    %417 = vector.load %arg8[%c0_320, %c0_321] : memref<50x10xf32, #tpu.memory_space<vmem>>, vector<50x10xf32>
    %cst_322 = arith.constant dense<0.000000e+00> : vector<2x10xf32>
    %418 = tpu.matmul %416, %417, %cst_322 {dimension_numbers = #tpu.dot_dimension_numbers<[1], [0], [0], [1], [0, 0, 1, 1], [], []>} : vector<2x50xf32>, vector<50x10xf32>, vector<2x10xf32> -> vector<2x10xf32>
    %c0_323 = arith.constant 0 : index
    %c0_324 = arith.constant 0 : index
    %419 = vector.load %arg9[%c0_323, %c0_324] : memref<1x10xf32, #tpu.memory_space<vmem>>, vector<1x10xf32>
    %420 = vector.broadcast %419 : vector<1x10xf32> to vector<2x10xf32>
    %421 = arith.addf %418, %420 : vector<2x10xf32>
    %cst_325 = arith.constant dense<0xFF800000> : vector<2xf32>
    %422 = vector.multi_reduction <maximumf>, %421, %cst_325 [1] : vector<2x10xf32> to vector<2xf32>
    %423 = vector.shape_cast %422 : vector<2xf32> to vector<2x1xf32>
    %424 = vector.broadcast %423 : vector<2x1xf32> to vector<2x10xf32>
    %425 = arith.subf %421, %424 : vector<2x10xf32>
    %426 = math.exp %425 : vector<2x10xf32>
    %cst_326 = arith.constant dense<0.000000e+00> : vector<2xf32>
    %427 = vector.multi_reduction <add>, %426, %cst_326 [1] : vector<2x10xf32> to vector<2xf32>
    %428 = vector.shape_cast %427 : vector<2xf32> to vector<2x1xf32>
    %429 = math.log %428 : vector<2x1xf32>
    %430 = arith.addf %429, %423 : vector<2x1xf32>
    %431 = vector.broadcast %430 : vector<2x1xf32> to vector<2x10xf32>
    %432 = arith.subf %421, %431 : vector<2x10xf32>
    %c0_327 = arith.constant 0 : index
    %c0_328 = arith.constant 0 : index
    %433 = vector.load %arg10[%c0_327, %c0_328] : memref<2x10xf32, #tpu.memory_space<vmem>>, vector<2x10xf32>
    tpu.vector_store %arg10[%c0_327, %c0_328], %432 {strides = array<i32>} : memref<2x10xf32, #tpu.memory_space<vmem>>, vector<2x10xf32>,
    return
  }
  func.func @transform_0(%arg0: i32) -> (i32, i32, i32, i32) {
    %c0_i32 = arith.constant 0 : i32
    %c0_i32_0 = arith.constant 0 : i32
    %c0_i32_1 = arith.constant 0 : i32
    %c0_i32_2 = arith.constant 0 : i32
    return %c0_i32, %arg0, %c0_i32_0, %c0_i32_1 : i32, i32, i32, i32
  }
  func.func @transform_1(%arg0: i32) -> (i32, i32) {
    %c0_i32 = arith.constant 0 : i32
    %c0_i32_0 = arith.constant 0 : i32
    %c0_i32_1 = arith.constant 0 : i32
    return %c0_i32, %c0_i32_0 : i32, i32
  }
  func.func @transform_2(%arg0: i32) -> (i32, i32) {
    %c0_i32 = arith.constant 0 : i32
    %c0_i32_0 = arith.constant 0 : i32
    %c0_i32_1 = arith.constant 0 : i32
    return %c0_i32, %c0_i32_0 : i32, i32
  }
  func.func @transform_3(%arg0: i32) -> (i32, i32, i32) {
    %c0_i32 = arith.constant 0 : i32
    %c0_i32_0 = arith.constant 0 : i32
    %c0_i32_1 = arith.constant 0 : i32
    %c0_i32_2 = arith.constant 0 : i32
    return %c0_i32, %c0_i32_0, %c0_i32_1 : i32, i32, i32
  }
  func.func @transform_4(%arg0: i32) -> (i32, i32) {
    %c0_i32 = arith.constant 0 : i32
    %c0_i32_0 = arith.constant 0 : i32
    %c0_i32_1 = arith.constant 0 : i32
    return %c0_i32, %c0_i32_0 : i32, i32
  }
  func.func @transform_5(%arg0: i32) -> (i32, i32, i32) {
    %c0_i32 = arith.constant 0 : i32
    %c0_i32_0 = arith.constant 0 : i32
    %c0_i32_1 = arith.constant 0 : i32
    %c0_i32_2 = arith.constant 0 : i32
    return %c0_i32, %c0_i32_0, %c0_i32_1 : i32, i32, i32
  }
  func.func @transform_6(%arg0: i32) -> (i32, i32) {
    %c0_i32 = arith.constant 0 : i32
    %c0_i32_0 = arith.constant 0 : i32
    %c0_i32_1 = arith.constant 0 : i32
    return %c0_i32, %c0_i32_0 : i32, i32
  }
  func.func @transform_7(%arg0: i32) -> (i32, i32) {
    %c0_i32 = arith.constant 0 : i32
    %c0_i32_0 = arith.constant 0 : i32
    %c0_i32_1 = arith.constant 0 : i32
    return %c0_i32, %c0_i32_0 : i32, i32
  }
  func.func @transform_8(%arg0: i32) -> (i32, i32) {
    %c0_i32 = arith.constant 0 : i32
    %c0_i32_0 = arith.constant 0 : i32
    %c0_i32_1 = arith.constant 0 : i32
    return %c0_i32, %c0_i32_0 : i32, i32
  }
  func.func @transform_9(%arg0: i32) -> (i32, i32) {
    %c0_i32 = arith.constant 0 : i32
    %c0_i32_0 = arith.constant 0 : i32
    return %arg0, %c0_i32 : i32, i32
  }
}

</mosaic_0001>

<bundles_post_ra>
// kernel: basic_conv_forward.1
= control target key start
LH: loop header
LB: loop body
LE: loop exit
PB: predicated region body
PF: predicated region fallthrough
CT: control target
= control target key end

     0   :  { %vm614_vm0 = vcmask 1040384   ;;  %vm181_vm1 = vcmask 203776   ;;  %s15388_s0 = inlined_call_operand.vmem [shape: f32[4,2,144,25], index: 0, kind: input, shape index: {}]   ;;  %s15389_s1 = inlined_call_operand.vmem [shape: f32[25,10], index: 1, kind: input, shape index: {}]   ;;  %s15390_s2 = inlined_call_operand.vmem [shape: f32[1,10], index: 2, kind: input, shape index: {}]   ;;  %s15391_s3 = inlined_call_operand.vmem [shape: f32[25,10,20], index: 3, kind: input, shape index: {}]   ;;  %s15392_s4 = inlined_call_operand.vmem [shape: f32[1,20], index: 4, kind: input, shape index: {}]   ;;  %s15393_s5 = inlined_call_operand.vmem [shape: f32[16,20,50], index: 5, kind: input, shape index: {}]   ;;  %s15394_s6 = inlined_call_operand.vmem [shape: f32[1,50], index: 6, kind: input, shape index: {}]   ;;  %s15395_s7 = inlined_call_operand.vmem [shape: f32[50,10], index: 7, kind: input, shape index: {}]   ;;  %s15396_s8 = inlined_call_operand.vmem [shape: f32[1,10], index: 8, kind: input, shape index: {}]   ;;  %s15397_s9 = inlined_call_operand.hbm [shape: f32[2,10], index: 9, kind: output, shape index: {}]  }
   0x1   :  { %v180_v0 = vld [vmem:[%s15389_s1 + $0x18] sm:$0x1]  ;;  %v179_v1 = vld [vmem:[%s15389_s1 + $0x10] sm:$0xff]  ;;  %v33_v2 = vld [vmem:[%s15388_s0] sm:$0xff] }
   0x2   :  { %10442 = vmatprep.subr.msk.mxu0 %vm614_vm0, %v180_v0  ;;  %v178_v3 = vld [vmem:[%s15389_s1 + $0x8] sm:$0xff]  ;;  %10450 = vmatprep.mubr.msk.f32.mxu0 %vm181_vm1, %v33_v2  ;;  %v177_v4 = vld [vmem:[%s15389_s1] sm:$0xff]  ;;  %v35_v6 = vld [vmem:[%s15388_s0 + $0x10] sm:$0xff] }
   0x3   :  { %10443 = vmatpush3.msk.msra.mxu0 %vm614_vm0, %v180_v0  ;;  %v34_v5 = vld [vmem:[%s15388_s0 + $0x8] sm:$0xff]  ;;  %v36_v7 = vld [vmem:[%s15388_s0 + $0x18] sm:$0xff]  ;;  %v37_v8 = vld [vmem:[%s15388_s0 + $0x20] sm:$0xff] }
   0x4   :  { %10444 = vmatprep.subr.mxu0 %v179_v1  ;;  %v38_v9 = vld [vmem:[%s15388_s0 + $0x28] sm:$0xff]  ;;  %v39_v10 = vld [vmem:[%s15388_s0 + $0x30] sm:$0xff]  ;;  %v40_v11 = vld [vmem:[%s15388_s0 + $0x38] sm:$0xff] }
   0x5   :  { %10445 = vmatpush3.msra.mxu0 %v179_v1  ;;  %v41_v12 = vld [vmem:[%s15388_s0 + $0x40] sm:$0xff]  ;;  %v42_v13 = vld [vmem:[%s15388_s0 + $0x48] sm:$0xff]  ;;  %v43_v14 = vld [vmem:[%s15388_s0 + $0x50] sm:$0xff] }
   0x6   :  { %10446 = vmatprep.subr.mxu0 %v178_v3  ;;  %v44_v15 = vld [vmem:[%s15388_s0 + $0x58] sm:$0xff] }
   0x7   :  { %10447 = vmatpush3.msra.mxu0 %v178_v3 }
   0x8   :  { %10448 = vmatprep.subr.mxu0 %v177_v4 }
   0x9   :  { %10449 = vmatpush3.msra.mxu0 %v177_v4 }
   0xa   :  { %10451 = vmatmul.mubr.msk.f32.vlgmr.msra.gmra.mxu0 %vm181_vm1, %v34_v5 }
   0xb   :  { %10453 = vmatprep.mubr.msk.f32.mxu0 %vm181_vm1, %v35_v6 }
   0xe   :  { %10454 = vmatmul.mubr.msk.f32.gmra.mxu0 %vm181_vm1, %v36_v7 }
   0xf   :  { %10456 = vmatprep.mubr.msk.f32.mxu0 %vm181_vm1, %v37_v8 }
  0x12   :  { %10457 = vmatmul.mubr.msk.f32.gmra.mxu0 %vm181_vm1, %v38_v9 }
  0x13   :  { %10459 = vmatprep.mubr.msk.f32.mxu0 %vm181_vm1, %v39_v10 }
  0x16   :  { %10460 = vmatmul.mubr.msk.f32.gmra.mxu0 %vm181_vm1, %v40_v11 }
  0x17   :  { %10462 = vmatprep.mubr.msk.f32.mxu0 %vm181_vm1, %v41_v12 }
  0x1a   :  { %10463 = vmatmul.mubr.msk.f32.gmra.mxu0 %vm181_vm1, %v42_v13 }
  0x1b   :  { %10465 = vmatprep.mubr.msk.f32.mxu0 %vm181_vm1, %v43_v14 }
  0x1c   :  { %14 = vsyncpa [#allocation4], 0  ;;  %v45_v16 = vld [vmem:[%s15388_s0 + $0x60] sm:$0xff]  ;;  %v46_v17 = vld [vmem:[%s15388_s0 + $0x68] sm:$0xff]  ;;  %vm1403_vm2 = vcmask 80896   ;;  %vm1881_vm3 = vcmask 1041408  }
  0x1d   :  { %v47_v18 = vld [vmem:[%s15388_s0 + $0x70] sm:$0xff]  ;;  %v48_v19 = vld [vmem:[%s15388_s0 + $0x78] sm:$0xff]  ;;  %v49_v20 = vld [vmem:[%s15388_s0 + $0x80] sm:$0xff]  ;;  %vm1736_vm4 = vcmask 76800   ;;  %vm1741_vm5 = vcmask 80900   ;;  %vm7590_vm6 = vcmask 1043456  }
  0x1e   :  { %10466 = vmatmul.mubr.msk.f32.gmra.mxu0 %vm181_vm1, %v44_v15  ;;  %v50_v21 = vld [vmem:[%s15388_s0 + $0x88] sm:$0xff]  ;;  %v51_v22 = vld [vmem:[%s15388_s0 + $0x90] sm:$0xff]  ;;  %v52_v23 = vld [vmem:[%s15388_s0 + $0x98] sm:$0xff]  ;;  %vm11562_vm7 = vmmov 0   ;;  %vm7585_vm8 = vcmask 1041409   ;;  %vm7587_vm9 = vcmask 162816  }
  0x1f   :  { %10468 = vmatprep.mubr.msk.f32.mxu0 %vm181_vm1, %v45_v16  ;;  %v53_v24 = vld [vmem:[%s15388_s0 + $0xa0] sm:$0xff]  ;;  %v54_v25 = vld [vmem:[%s15388_s0 + $0xa8] sm:$0xff]  ;;  %v55_v26 = vld [vmem:[%s15388_s0 + $0xb0] sm:$0xff]  ;;  %vm8965_vm10 = vcmask 408576   ;;  %vm9042_vm11 = vcmask 74752  }
  0x20   :  { %v56_v27 = vld [vmem:[%s15388_s0 + $0xb8] sm:$0xff]  ;;  %v57_v28 = vld [vmem:[%s15388_s0 + $0xc0] sm:$0xff]  ;;  %v58_v29 = vld [vmem:[%s15388_s0 + $0xc8] sm:$0xff] }
  0x21   :  { %v59_v30 = vld [vmem:[%s15388_s0 + $0xd0] sm:$0xff]  ;;  %v60_v31 = vld [vmem:[%s15388_s0 + $0xd8] sm:$0xff]  ;;  %v61_v32 = vld [vmem:[%s15388_s0 + $0xe0] sm:$0xff] }
  0x22   :  { %10469 = vmatmul.mubr.msk.f32.gmra.mxu0 %vm181_vm1, %v46_v17  ;;  %v62_v33 = vld [vmem:[%s15388_s0 + $0xe8] sm:$0xff]  ;;  %v63_v34 = vld [vmem:[%s15388_s0 + $0xf0] sm:$0xff]  ;;  %v64_v35 = vld [vmem:[%s15388_s0 + $0xf8] sm:$0xff] }
  0x23   :  { %10471 = vmatprep.mubr.msk.f32.mxu0 %vm181_vm1, %v47_v18  ;;  %v65_v36 = vld [vmem:[%s15388_s0 + $0x100] sm:$0xff]  ;;  %v66_v37 = vld [vmem:[%s15388_s0 + $0x108] sm:$0xff]  ;;  %v67_v38 = vld [vmem:[%s15388_s0 + $0x110] sm:$0xff] }
  0x24   :  { %v68_v39 = vld [vmem:[%s15388_s0 + $0x118] sm:$0xff]  ;;  %v69_v40 = vld [vmem:[%s15388_s0 + $0x120] sm:$0xff]  ;;  %v70_v41 = vld [vmem:[%s15388_s0 + $0x128] sm:$0xff] }
  0x25   :  { %v71_v42 = vld [vmem:[%s15388_s0 + $0x130] sm:$0xff]  ;;  %v72_v43 = vld [vmem:[%s15388_s0 + $0x138] sm:$0xff]  ;;  %v73_v44 = vld [vmem:[%s15388_s0 + $0x140] sm:$0xff] }
  0x26   :  { %10472 = vmatmul.mubr.msk.f32.gmra.mxu0 %vm181_vm1, %v48_v19  ;;  %v74_v45 = vld [vmem:[%s15388_s0 + $0x148] sm:$0xff]  ;;  %v75_v46 = vld [vmem:[%s15388_s0 + $0x150] sm:$0xff]  ;;  %v76_v47 = vld [vmem:[%s15388_s0 + $0x158] sm:$0xff] }
  0x27   :  { %10474 = vmatprep.mubr.msk.f32.mxu0 %vm181_vm1, %v49_v20  ;;  %v77_v48 = vld [vmem:[%s15388_s0 + $0x160] sm:$0xff]  ;;  %v78_v49 = vld [vmem:[%s15388_s0 + $0x168] sm:$0xff]  ;;  %v79_v50 = vld [vmem:[%s15388_s0 + $0x170] sm:$0xff] }
  0x28   :  { %v80_v51 = vld [vmem:[%s15388_s0 + $0x178] sm:$0xff]  ;;  %v81_v52 = vld [vmem:[%s15388_s0 + $0x180] sm:$0xff]  ;;  %v82_v53 = vld [vmem:[%s15388_s0 + $0x188] sm:$0xff] }
  0x29   :  { %v83_v54 = vld [vmem:[%s15388_s0 + $0x190] sm:$0xff]  ;;  %v84_v55 = vld [vmem:[%s15388_s0 + $0x198] sm:$0xff]  ;;  %v85_v56 = vld [vmem:[%s15388_s0 + $0x1a0] sm:$0xff] }
  0x2a   :  { %10475 = vmatmul.mubr.msk.f32.gmra.mxu0 %vm181_vm1, %v50_v21  ;;  %v86_v57 = vld [vmem:[%s15388_s0 + $0x1a8] sm:$0xff]  ;;  %v87_v58 = vld [vmem:[%s15388_s0 + $0x1b0] sm:$0xff]  ;;  %v88_v59 = vld [vmem:[%s15388_s0 + $0x1b8] sm:$0xff] }
  0x2b   :  { %10477 = vmatprep.mubr.msk.f32.mxu0 %vm181_vm1, %v51_v22  ;;  %v89_v60 = vld [vmem:[%s15388_s0 + $0x1c0] sm:$0xff]  ;;  %v90_v61 = vld [vmem:[%s15388_s0 + $0x1c8] sm:$0xff]  ;;  %v91_v62 = vld [vmem:[%s15388_s0 + $0x1d0] sm:$0xff] }
  0x2c   :  { %v92_v63 = vld [vmem:[%s15388_s0 + $0x1d8] sm:$0xff]  ;;  %v93_v0 = vld [vmem:[%s15388_s0 + $0x1e0] sm:$0xff]  ;;  %v94_v1 = vld [vmem:[%s15388_s0 + $0x1e8] sm:$0xff] }
  0x2d   :  { %v95_v2 = vld [vmem:[%s15388_s0 + $0x1f0] sm:$0xff]  ;;  %v96_v3 = vld [vmem:[%s15388_s0 + $0x1f8] sm:$0xff]  ;;  %v97_v4 = vld [vmem:[%s15388_s0 + $0x200] sm:$0xff] }
  0x2e   :  { %10478 = vmatmul.mubr.msk.f32.gmra.mxu0 %vm181_vm1, %v52_v23  ;;  %v98_v5 = vld [vmem:[%s15388_s0 + $0x208] sm:$0xff]  ;;  %v99_v6 = vld [vmem:[%s15388_s0 + $0x210] sm:$0xff]  ;;  %v100_v7 = vld [vmem:[%s15388_s0 + $0x218] sm:$0xff] }
  0x2f   :  { %10480 = vmatprep.mubr.msk.f32.mxu0 %vm181_vm1, %v53_v24  ;;  %v101_v8 = vld [vmem:[%s15388_s0 + $0x220] sm:$0xff]  ;;  %v102_v9 = vld [vmem:[%s15388_s0 + $0x228] sm:$0xff]  ;;  %v103_v10 = vld [vmem:[%s15388_s0 + $0x230] sm:$0xff] }
  0x30   :  { %v104_v11 = vld [vmem:[%s15388_s0 + $0x238] sm:$0xff]  ;;  %v105_v12 = vld [vmem:[%s15388_s0 + $0x240] sm:$0xff]  ;;  %v106_v13 = vld [vmem:[%s15388_s0 + $0x248] sm:$0xff] }
  0x31   :  { %v107_v14 = vld [vmem:[%s15388_s0 + $0x250] sm:$0xff]  ;;  %v108_v15 = vld [vmem:[%s15388_s0 + $0x258] sm:$0xff]  ;;  %v109_v16 = vld [vmem:[%s15388_s0 + $0x260] sm:$0xff] }
  0x32   :  { %10481 = vmatmul.mubr.msk.f32.gmra.mxu0 %vm181_vm1, %v54_v25  ;;  %v110_v17 = vld [vmem:[%s15388_s0 + $0x268] sm:$0xff]  ;;  %v111_v18 = vld [vmem:[%s15388_s0 + $0x270] sm:$0xff]  ;;  %v112_v19 = vld [vmem:[%s15388_s0 + $0x278] sm:$0xff] }
  0x33   :  { %10483 = vmatprep.mubr.msk.f32.mxu0 %vm181_vm1, %v55_v26  ;;  %v113_v20 = vld [vmem:[%s15388_s0 + $0x280] sm:$0xff]  ;;  %v114_v21 = vld [vmem:[%s15388_s0 + $0x288] sm:$0xff]  ;;  %v115_v22 = vld [vmem:[%s15388_s0 + $0x290] sm:$0xff] }
  0x34   :  { %v116_v23 = vld [vmem:[%s15388_s0 + $0x298] sm:$0xff]  ;;  %v117_v24 = vld [vmem:[%s15388_s0 + $0x2a0] sm:$0xff]  ;;  %v118_v25 = vld [vmem:[%s15388_s0 + $0x2a8] sm:$0xff] }
  0x35   :  { %v119_v26 = vld [vmem:[%s15388_s0 + $0x2b0] sm:$0xff] }
  0x36   :  { %10484 = vmatmul.mubr.msk.f32.gmra.mxu0 %vm181_vm1, %v56_v27  ;;  %v120_v27 = vld [vmem:[%s15388_s0 + $0x2b8] sm:$0xff] }
  0x37   :  { %10486 = vmatprep.mubr.msk.f32.mxu0 %vm181_vm1, %v57_v28  ;;  %v121_v28 = vld [vmem:[%s15388_s0 + $0x2c0] sm:$0xff] }
  0x3a   :  { %10487 = vmatmul.mubr.msk.f32.gmra.mxu0 %vm181_vm1, %v58_v29  ;;  %v122_v29 = vld [vmem:[%s15388_s0 + $0x2c8] sm:$0xff] }
  0x3b   :  { %10489 = vmatprep.mubr.msk.f32.mxu0 %vm181_vm1, %v59_v30  ;;  %v123_v30 = vld [vmem:[%s15388_s0 + $0x2d0] sm:$0xff] }
  0x3e   :  { %10490 = vmatmul.mubr.msk.f32.gmra.mxu0 %vm181_vm1, %v60_v31  ;;  %v124_v31 = vld [vmem:[%s15388_s0 + $0x2d8] sm:$0xff] }
  0x3f   :  { %10492 = vmatprep.mubr.msk.f32.mxu0 %vm181_vm1, %v61_v32  ;;  %v125_v32 = vld [vmem:[%s15388_s0 + $0x2e0] sm:$0xff] }
  0x42   :  { %10493 = vmatmul.mubr.msk.f32.gmra.mxu0 %vm181_vm1, %v62_v33  ;;  %v126_v33 = vld [vmem:[%s15388_s0 + $0x2e8] sm:$0xff] }
  0x43   :  { %10495 = vmatprep.mubr.msk.f32.mxu0 %vm181_vm1, %v63_v34  ;;  %v127_v34 = vld [vmem:[%s15388_s0 + $0x2f0] sm:$0xff] }
  0x46   :  { %10496 = vmatmul.mubr.msk.f32.gmra.mxu0 %vm181_vm1, %v64_v35  ;;  %v128_v35 = vld [vmem:[%s15388_s0 + $0x2f8] sm:$0xff] }
  0x47   :  { %10498 = vmatprep.mubr.msk.f32.mxu0 %vm181_vm1, %v65_v36  ;;  %v129_v36 = vld [vmem:[%s15388_s0 + $0x300] sm:$0xff] }
  0x4a   :  { %10499 = vmatmul.mubr.msk.f32.gmra.mxu0 %vm181_vm1, %v66_v37  ;;  %v130_v37 = vld [vmem:[%s15388_s0 + $0x308] sm:$0xff] }
  0x4b   :  { %10501 = vmatprep.mubr.msk.f32.mxu0 %vm181_vm1, %v67_v38  ;;  %v131_v38 = vld [vmem:[%s15388_s0 + $0x310] sm:$0xff] }
  0x4e   :  { %10502 = vmatmul.mubr.msk.f32.gmra.mxu0 %vm181_vm1, %v68_v39 }
  0x4f   :  { %10504 = vmatprep.mubr.msk.f32.mxu0 %vm181_vm1, %v69_v40  ;;  %v132_v40 = vld [vmem:[%s15388_s0 + $0x318] sm:$0xff] }
  0x52   :  { %10505 = vmatmul.mubr.msk.f32.gmra.mxu0 %vm181_vm1, %v70_v41 }
  0x53   :  { %10507 = vmatprep.mubr.msk.f32.mxu0 %vm181_vm1, %v71_v42  ;;  %v133_v42 = vld [vmem:[%s15388_s0 + $0x320] sm:$0xff] }
  0x56   :  { %10508 = vmatmul.mubr.msk.f32.gmra.mxu0 %vm181_vm1, %v72_v43 }
  0x57   :  { %10510 = vmatprep.mubr.msk.f32.mxu0 %vm181_vm1, %v73_v44  ;;  %v134_v44 = vld [vmem:[%s15388_s0 + $0x328] sm:$0xff] }
  0x5a   :  { %10511 = vmatmul.mubr.msk.f32.gmra.mxu0 %vm181_vm1, %v74_v45 }
  0x5b   :  { %10513 = vmatprep.mubr.msk.f32.mxu0 %vm181_vm1, %v75_v46  ;;  %v135_v46 = vld [vmem:[%s15388_s0 + $0x330] sm:$0xff] }
  0x5e   :  { %10514 = vmatmul.mubr.msk.f32.gmra.mxu0 %vm181_vm1, %v76_v47 }
  0x5f   :  { %10516 = vmatprep.mubr.msk.f32.mxu0 %vm181_vm1, %v77_v48  ;;  %v136_v48 = vld [vmem:[%s15388_s0 + $0x338] sm:$0xff] }
  0x62   :  { %10517 = vmatmul.mubr.msk.f32.gmra.mxu0 %vm181_vm1, %v78_v49 }
  0x63   :  { %10519 = vmatprep.mubr.msk.f32.mxu0 %vm181_vm1, %v79_v50  ;;  %v137_v50 = vld [vmem:[%s15388_s0 + $0x340] sm:$0xff] }
  0x66   :  { %10520 = vmatmul.mubr.msk.f32.gmra.mxu0 %vm181_vm1, %v80_v51 }
  0x67   :  { %10522 = vmatprep.mubr.msk.f32.mxu0 %vm181_vm1, %v81_v52  ;;  %v138_v52 = vld [vmem:[%s15388_s0 + $0x348] sm:$0xff] }
  0x6a   :  { %10523 = vmatmul.mubr.msk.f32.gmra.mxu0 %vm181_vm1, %v82_v53 }
  0x6b   :  { %10525 = vmatprep.mubr.msk.f32.mxu0 %vm181_vm1, %v83_v54  ;;  %v139_v54 = vld [vmem:[%s15388_s0 + $0x350] sm:$0xff] }
  0x6e   :  { %10526 = vmatmul.mubr.msk.f32.gmra.mxu0 %vm181_vm1, %v84_v55 }
  0x6f   :  { %10528 = vmatprep.mubr.msk.f32.mxu0 %vm181_vm1, %v85_v56  ;;  %v140_v56 = vld [vmem:[%s15388_s0 + $0x358] sm:$0xff] }
  0x72   :  { %10529 = vmatmul.mubr.msk.f32.gmra.mxu0 %vm181_vm1, %v86_v57 }
  0x73   :  { %10531 = vmatprep.mubr.msk.f32.mxu0 %vm181_vm1, %v87_v58  ;;  %v141_v58 = vld [vmem:[%s15388_s0 + $0x360] sm:$0xff] }
  0x76   :  { %10532 = vmatmul.mubr.msk.f32.gmra.mxu0 %vm181_vm1, %v88_v59 }
  0x77   :  { %10534 = vmatprep.mubr.msk.f32.mxu0 %vm181_vm1, %v89_v60  ;;  %v142_v60 = vld [vmem:[%s15388_s0 + $0x368] sm:$0xff] }
  0x7a   :  { %10535 = vmatmul.mubr.msk.f32.gmra.mxu0 %vm181_vm1, %v90_v61 }
  0x7b   :  { %10537 = vmatprep.mubr.msk.f32.mxu0 %vm181_vm1, %v91_v62  ;;  %v143_v62 = vld [vmem:[%s15388_s0 + $0x370] sm:$0xff] }
  0x7e   :  { %10538 = vmatmul.mubr.msk.f32.gmra.mxu0 %vm181_vm1, %v92_v63 }
  0x7f   :  { %10540 = vmatprep.mubr.msk.f32.mxu0 %vm181_vm1, %v93_v0  ;;  %v144_v0 = vld [vmem:[%s15388_s0 + $0x378] sm:$0xff] }
  0x82   :  { %10541 = vmatmul.mubr.msk.f32.gmra.mxu0 %vm181_vm1, %v94_v1 }
  0x83   :  { %10543 = vmatprep.mubr.msk.f32.mxu0 %vm181_vm1, %v95_v2  ;;  %v145_v2 = vld [vmem:[%s15388_s0 + $0x380] sm:$0xff] }
  0x86   :  { %10544 = vmatmul.mubr.msk.f32.gmra.mxu0 %vm181_vm1, %v96_v3 }
  0x87   :  { %10546 = vmatprep.mubr.msk.f32.mxu0 %vm181_vm1, %v97_v4  ;;  %v146_v4 = vld [vmem:[%s15388_s0 + $0x388] sm:$0xff] }
  0x8a   :  { %10547 = vmatmul.mubr.msk.f32.gmra.mxu0 %vm181_vm1, %v98_v5 }
  0x8b   :  { %10549 = vmatprep.mubr.msk.f32.mxu0 %vm181_vm1, %v99_v6  ;;  %v147_v6 = vld [vmem:[%s15388_s0 + $0x390] sm:$0xff] }
  0x8e   :  { %10550 = vmatmul.mubr.msk.f32.gmra.mxu0 %vm181_vm1, %v100_v7 }
  0x8f   :  { %10552 = vmatprep.mubr.msk.f32.mxu0 %vm181_vm1, %v101_v8  ;;  %v148_v8 = vld [vmem:[%s15388_s0 + $0x398] sm:$0xff] }
  0x92   :  { %10553 = vmatmul.mubr.msk.f32.gmra.mxu0 %vm181_vm1, %v102_v9 }
  0x93   :  { %10555 = vmatprep.mubr.msk.f32.mxu0 %vm181_vm1, %v103_v10  ;;  %v149_v10 = vld [vmem:[%s15388_s0 + $0x3a0] sm:$0xff] }
  0x96   :  { %10556 = vmatmul.mubr.msk.f32.gmra.mxu0 %vm181_vm1, %v104_v11 }
  0x97   :  { %10558 = vmatprep.mubr.msk.f32.mxu0 %vm181_vm1, %v105_v12  ;;  %v150_v12 = vld [vmem:[%s15388_s0 + $0x3a8] sm:$0xff] }
  0x9a   :  { %10559 = vmatmul.mubr.msk.f32.gmra.mxu0 %vm181_vm1, %v106_v13 }
  0x9b   :  { %10561 = vmatprep.mubr.msk.f32.mxu0 %vm181_vm1, %v107_v14  ;;  %v151_v14 = vld [vmem:[%s15388_s0 + $0x3b0] sm:$0xff] }
  0x9e   :  { %10562 = vmatmul.mubr.msk.f32.gmra.mxu0 %vm181_vm1, %v108_v15 }
  0x9f   :  { %10564 = vmatprep.mubr.msk.f32.mxu0 %vm181_vm1, %v109_v16  ;;  %v152_v16 = vld [vmem:[%s15388_s0 + $0x3b8] sm:$0xff] }
  0xa2   :  { %10565 = vmatmul.mubr.msk.f32.gmra.mxu0 %vm181_vm1, %v110_v17 }
  0xa3   :  { %10567 = vmatprep.mubr.msk.f32.mxu0 %vm181_vm1, %v111_v18  ;;  %v153_v18 = vld [vmem:[%s15388_s0 + $0x3c0] sm:$0xff] }
  0xa6   :  { %10568 = vmatmul.mubr.msk.f32.gmra.mxu0 %vm181_vm1, %v112_v19 }
  0xa7   :  { %10570 = vmatprep.mubr.msk.f32.mxu0 %vm181_vm1, %v113_v20  ;;  %v154_v20 = vld [vmem:[%s15388_s0 + $0x3c8] sm:$0xff] }
  0xaa   :  { %10571 = vmatmul.mubr.msk.f32.gmra.mxu0 %vm181_vm1, %v114_v21 }
  0xab   :  { %10573 = vmatprep.mubr.msk.f32.mxu0 %vm181_vm1, %v115_v22  ;;  %v155_v22 = vld [vmem:[%s15388_s0 + $0x3d0] sm:$0xff] }
  0xae   :  { %10574 = vmatmul.mubr.msk.f32.gmra.mxu0 %vm181_vm1, %v116_v23 }
  0xaf   :  { %10576 = vmatprep.mubr.msk.f32.mxu0 %vm181_vm1, %v117_v24  ;;  %v156_v24 = vld [vmem:[%s15388_s0 + $0x3d8] sm:$0xff] }
  0xb2   :  { %10577 = vmatmul.mubr.msk.f32.gmra.mxu0 %vm181_vm1, %v118_v25 }
  0xb3   :  { %10579 = vmatprep.mubr.msk.f32.mxu0 %vm181_vm1, %v119_v26  ;;  %v157_v26 = vld [vmem:[%s15388_s0 + $0x3e0] sm:$0xff] }
  0xb6   :  { %10580 = vmatmul.mubr.msk.f32.gmra.mxu0 %vm181_vm1, %v120_v27 }
  0xb7   :  { %10582 = vmatprep.mubr.msk.f32.mxu0 %vm181_vm1, %v121_v28  ;;  %v158_v28 = vld [vmem:[%s15388_s0 + $0x3e8] sm:$0xff] }
  0xba   :  { %10583 = vmatmul.mubr.msk.f32.gmra.mxu0 %vm181_vm1, %v122_v29 }
  0xbb   :  { %10585 = vmatprep.mubr.msk.f32.mxu0 %vm181_vm1, %v123_v30  ;;  %v159_v30 = vld [vmem:[%s15388_s0 + $0x3f0] sm:$0xff] }
  0xbe   :  { %10586 = vmatmul.mubr.msk.f32.gmra.mxu0 %vm181_vm1, %v124_v31 }
  0xbf   :  { %10588 = vmatprep.mubr.msk.f32.mxu0 %vm181_vm1, %v125_v32  ;;  %v160_v32 = vld [vmem:[%s15388_s0 + $0x3f8] sm:$0xff] }
  0xc2   :  { %10589 = vmatmul.mubr.msk.f32.gmra.mxu0 %vm181_vm1, %v126_v33 }
  0xc3   :  { %10591 = vmatprep.mubr.msk.f32.mxu0 %vm181_vm1, %v127_v34  ;;  %v161_v34 = vld [vmem:[%s15388_s0 + $0x400] sm:$0xff] }
  0xc6   :  { %10592 = vmatmul.mubr.msk.f32.gmra.mxu0 %vm181_vm1, %v128_v35 }
  0xc7   :  { %10594 = vmatprep.mubr.msk.f32.mxu0 %vm181_vm1, %v129_v36  ;;  %v162_v36 = vld [vmem:[%s15388_s0 + $0x408] sm:$0xff] }
  0xca   :  { %v12020_v39 = vpop.f32.mrf.mxu0  ;;  %10595 = vmatmul.mubr.msk.f32.gmra.mxu0 %vm181_vm1, %v130_v37 }
  0xcb   :  { %10597 = vmatprep.mubr.msk.f32.mxu0 %vm181_vm1, %v131_v38  ;;  %v163_v38 = vld [vmem:[%s15388_s0 + $0x410] sm:$0xff] }
  0xcc   :  { %v12027_v41 = vpop.f32.mrf.mxu0 }
  0xce   :  { %v12032_v43 = vpop.f32.mrf.mxu0  ;;  %10598 = vmatmul.mubr.msk.f32.gmra.mxu0 %vm181_vm1, %v132_v40 }
  0xcf   :  { %10600 = vmatprep.mubr.msk.f32.mxu0 %vm181_vm1, %v133_v42  ;;  %v164_v42 = vld [vmem:[%s15388_s0 + $0x418] sm:$0xff] }
  0xd0   :  { %v12039_v45 = vpop.f32.mrf.mxu0 }
  0xd2   :  { %v12044_v47 = vpop.f32.mrf.mxu0  ;;  %10601 = vmatmul.mubr.msk.f32.gmra.mxu0 %vm181_vm1, %v134_v44 }
  0xd3   :  { %10603 = vmatprep.mubr.msk.f32.mxu0 %vm181_vm1, %v135_v46  ;;  %v165_v46 = vld [vmem:[%s15388_s0 + $0x420] sm:$0xff] }
  0xd4   :  { %v12051_v49 = vpop.f32.mrf.mxu0 }
  0xd6   :  { %v12056_v51 = vpop.f32.mrf.mxu0  ;;  %10604 = vmatmul.mubr.msk.f32.gmra.mxu0 %vm181_vm1, %v136_v48 }
  0xd7   :  { %10606 = vmatprep.mubr.msk.f32.mxu0 %vm181_vm1, %v137_v50  ;;  %v166_v50 = vld [vmem:[%s15388_s0 + $0x428] sm:$0xff] }
  0xd8   :  { %v12063_v53 = vpop.f32.mrf.mxu0 }
  0xda   :  { %v12068_v55 = vpop.f32.mrf.mxu0  ;;  %10607 = vmatmul.mubr.msk.f32.gmra.mxu0 %vm181_vm1, %v138_v52 }
  0xdb   :  { %10609 = vmatprep.mubr.msk.f32.mxu0 %vm181_vm1, %v139_v54  ;;  %v167_v54 = vld [vmem:[%s15388_s0 + $0x430] sm:$0xff] }
  0xdc   :  { %v12075_v57 = vpop.f32.mrf.mxu0 }
  0xde   :  { %v12080_v59 = vpop.f32.mrf.mxu0  ;;  %10610 = vmatmul.mubr.msk.f32.gmra.mxu0 %vm181_vm1, %v140_v56 }
  0xdf   :  { %10612 = vmatprep.mubr.msk.f32.mxu0 %vm181_vm1, %v141_v58  ;;  %v12239_v58 = vsel %vm1403_vm2, %v12020_v39, -inf }
  0xe0   :  { %v12087_v61 = vpop.f32.mrf.mxu0 }
  0xe2   :  { %v12092_v63 = vpop.f32.mrf.mxu0  ;;  %10613 = vmatmul.mubr.msk.f32.gmra.mxu0 %vm181_vm1, %v142_v60 }
  0xe3   :  { %10615 = vmatprep.mubr.msk.f32.mxu0 %vm181_vm1, %v143_v62  ;;  %v168_v62 = vld [vmem:[%s15388_s0 + $0x438] sm:$0xff] }
  0xe4   :  { %v12099_v1 = vpop.f32.mrf.mxu0 }
  0xe6   :  { %v12104_v3 = vpop.f32.mrf.mxu0  ;;  %10616 = vmatmul.mubr.msk.f32.gmra.mxu0 %vm181_vm1, %v144_v0 }
  0xe7   :  { %10618 = vmatprep.mubr.msk.f32.mxu0 %vm181_vm1, %v145_v2 }
  0xe8   :  { %v12111_v5 = vpop.f32.mrf.mxu0 }
  0xea   :  { %v12116_v7 = vpop.f32.mrf.mxu0  ;;  %10619 = vmatmul.mubr.msk.f32.gmra.mxu0 %vm181_vm1, %v146_v4  ;;  %v169_v4 = vld [vmem:[%s15388_s0 + $0x440] sm:$0xff] }
  0xeb   :  { %10621 = vmatprep.mubr.msk.f32.mxu0 %vm181_vm1, %v147_v6  ;;  %v12258_v6 = vsel %vm1403_vm2, %v12032_v43, -inf }
  0xec   :  { %v12123_v9 = vpop.f32.mrf.mxu0 }
  0xed   :  { %15419 = vst [vmem:[#allocation6_spill] sm:$0xff] %v12123_v9 }
  0xee   :  { %v12128_v11 = vpop.f32.mrf.mxu0  ;;  %10622 = vmatmul.mubr.msk.f32.gmra.mxu0 %vm181_vm1, %v148_v8 }
  0xef   :  { %10624 = vmatprep.mubr.msk.f32.mxu0 %vm181_vm1, %v149_v10  ;;  %v170_v10 = vld [vmem:[%s15388_s0 + $0x448] sm:$0xff] }
  0xf0   :  { %v12135_v13 = vpop.f32.mrf.mxu0 }
  0xf1   :  { %15420 = vst [vmem:[#allocation7_spill] sm:$0xff] %v12135_v13 }
  0xf2   :  { %v12140_v15 = vpop.f32.mrf.mxu0  ;;  %10625 = vmatmul.mubr.msk.f32.gmra.mxu0 %vm181_vm1, %v150_v12 }
  0xf3   :  { %10627 = vmatprep.mubr.msk.f32.mxu0 %vm181_vm1, %v151_v14 }
  0xf4   :  { %v12147_v17 = vpop.f32.mrf.mxu0 }
  0xf5   :  { %15421 = vst [vmem:[#allocation8_spill] sm:$0xff] %v12147_v17 }
  0xf6   :  { %v12152_v19 = vpop.f32.mrf.mxu0  ;;  %10628 = vmatmul.mubr.msk.f32.gmra.mxu0 %vm181_vm1, %v152_v16  ;;  %v171_v16 = vld [vmem:[%s15388_s0 + $0x450] sm:$0xff] }
  0xf7   :  { %10630 = vmatprep.mubr.msk.f32.mxu0 %vm181_vm1, %v153_v18  ;;  %v12277_v18 = vsel %vm1403_vm2, %v12044_v47, -inf }
  0xf8   :  { %v12159_v21 = vpop.f32.mrf.mxu0 }
  0xf9   :  { %15422 = vst [vmem:[#allocation9_spill] sm:$0xff] %v12159_v21 }
  0xfa   :  { %v12164_v23 = vpop.f32.mrf.mxu0  ;;  %10631 = vmatmul.mubr.msk.f32.gmra.mxu0 %vm181_vm1, %v154_v20 }
  0xfb   :  { %10633 = vmatprep.mubr.msk.f32.mxu0 %vm181_vm1, %v155_v22  ;;  %v172_v22 = vld [vmem:[%s15388_s0 + $0x458] sm:$0xff] }
  0xfc   :  { %v12171_v25 = vpop.f32.mrf.mxu0 }
  0xfd   :  { %15423 = vst [vmem:[#allocation10_spill] sm:$0xff] %v12171_v25 }
  0xfe   :  { %v12176_v27 = vpop.f32.mrf.mxu0  ;;  %10634 = vmatmul.mubr.msk.f32.gmra.mxu0 %vm181_vm1, %v156_v24 }
  0xff   :  { %10636 = vmatprep.mubr.msk.f32.mxu0 %vm181_vm1, %v157_v26 }
 0x100   :  { %v12183_v29 = vpop.f32.mrf.mxu0 }
 0x101   :  { %15424 = vst [vmem:[#allocation11_spill] sm:$0xff] %v12183_v29  ;;  %v12436_v29 = vsel %vm1403_vm2, %v12176_v27, -inf }
 0x102   :  { %v12188_v31 = vpop.f32.mrf.mxu0  ;;  %10637 = vmatmul.mubr.msk.f32.gmra.mxu0 %vm181_vm1, %v158_v28  ;;  %v173_v28 = vld [vmem:[%s15388_s0 + $0x460] sm:$0xff] }
 0x103   :  { %10639 = vmatprep.mubr.msk.f32.mxu0 %vm181_vm1, %v159_v30  ;;  %v12296_v30 = vsel %vm1403_vm2, %v12056_v51, -inf  ;;  %v12447_v21 = vsel %vm1403_vm2, %v12188_v31, -inf }
 0x104   :  { %v12195_v33 = vpop.f32.mrf.mxu0 }
 0x105   :  { %15425 = vst [vmem:[#allocation12_spill] sm:$0xff] %v12195_v33 }
 0x106   :  { %v12200_v35 = vpop.f32.mrf.mxu0  ;;  %10640 = vmatmul.mubr.msk.f32.gmra.mxu0 %vm181_vm1, %v160_v32 }
 0x107   :  { %10642 = vmatprep.mubr.msk.f32.mxu0 %vm181_vm1, %v161_v34  ;;  %v174_v34 = vld [vmem:[%s15388_s0 + $0x468] sm:$0xff] }
 0x108   :  { %v12207_v37 = vpop.f32.mrf.mxu0 }
 0x109   :  { %15426 = vst [vmem:[#allocation13_spill] sm:$0xff] %v12207_v37  ;;  %v12425_v37 = vsel %vm1403_vm2, %v12164_v23, -inf }
 0x10a   :  { %v12212_v40 = vpop.f32.mrf.mxu0  ;;  %10643 = vmatmul.mubr.msk.f32.gmra.mxu0 %vm181_vm1, %v162_v36 }
 0x10b   :  { %10645 = vmatprep.mubr.msk.f32.mxu0 %vm181_vm1, %v163_v38  ;;  %v12469_v17 = vsel %vm1403_vm2, %v12212_v40, -inf }
 0x10c   :  { %v12219_v44 = vpop.f32.mrf.mxu0 }
 0x10d   :  { %15427 = vst [vmem:[#allocation14_spill] sm:$0xff] %v12219_v44 }
 0x10e   :  { %v12224_v48 = vpop.f32.mrf.mxu0  ;;  %10646 = vmatmul.mubr.msk.f32.gmra.mxu0 %vm181_vm1, %v164_v42  ;;  %v175_v42 = vld [vmem:[%s15388_s0 + $0x470] sm:$0xff] }
 0x10f   :  { %10648 = vmatprep.mubr.msk.f32.mxu0 %vm181_vm1, %v165_v46  ;;  %v12315_v46 = vsel %vm1403_vm2, %v12068_v55, -inf  ;;  %v12331_v55 = vsel %vm1403_vm2, %v12080_v59, -inf }
 0x110   :  { %v12231_v52 = vpop.f32.mrf.mxu0 }
 0x111   :  { %15428 = vst [vmem:[#allocation15_spill] sm:$0xff] %v12231_v52 }
 0x112   :  { %v10506_v56 = vpop.f32.mrf.mxu0  ;;  %10649 = vmatmul.mubr.msk.f32.gmra.mxu0 %vm181_vm1, %v166_v50 }
 0x113   :  { %v12242_v60 = vsel %vm1403_vm2, %v10506_v56, -inf  ;;  %10651 = vmatprep.mubr.msk.f32.mxu0 %vm181_vm1, %v167_v54  ;;  %v176_v54 = vld [vmem:[%s15388_s0 + $0x478] sm:$0xff]  ;;  %v12393_v56 = vld [vmem:[%s15391_s3 + $0xa8] sm:$0x3] }
 0x114   :  { %v12250_v2 = vpop.f32.mrf.mxu0 }
 0x116   :  { %v10509_v39 = vpop.f32.mrf.mxu0  ;;  %10652 = vmatmul.mubr.msk.f32.gmra.mxu0 %vm181_vm1, %v168_v62 }
 0x117   :  { %v12261_v8 = vsel %vm1403_vm2, %v10509_v39, -inf  ;;  %10654 = vmatprep.mubr.msk.f32.mxu0 %vm181_vm1, %v169_v4 }
 0x118   :  { %v12269_v14 = vpop.f32.mrf.mxu0 }
 0x11a   :  { %v10512_v43 = vpop.f32.mrf.mxu0  ;;  %10655 = vmatmul.mubr.msk.f32.gmra.mxu0 %vm181_vm1, %v170_v10 }
 0x11b   :  { %v12280_v20 = vsel %vm1403_vm2, %v10512_v43, -inf  ;;  %10657 = vmatprep.mubr.msk.f32.mxu0 %vm181_vm1, %v171_v16 }
 0x11c   :  { %v12288_v26 = vpop.f32.mrf.mxu0 }
 0x11e   :  { %v10515_v47 = vpop.f32.mrf.mxu0  ;;  %10658 = vmatmul.mubr.msk.f32.gmra.mxu0 %vm181_vm1, %v172_v22  ;;  %v12342_v22 = vsel %vm1403_vm2, %v12092_v63, -inf }
 0x11f   :  { %v12299_v32 = vsel %vm1403_vm2, %v10515_v47, -inf  ;;  %10660 = vmatprep.mubr.msk.f32.mxu0 %vm181_vm1, %v173_v28 }
 0x120   :  { %v12307_v38 = vpop.f32.mrf.mxu0 }
 0x122   :  { %v10518_v51 = vpop.f32.mrf.mxu0  ;;  %10661 = vmatmul.mubr.msk.f32.gmra.mxu0 %vm181_vm1, %v174_v34 }
 0x123   :  { %v12318_v50 = vsel %vm1403_vm2, %v10518_v51, -inf  ;;  %10663 = vmatprep.mubr.msk.f32.mxu0 %vm181_vm1, %v175_v42  ;;  %v12353_v42 = vsel %vm1403_vm2, %v12104_v3, -inf  ;;  %v9218_v3 = vld [vmem:[%s15391_s3 + $0x18] sm:$0x3] }
 0x124   :  { %v12326_v62 = vpop.f32.mrf.mxu0  ;;  %10666 = vmatprep.subr.msk.mxu0 %vm1881_vm3, %v9218_v3  ;;  %11527 = vmatprep.subr.msk.mxu1 %vm1881_vm3, %v9218_v3 }
 0x125   :  { %10667 = vmatpush3.msk.msra.mxu0 %vm1881_vm3, %v9218_v3  ;;  %11529 = vmatpush3.msk.msra.mxu1 %vm1881_vm3, %v9218_v3  ;;  %v12414_v3 = vsel %vm1403_vm2, %v12152_v19, -inf }
 0x126   :  { %v10521_v4 = vpop.f32.mrf.mxu0  ;;  %10664 = vmatmul.mubr.msk.f32.gmra.mxu0 %vm181_vm1, %v176_v54 }
 0x127   :  { %v12334_v39 = vsel %vm1403_vm2, %v10521_v4, -inf }
 0x128   :  { %v12338_v16 = vpop.f32.mrf.mxu0 }
 0x12a   :  { %v10524_v43 = vpop.f32.mrf.mxu0 }
 0x12b   :  { %v12345_v28 = vsel %vm1403_vm2, %v10524_v43, -inf  ;;  %v12364_v43 = vsel %vm1403_vm2, %v12116_v7, -inf  ;;  %v9217_v7 = vld [vmem:[%s15391_s3 + $0x10] sm:$0xff] }
 0x12c   :  { %v12349_v47 = vpop.f32.mrf.mxu0  ;;  %10668 = vmatprep.subr.mxu0 %v9217_v7  ;;  %11528 = vmatprep.subr.mxu1 %v9217_v7 }
 0x12d   :  { %10669 = vmatpush3.msra.mxu0 %v9217_v7  ;;  %11530 = vmatpush3.msra.mxu1 %v9217_v7 }
 0x12e   :  { %v10527_v34 = vpop.f32.mrf.mxu0  ;;  %10946 = vmatprep.subr.msk.mxu0 %vm1881_vm3, %v12393_v56 }
 0x12f   :  { %v12356_v51 = vsel %vm1403_vm2, %v10527_v34, -inf  ;;  %v12385_v34 = vsel %vm1403_vm2, %v12128_v11, -inf }
 0x130   :  { %v12360_v54 = vpop.f32.mrf.mxu0 }
 0x132   :  { %v10530_v4 = vpop.f32.mrf.mxu0 }
 0x133   :  { %v12367_v59 = vsel %vm1403_vm2, %v10530_v4, -inf }
 0x134   :  { %v12374_v10 = vpop.f32.mrf.mxu0 }
 0x135   :  { %15429 = vst [vmem:[#allocation16_spill] sm:$0xff] %v12374_v10 }
 0x136   :  { %v10533_v4 = vpop.f32.mrf.mxu0 }
 0x137   :  { %v12388_v63 = vsel %vm1403_vm2, %v10533_v4, -inf  ;;  %v12403_v4 = vsel %vm1403_vm2, %v12140_v15, -inf }
 0x138   :  { %v12397_v36 = vpop.f32.mrf.mxu0 }
 0x139   :  { %15430 = vst [vmem:[#allocation17_spill] sm:$0xff] %v12397_v36 }
 0x13a   :  { %v10536_v11 = vpop.f32.mrf.mxu0 }
 0x13b   :  { %v12406_v24 = vsel %vm1403_vm2, %v10536_v11, -inf }
 0x13c   :  { %v12410_v7 = vpop.f32.mrf.mxu0 }
 0x13d   :  { %15431 = vst [vmem:[#allocation18_spill] sm:$0xff] %v12410_v7  ;;  %v12480_v7 = vsel %vm1403_vm2, %v12224_v48, -inf  ;;  %v12500_v48 = vld [vmem:[%s15391_s3 + $0x8] sm:$0x3] }
 0x13e   :  { %v10539_v0 = vpop.f32.mrf.mxu0  ;;  %15440 = vst [vmem:[#allocation26_spill] sm:$0xff] %v12500_v48  ;;  %10694 = vmatprep.subr.msk.mxu1 %vm1881_vm3, %v12500_v48 }
 0x13f   :  { %v12417_v52 = vsel %vm1403_vm2, %v10539_v0, -inf }
 0x140   :  { %v12421_v44 = vpop.f32.mrf.mxu0 }
 0x141   :  { %15432 = vst [vmem:[#allocation19_spill] sm:$0xff] %v12421_v44  ;;  %v12458_v44 = vsel %vm1403_vm2, %v12200_v35, -inf  ;;  %v15439_v35 = vmax.f32 %v12239_v58, %v12242_v60 }
 0x142   :  { %v10542_v11 = vpop.f32.mrf.mxu0 }
 0x143   :  { %v12428_v12 = vsel %vm1403_vm2, %v10542_v11, -inf }
 0x144   :  { %v12432_v33 = vpop.f32.mrf.mxu0 }
 0x145   :  { %15433 = vst [vmem:[#allocation20_spill] sm:$0xff] %v12432_v33 }
 0x146   :  { %v10545_v0 = vpop.f32.mrf.mxu0 }
 0x147   :  { %v12439_v15 = vsel %vm1403_vm2, %v10545_v0, -inf }
 0x148   :  { %v12443_v25 = vpop.f32.mrf.mxu0 }
 0x149   :  { %15434 = vst [vmem:[#allocation21_spill] sm:$0xff] %v12443_v25 }
 0x14a   :  { %v10548_v11 = vpop.f32.mrf.mxu0 }
 0x14b   :  { %v12450_v19 = vsel %vm1403_vm2, %v10548_v11, -inf }
 0x14c   :  { %v12454_v33 = vpop.f32.mrf.mxu0 }
 0x14d   :  { %15435 = vst [vmem:[#allocation22_spill] sm:$0xff] %v12454_v33 }
 0x14e   :  { %v10551_v0 = vpop.f32.mrf.mxu0 }
 0x14f   :  { %v12461_v23 = vsel %vm1403_vm2, %v10551_v0, -inf }
 0x150   :  { %v12465_v25 = vpop.f32.mrf.mxu0 }
 0x151   :  { %15436 = vst [vmem:[#allocation23_spill] sm:$0xff] %v12465_v25 }
 0x152   :  { %v10554_v11 = vpop.f32.mrf.mxu0 }
 0x153   :  { %v12472_v27 = vsel %vm1403_vm2, %v10554_v11, -inf }
 0x154   :  { %v12476_v33 = vpop.f32.mrf.mxu0 }
 0x155   :  { %15437 = vst [vmem:[#allocation24_spill] sm:$0xff] %v12476_v33 }
 0x156   :  { %v10557_v0 = vpop.f32.mrf.mxu0 }
 0x157   :  { %v12483_v31 = vsel %vm1403_vm2, %v10557_v0, -inf }
 0x158   :  { %v12487_v25 = vpop.f32.mrf.mxu0 }
 0x159   :  { %15438 = vst [vmem:[#allocation25_spill] sm:$0xff] %v12487_v25 }
 0x15a   :  { %v10560_v11 = vpop.f32.mrf.mxu0 }
 0x15b   :  { %v1414_v13 = vsel %vm1403_vm2, %v10560_v11, -inf  ;;  %v15441_v11 = vmax.f32 %v12258_v6, %v12261_v8  ;;  %v15443_v6 = vmax.f32 %v12296_v30, %v12299_v32  ;;  %v15445_v30 = vmax.f32 %v12331_v55, %v12334_v39 }
 0x15c   :  { %v12493_v33 = vmax.f32 %v15439_v35, %v1414_v13  ;;  %v12495_v36 = vpop.f32.mrf.mxu0  ;;  %v15442_v35 = vmax.f32 %v12277_v18, %v12280_v20  ;;  %v15444_v18 = vmax.f32 %v12315_v46, %v12318_v50  ;;  %v15446_v46 = vmax.f32 %v12342_v22, %v12345_v28 }
 0x15d   :  { %v15447_v55 = vmax.f32 %v12353_v42, %v12356_v51  ;;  %v15448_v22 = vmax.f32 %v12364_v43, %v12367_v59  ;;  %v15449_v42 = vmax.f32 %v12385_v34, %v12388_v63  ;;  %v15450_v59 = vmax.f32 %v12403_v4, %v12406_v24 }
 0x15e   :  { %v10563_v0 = vpop.f32.mrf.mxu0  ;;  %v15451_v63 = vmax.f32 %v12414_v3, %v12417_v52  ;;  %v15452_v24 = vmax.f32 %v12425_v37, %v12428_v12  ;;  %v15453_v52 = vmax.f32 %v12436_v29, %v12439_v15  ;;  %v15454_v37 = vmax.f32 %v12447_v21, %v12450_v19 }
 0x15f   :  { %v1428_v40 = vsel %vm1403_vm2, %v10563_v0, -inf  ;;  %v15455_v29 = vmax.f32 %v12458_v44, %v12461_v23  ;;  %v15456_v21 = vmax.f32 %v12469_v17, %v12472_v27  ;;  %v15457_v23 = vmax.f32 %v12480_v7, %v12483_v31  ;;  %v12652_v7 = vld [vmem:[%s15390_s2] ss:$0 sm:$0xff] }
 0x160   :  { %v12508_v25 = vmax.f32 %v15441_v11, %v1428_v40  ;;  %v12510_v13 = vpop.f32.mrf.mxu0  ;;  %v1404_v17 = vsel %vm1403_vm2, %v12027_v41, -inf  ;;  %v1407_v27 = vsel %vm1403_vm2, %v12495_v36, -inf  ;;  %v1418_v41 = vsel %vm1403_vm2, %v12039_v45, -inf }
 0x161   :  { %v1421_v36 = vsel %vm1403_vm2, %v12510_v13, -inf }
 0x162   :  { %v10566_v58 = vpop.f32.mrf.mxu0 }
 0x163   :  { %v1442_v60 = vsel %vm1403_vm2, %v10566_v58, -inf }
 0x164   :  { %v12516_v9 = vmax.f32 %v15442_v35, %v1442_v60  ;;  %v12518_v10 = vpop.f32.mrf.mxu0 }
 0x166   :  { %v10569_v48 = vpop.f32.mrf.mxu0 }
 0x167   :  { %v1456_v0 = vsel %vm1403_vm2, %v10569_v48, -inf }
 0x168   :  { %v12524_v8 = vmax.f32 %v15443_v6, %v1456_v0  ;;  %v12526_v40 = vpop.f32.mrf.mxu0 }
 0x16a   :  { %v10572_v11 = vpop.f32.mrf.mxu0 }
 0x16b   :  { %v1470_v58 = vsel %vm1403_vm2, %v10572_v11, -inf }
 0x16c   :  { %v12532_v20 = vmax.f32 %v15444_v18, %v1470_v58  ;;  %v12534_v60 = vpop.f32.mrf.mxu0 }
 0x16e   :  { %v10575_v35 = vpop.f32.mrf.mxu0 }
 0x16f   :  { %v1484_v48 = vsel %vm1403_vm2, %v10575_v35, -inf }
 0x170   :  { %v12540_v32 = vmax.f32 %v15445_v30, %v1484_v48  ;;  %v12542_v0 = vpop.f32.mrf.mxu0 }
 0x172   :  { %v10578_v6 = vpop.f32.mrf.mxu0 }
 0x173   :  { %v1498_v11 = vsel %vm1403_vm2, %v10578_v6, -inf }
 0x174   :  { %v12548_v50 = vmax.f32 %v15446_v46, %v1498_v11  ;;  %v12550_v58 = vpop.f32.mrf.mxu0 }
 0x176   :  { %v10581_v18 = vpop.f32.mrf.mxu0 }
 0x177   :  { %v1512_v35 = vsel %vm1403_vm2, %v10581_v18, -inf }
 0x178   :  { %v12556_v39 = vmax.f32 %v15447_v55, %v1512_v35  ;;  %v12558_v48 = vpop.f32.mrf.mxu0 }
 0x17a   :  { %v10584_v30 = vpop.f32.mrf.mxu0 }
 0x17b   :  { %v1526_v6 = vsel %vm1403_vm2, %v10584_v30, -inf }
 0x17c   :  { %v12564_v28 = vmax.f32 %v15448_v22, %v1526_v6  ;;  %v12566_v11 = vpop.f32.mrf.mxu0 }
 0x17e   :  { %v10587_v46 = vpop.f32.mrf.mxu0 }
 0x17f   :  { %v1540_v18 = vsel %vm1403_vm2, %v10587_v46, -inf }
 0x180   :  { %v12572_v51 = vmax.f32 %v15449_v42, %v1540_v18  ;;  %v12574_v35 = vpop.f32.mrf.mxu0 }
 0x182   :  { %v10590_v55 = vpop.f32.mrf.mxu0 }
 0x183   :  { %v1554_v30 = vsel %vm1403_vm2, %v10590_v55, -inf }
 0x184   :  { %v12580_v43 = vmax.f32 %v15450_v59, %v1554_v30  ;;  %v12582_v6 = vpop.f32.mrf.mxu0 }
 0x186   :  { %v10593_v22 = vpop.f32.mrf.mxu0 }
 0x187   :  { %v1568_v46 = vsel %vm1403_vm2, %v10593_v22, -inf }
 0x188   :  { %v12588_v34 = vmax.f32 %v15451_v63, %v1568_v46  ;;  %v12590_v18 = vpop.f32.mrf.mxu0 }
 0x18a   :  { %v10596_v42 = vpop.f32.mrf.mxu0 }
 0x18b   :  { %v1582_v55 = vsel %vm1403_vm2, %v10596_v42, -inf }
 0x18c   :  { %v12596_v4 = vmax.f32 %v15452_v24, %v1582_v55  ;;  %v12598_v30 = vpop.f32.mrf.mxu0 }
 0x18e   :  { %v10599_v59 = vpop.f32.mrf.mxu0 }
 0x18f   :  { %v1596_v22 = vsel %vm1403_vm2, %v10599_v59, -inf }
 0x190   :  { %v12604_v3 = vmax.f32 %v15453_v52, %v1596_v22  ;;  %v12606_v46 = vpop.f32.mrf.mxu0 }
 0x192   :  { %v10602_v63 = vpop.f32.mrf.mxu0 }
 0x193   :  { %v1610_v42 = vsel %vm1403_vm2, %v10602_v63, -inf }
 0x194   :  { %v12612_v12 = vmax.f32 %v15454_v37, %v1610_v42  ;;  %v12614_v55 = vpop.f32.mrf.mxu0 }
 0x196   :  { %v10605_v24 = vpop.f32.mrf.mxu0 }
 0x197   :  { %v1624_v59 = vsel %vm1403_vm2, %v10605_v24, -inf  ;;  %v1405_v24 = vsel %vm1403_vm2, %v12250_v2, -inf  ;;  %v1419_v2 = vsel %vm1403_vm2, %v12269_v14, -inf }
 0x198   :  { %v12620_v15 = vmax.f32 %v15455_v29, %v1624_v59  ;;  %v12622_v22 = vpop.f32.mrf.mxu0  ;;  %v1420_v14 = vmax.f32 %v1418_v41, %v1419_v2  ;;  %v1432_v2 = vsel %vm1403_vm2, %v12051_v49, -inf }
 0x19a   :  { %v10608_v52 = vpop.f32.mrf.mxu0 }
 0x19b   :  { %v1638_v63 = vsel %vm1403_vm2, %v10608_v52, -inf  ;;  %v1406_v52 = vmax.f32 %v1404_v17, %v1405_v24 }
 0x19c   :  { %v12628_v19 = vmax.f32 %v15456_v21, %v1638_v63  ;;  %v12630_v42 = vpop.f32.mrf.mxu0 }
 0x19d   :  { %v1408_v31 = vmax.f32 %v1406_v52, %v1407_v27  ;;  %v1422_v27 = vmax.f32 %v1420_v14, %v1421_v36 }
 0x19e   :  { %v10611_v37 = vpop.f32.mrf.mxu0 }
 0x19f   :  { %v1652_v44 = vsel %vm1403_vm2, %v10611_v37, -inf }
 0x1a0   :  { %v12638_v59 = vmax.f32 %v15457_v23, %v1652_v44  ;;  %v12640_v29 = vpop.f32.mrf.mxu0 }
 0x1a2   :  { %15458 = vst [vmem:[#allocation27_spill] sm:$0xff] %v12638_v59  ;;  %v10614_v63 = vpop.f32.mrf.mxu0  ;;  %v1433_v59 = vsel %vm1403_vm2, %v12288_v26, -inf }
 0x1a3   :  { %v1416_v21 = vsel %vm1403_vm2, %v10614_v63, -inf  ;;  %v1434_v26 = vmax.f32 %v1432_v2, %v1433_v59 }
 0x1a4   :  { %v1417_v37 = vmax.f32 %v12493_v33, %v1416_v21  ;;  %v1224_v44 = vpop.f32.mrf.mxu0 }
 0x1a5   :  { %v1409_v24 = vsel %vm1403_vm2, %v1224_v44, -inf }
 0x1a6   :  { %v1664_v23 = vadd.f32 %v12652_v7, %v1417_v37  ;;  %v1410_v17 = vmax.f32 %v1408_v31, %v1409_v24  ;;  %v10617_v63 = vpop.f32.mrf.mxu0  ;;  %v1435_v31 = vsel %vm1403_vm2, %v12518_v10, -inf }
 0x1a7   :  { %v1430_v33 = vsel %vm1403_vm2, %v10617_v63, -inf  ;;  %v1436_v14 = vmax.f32 %v1434_v26, %v1435_v31  ;;  %v1446_v63 = vsel %vm1403_vm2, %v12063_v53, -inf }
 0x1a8   :  { %v1700_v52 = vmax.f32 %v1664_v23, 0.0  ;;  %v1663_v45 = vadd.f32 %v12652_v7, %v1410_v17  ;;  %v1431_v13 = vmax.f32 %v12508_v25, %v1430_v33  ;;  %v1234_v21 = vpop.f32.mrf.mxu0  ;;  %v1447_v25 = vsel %vm1403_vm2, %v12307_v38, -inf }
 0x1a9   :  { %v1423_v37 = vsel %vm1403_vm2, %v1234_v21, -inf  ;;  %v1449_v33 = vsel %vm1403_vm2, %v12526_v40, -inf  ;;  %v1448_v38 = vmax.f32 %v1446_v63, %v1447_v25 }
 0x1aa   :  { %1737 = vst.msk [vmem:[#allocation2 + $0x8] sm:$0xf] %vm1736_vm4, %v1700_v52  ;;  %v1699_v44 = vmax.f32 %v1663_v45, 0.0  ;;  %v1666_v41 = vadd.f32 %v12652_v7, %v1431_v13  ;;  %v1424_v36 = vmax.f32 %v1422_v27, %v1423_v37  ;;  %v10620_v24 = vpop.f32.mrf.mxu0 }
 0x1ab   :  { %1742 = vst.msk [vmem:[#allocation2 + $0xc] sm:$0xf0] %vm1741_vm5, %v1700_v52  ;;  %v1444_v49 = vsel %vm1403_vm2, %v10620_v24, -inf  ;;  %v1450_v31 = vmax.f32 %v1448_v38, %v1449_v33  ;;  %v1474_v33 = vsel %vm1403_vm2, %v12087_v61, -inf }
 0x1ac   :  { %1735 = vst.msk [vmem:[#allocation2] sm:$0xff] %vm1403_vm2, %v1699_v44  ;;  %v1702_v10 = vmax.f32 %v1666_v41, 0.0  ;;  %v1665_v59 = vadd.f32 %v12652_v7, %v1424_v36  ;;  %v1445_v23 = vmax.f32 %v12516_v9, %v1444_v49  ;;  %v1244_v17 = vpop.f32.mrf.mxu0  ;;  %v1461_v9 = vsel %vm1403_vm2, %v12326_v62, -inf }
 0x1ad   :  { %v1437_v27 = vsel %vm1403_vm2, %v1244_v17, -inf  ;;  %v1460_v44 = vsel %vm1403_vm2, %v12075_v57, -inf  ;;  %v1463_v41 = vsel %vm1403_vm2, %v12534_v60, -inf }
 0x1ae   :  { %1747 = vst.msk [vmem:[#allocation2 + $0x20] sm:$0xff] %vm1403_vm2, %v1702_v10  ;;  %v1701_v52 = vmax.f32 %v1665_v59, 0.0  ;;  %v1668_v45 = vadd.f32 %v12652_v7, %v1445_v23  ;;  %v1438_v13 = vmax.f32 %v1436_v14, %v1437_v27  ;;  %v10623_v21 = vpop.f32.mrf.mxu0  ;;  %v1462_v62 = vmax.f32 %v1460_v44, %v1461_v9 }
 0x1af   :  { %v1458_v2 = vsel %vm1403_vm2, %v10623_v21, -inf  ;;  %v1489_v21 = vsel %vm1403_vm2, %v12349_v47, -inf  ;;  %v1488_v47 = vsel %vm1403_vm2, %v12099_v1, -inf  ;;  %v1491_v44 = vsel %vm1403_vm2, %v12550_v58, -inf  ;;  %v9444_v1 = vld [vmem:[%s15391_s3 + $0xc8] sm:$0x3] }
 0x1b0   :  { %1743 = vst.msk [vmem:[#allocation2 + $0x14] sm:$0xff] %vm1403_vm2, %v1701_v52  ;;  %v1704_v53 = vmax.f32 %v1668_v45, 0.0  ;;  %v1667_v40 = vadd.f32 %v12652_v7, %v1438_v13  ;;  %v1459_v37 = vmax.f32 %v12524_v8, %v1458_v2  ;;  %v1254_v26 = vpop.f32.mrf.mxu0  ;;  %v1475_v8 = vsel %vm1403_vm2, %v12338_v16, -inf }
 0x1b1   :  { %v1451_v36 = vsel %vm1403_vm2, %v1254_v26, -inf  ;;  %v1464_v57 = vmax.f32 %v1462_v62, %v1463_v41  ;;  %v1477_v16 = vsel %vm1403_vm2, %v12542_v0, -inf  ;;  %v1476_v38 = vmax.f32 %v1474_v33, %v1475_v8  ;;  %v9405_v0 = vld [vmem:[%s15391_s3 + $0xa0] sm:$0xff] }
 0x1b2   :  { %1753 = vst.msk [vmem:[#allocation2 + $0x34] sm:$0xff] %vm1403_vm2, %v1704_v53  ;;  %v1703_v24 = vmax.f32 %v1667_v40, 0.0  ;;  %v1670_v25 = vadd.f32 %v12652_v7, %v1459_v37  ;;  %v1452_v49 = vmax.f32 %v1450_v31, %v1451_v36  ;;  %v10626_v14 = vpop.f32.mrf.mxu0  ;;  %v1503_v58 = vsel %vm1403_vm2, %v12360_v54, -inf  ;;  %v1812_v54 = vld [vmem:[%s15391_s3] sm:$0xff] }
 0x1b3   :  { %v1472_v10 = vsel %vm1403_vm2, %v10626_v14, -inf  ;;  %v1814_v59 = vld [vmem:[#allocation2 + $0x1] sm:$0xff]  ;;  %v1478_v2 = vmax.f32 %v1476_v38, %v1477_v16 }
 0x1b4   :  { %1748 = vst.msk [vmem:[#allocation2 + $0x28] sm:$0xf] %vm1736_vm4, %v1703_v24  ;;  %v1706_v60 = vmax.f32 %v1670_v25, 0.0  ;;  %v1669_v23 = vadd.f32 %v12652_v7, %v1452_v49  ;;  %v1473_v17 = vmax.f32 %v12532_v20, %v1472_v10  ;;  %v1264_v63 = vpop.f32.mrf.mxu0  ;;  %10670 = vmatprep.mubr.msk.f32.mxu0 %vm1403_vm2, %v1814_v59 }
 0x1b5   :  { %1752 = vst.msk [vmem:[#allocation2 + $0x2c] sm:$0xf0] %vm1741_vm5, %v1703_v24  ;;  %v1465_v27 = vsel %vm1403_vm2, %v1264_v63, -inf  ;;  %v12726_v26 = vld [vmem:[#allocation2 + $0x20] sm:$0xff]  ;;  %v1502_v63 = vsel %vm1403_vm2, %v12111_v5, -inf }
 0x1b6   :  { %1758 = vst.msk [vmem:[#allocation2 + $0x48] sm:$0xf] %vm1736_vm4, %v1706_v60  ;;  %v1705_v52 = vmax.f32 %v1669_v23, 0.0  ;;  %v1672_v45 = vadd.f32 %v12652_v7, %v1473_v17  ;;  %v1466_v20 = vmax.f32 %v1464_v57, %v1465_v27  ;;  %v10629_v13 = vpop.f32.mrf.mxu0  ;;  %v9443_v17 = vld [vmem:[%s15391_s3 + $0xc0] sm:$0xff]  ;;  %v1504_v16 = vmax.f32 %v1502_v63, %v1503_v58  ;;  %v12776_v5 = vld [vmem:[%s15391_s3 + $0x28] sm:$0x3] }
 0x1b7   :  { %1762 = vst.msk [vmem:[#allocation2 + $0x4c] sm:$0xf0] %vm1741_vm5, %v1706_v60  ;;  %v1486_v61 = vsel %vm1403_vm2, %v10629_v13, -inf  ;;  %v1815_v9 = vld [vmem:[#allocation2 + $0x11] sm:$0xff] }
 0x1b8   :  { %1757 = vst.msk [vmem:[#allocation2 + $0x40] sm:$0xff] %vm1403_vm2, %v1705_v52  ;;  %v1708_v31 = vmax.f32 %v1672_v45, 0.0  ;;  %v1671_v53 = vadd.f32 %v12652_v7, %v1466_v20  ;;  %v1487_v40 = vmax.f32 %v12540_v32, %v1486_v61  ;;  %v1274_v37 = vpop.f32.mrf.mxu0  ;;  %10671 = vmatmul.mubr.msk.f32.vlgmr.msra.gmra.mxu0 %vm1403_vm2, %v1815_v9  ;;  %v1490_v32 = vmax.f32 %v1488_v47, %v1489_v21  ;;  %v15459_v20 = vld [vmem:[#allocation26_spill] sm:$0xff] }
 0x1b9   :  { %v1479_v41 = vsel %vm1403_vm2, %v1274_v37, -inf  ;;  %10947 = vmatpush3.msk.msra.mxu0 %vm1881_vm3, %v12393_v56  ;;  %10950 = vmatprep.mubr.msk.f32.mxu0 %vm1403_vm2, %v12726_v26  ;;  %v15461_v47 = vld [vmem:[#allocation6_spill] sm:$0xff] }
 0x1ba   :  { %1767 = vst.msk [vmem:[#allocation2 + $0x60] sm:$0xff] %vm1403_vm2, %v1708_v31  ;;  %v1707_v36 = vmax.f32 %v1671_v53, 0.0  ;;  %v1674_v62 = vadd.f32 %v12652_v7, %v1487_v40  ;;  %v1480_v24 = vmax.f32 %v1478_v2, %v1479_v41  ;;  %v10632_v25 = vpop.f32.mrf.mxu0  ;;  %10948 = vmatprep.subr.mxu0 %v9405_v0  ;;  %v1492_v10 = vmax.f32 %v1490_v32, %v1491_v44 }
 0x1bb   :  { %v1500_v56 = vsel %vm1403_vm2, %v10632_v25, -inf  ;;  %10949 = vmatpush3.msra.mxu0 %v9405_v0  ;;  %v1816_v49 = vld [vmem:[#allocation2 + $0x21] sm:$0xff]  ;;  %v1516_v44 = vsel %vm1403_vm2, %v15461_v47, -inf  ;;  %v1519_v41 = vsel %vm1403_vm2, %v12566_v11, -inf  ;;  %v15465_v47 = vld [vmem:[#allocation8_spill] sm:$0xff] }
 0x1bc   :  { %v12745_v14 = vld [vmem:[#allocation2 + $0x30] sm:$0xff]  ;;  %1763 = vst.msk [vmem:[#allocation2 + $0x54] sm:$0xff] %vm1403_vm2, %v1707_v36  ;;  %v1710_v59 = vmax.f32 %v1674_v62, 0.0  ;;  %v1673_v57 = vadd.f32 %v12652_v7, %v1480_v24  ;;  %v1501_v60 = vmax.f32 %v12548_v50, %v1500_v56  ;;  %v1284_v23 = vpop.f32.mrf.mxu0  ;;  %10673 = vmatprep.mubr.msk.f32.mxu1 %vm1403_vm2, %v1816_v49  ;;  %v1505_v50 = vsel %vm1403_vm2, %v12558_v48, -inf  ;;  %11002 = vmatprep.subr.msk.mxu0 %vm1881_vm3, %v9444_v1  ;;  %v12789_v0 = vld [vmem:[%s15391_s3 + $0xe8] sm:$0x3] }
 0x1bd   :  { %v12747_v8 = vld [vmem:[#allocation2 + $0x31] sm:$0xff]  ;;  %10951 = vmatmul.mubr.msk.f32.vlgmr.msra.gmra.mxu0 %vm1403_vm2, %v12745_v14  ;;  %v1493_v33 = vsel %vm1403_vm2, %v1284_v23, -inf  ;;  %v1506_v2 = vmax.f32 %v1504_v16, %v1505_v50  ;;  %v15462_v11 = vld [vmem:[#allocation17_spill] sm:$0xff]  ;;  %v1533_v50 = vsel %vm1403_vm2, %v12574_v35, -inf }
 0x1be   :  { %10674 = vmatmul.mubr.msk.f32.vlgmr.msra.gmra.mxu1 %vm1403_vm2, %v12747_v8  ;;  %1773 = vst.msk [vmem:[#allocation2 + $0x74] sm:$0xff] %vm1403_vm2, %v1710_v59  ;;  %v1709_v27 = vmax.f32 %v1673_v57, 0.0  ;;  %v1676_v38 = vadd.f32 %v12652_v7, %v1501_v60  ;;  %v1494_v52 = vmax.f32 %v1492_v10, %v1493_v33  ;;  %v10635_v45 = vpop.f32.mrf.mxu0  ;;  %11003 = vmatpush3.msk.msra.mxu0 %vm1881_vm3, %v9444_v1  ;;  %v15460_v48 = vld [vmem:[#allocation16_spill] sm:$0xff]  ;;  %v1531_v1 = vsel %vm1403_vm2, %v15462_v11, -inf }
 0x1bf   :  { %10695 = vmatpush3.msk.msra.mxu1 %vm1881_vm3, %v15459_v20  ;;  %v1517_v13 = vsel %vm1403_vm2, %v15460_v48, -inf  ;;  %v1514_v21 = vsel %vm1403_vm2, %v10635_v45, -inf  ;;  %v12782_v61 = vld [vmem:[#allocation2 + $0x41] sm:$0xff]  ;;  %11004 = vmatprep.subr.mxu0 %v9443_v17 }
 0x1c0   :  { %v12784_v9 = vld [vmem:[#allocation2 + $0x40] sm:$0xff]  ;;  %10696 = vmatprep.subr.mxu1 %v1812_v54  ;;  %1768 = vst.msk [vmem:[#allocation2 + $0x68] sm:$0xf] %vm1736_vm4, %v1709_v27  ;;  %v1712_v31 = vmax.f32 %v1676_v38, 0.0  ;;  %v1675_v53 = vadd.f32 %v12652_v7, %v1494_v52  ;;  %v1515_v40 = vmax.f32 %v12556_v39, %v1514_v21  ;;  %v1294_v37 = vpop.f32.mrf.mxu0  ;;  %10676 = vmatprep.mubr.msk.f32.mxu1 %vm1403_vm2, %v12782_v61 }
 0x1c1   :  { %1772 = vst.msk [vmem:[#allocation2 + $0x6c] sm:$0xf0] %vm1741_vm5, %v1709_v27  ;;  %10953 = vmatprep.mubr.msk.f32.mxu0 %vm1403_vm2, %v12784_v9  ;;  %v1507_v32 = vsel %vm1403_vm2, %v1294_v37, -inf  ;;  %10697 = vmatpush3.msra.mxu1 %v1812_v54  ;;  %v1518_v36 = vmax.f32 %v1516_v44, %v1517_v13  ;;  %v12825_v54 = vld [vmem:[#allocation2 + $0x60] sm:$0xff]  ;;  %v1544_v44 = vsel %vm1403_vm2, %v15465_v47, -inf  ;;  %v1575_v47 = vsel %vm1403_vm2, %v12598_v30, -inf }
 0x1c2   :  { %11005 = vmatpush3.msra.mxu0 %v9443_v17  ;;  %1778 = vst.msk [vmem:[#allocation2 + $0x88] sm:$0xf] %vm1736_vm4, %v1712_v31  ;;  %v1711_v39 = vmax.f32 %v1675_v53, 0.0  ;;  %v1678_v62 = vadd.f32 %v12652_v7, %v1515_v40  ;;  %v1508_v24 = vmax.f32 %v1506_v2, %v1507_v32  ;;  %v10638_v25 = vpop.f32.mrf.mxu0  ;;  %10722 = vmatprep.subr.msk.mxu1 %vm1881_vm3, %v12776_v5  ;;  %v15463_v17 = vld [vmem:[#allocation7_spill] sm:$0xff]  ;;  %v15464_v45 = vld [vmem:[#allocation18_spill] sm:$0xff] }
 0x1c3   :  { %1782 = vst.msk [vmem:[#allocation2 + $0x8c] sm:$0xf0] %vm1741_vm5, %v1712_v31  ;;  %11058 = vmatprep.subr.msk.mxu0 %vm1881_vm3, %v12789_v0  ;;  %v1528_v58 = vsel %vm1403_vm2, %v10638_v25, -inf  ;;  %v12814_v56 = vld [vmem:[#allocation2 + $0x51] sm:$0xff]  ;;  %v1520_v10 = vmax.f32 %v1518_v36, %v1519_v41  ;;  %v1530_v63 = vsel %vm1403_vm2, %v15463_v17, -inf  ;;  %v1545_v20 = vsel %vm1403_vm2, %v15464_v45, -inf }
 0x1c4   :  { %v12816_v49 = vld [vmem:[#allocation2 + $0x50] sm:$0xff]  ;;  %1777 = vst.msk [vmem:[#allocation2 + $0x80] sm:$0xff] %vm1403_vm2, %v1711_v39  ;;  %v1714_v59 = vmax.f32 %v1678_v62, 0.0  ;;  %v1677_v57 = vadd.f32 %v12652_v7, %v1508_v24  ;;  %v1529_v60 = vmax.f32 %v12564_v28, %v1528_v58  ;;  %v1304_v23 = vpop.f32.mrf.mxu0  ;;  %10677 = vmatmul.mubr.msk.f32.gmra.mxu1 %vm1403_vm2, %v12814_v56  ;;  %v1532_v28 = vmax.f32 %v1530_v63, %v1531_v1 }
 0x1c5   :  { %10954 = vmatmul.mubr.msk.f32.gmra.mxu0 %vm1403_vm2, %v12816_v49  ;;  %v1521_v33 = vsel %vm1403_vm2, %v1304_v23, -inf  ;;  %v1547_v41 = vsel %vm1403_vm2, %v12582_v6, -inf  ;;  %v1546_v36 = vmax.f32 %v1544_v44, %v1545_v20  ;;  %v15466_v25 = vld [vmem:[#allocation19_spill] sm:$0xff]  ;;  %v15467_v23 = vld [vmem:[#allocation9_spill] sm:$0xff]  ;;  %v1561_v63 = vsel %vm1403_vm2, %v12590_v18, -inf }
 0x1c6   :  { %10956 = vmatprep.mubr.msk.f32.mxu0 %vm1403_vm2, %v12825_v54  ;;  %1787 = vst.msk [vmem:[#allocation2 + $0xa0] sm:$0xff] %vm1403_vm2, %v1714_v59  ;;  %v1713_v16 = vmax.f32 %v1677_v57, 0.0  ;;  %v1680_v27 = vadd.f32 %v12652_v7, %v1529_v60  ;;  %v1522_v38 = vmax.f32 %v1520_v10, %v1521_v33  ;;  %v10641_v52 = vpop.f32.mrf.mxu0  ;;  %v1534_v2 = vmax.f32 %v1532_v28, %v1533_v50 }
 0x1c7   :  { %v1542_v48 = vsel %vm1403_vm2, %v10641_v52, -inf  ;;  %v12839_v13 = vld [vmem:[#allocation2 + $0x61] sm:$0xff]  ;;  %v1559_v11 = vsel %vm1403_vm2, %v15466_v25, -inf  ;;  %v1548_v6 = vmax.f32 %v1546_v36, %v1547_v41  ;;  %v1558_v17 = vsel %vm1403_vm2, %v15467_v23, -inf }
 0x1c8   :  { %v12841_v35 = vld [vmem:[#allocation2 + $0x70] sm:$0xff]  ;;  %1783 = vst.msk [vmem:[#allocation2 + $0x94] sm:$0xff] %vm1403_vm2, %v1713_v16  ;;  %v1716_v31 = vmax.f32 %v1680_v27, 0.0  ;;  %v1679_v53 = vadd.f32 %v12652_v7, %v1522_v38  ;;  %v1543_v40 = vmax.f32 %v12572_v51, %v1542_v48  ;;  %v1314_v37 = vpop.f32.mrf.mxu0  ;;  %10679 = vmatprep.mubr.msk.f32.mxu1 %vm1403_vm2, %v12839_v13  ;;  %v1560_v33 = vmax.f32 %v1558_v17, %v1559_v11 }
 0x1c9   :  { %v12843_v21 = vld [vmem:[#allocation2 + $0x71] sm:$0xff]  ;;  %10957 = vmatmul.mubr.msk.f32.gmra.mxu0 %vm1403_vm2, %v12841_v35  ;;  %v1535_v32 = vsel %vm1403_vm2, %v1314_v37, -inf }
 0x1ca   :  { %10680 = vmatmul.mubr.msk.f32.gmra.mxu1 %vm1403_vm2, %v12843_v21  ;;  %1793 = vst.msk [vmem:[#allocation2 + $0xb4] sm:$0xff] %vm1403_vm2, %v1716_v31  ;;  %v1715_v51 = vmax.f32 %v1679_v53, 0.0  ;;  %v1682_v39 = vadd.f32 %v12652_v7, %v1543_v40  ;;  %v1536_v62 = vmax.f32 %v1534_v2, %v1535_v32  ;;  %v10644_v24 = vpop.f32.mrf.mxu0  ;;  %v15468_v38 = vld [vmem:[#allocation20_spill] sm:$0xff]  ;;  %v1562_v18 = vmax.f32 %v1560_v33, %v1561_v63  ;;  %v15469_v40 = vld [vmem:[#allocation10_spill] sm:$0xff] }
 0x1cb   :  { %v1556_v1 = vsel %vm1403_vm2, %v10644_v24, -inf  ;;  %v12864_v58 = vld [vmem:[#allocation2 + $0x80] sm:$0xff]  ;;  %v1573_v52 = vsel %vm1403_vm2, %v15468_v38, -inf  ;;  %v1572_v37 = vsel %vm1403_vm2, %v15469_v40, -inf }
 0x1cc   :  { %1788 = vst.msk [vmem:[#allocation2 + $0xa8] sm:$0xf] %vm1736_vm4, %v1715_v51  ;;  %v1718_v10 = vmax.f32 %v1682_v39, 0.0  ;;  %v1681_v59 = vadd.f32 %v12652_v7, %v1536_v62  ;;  %v1557_v57 = vmax.f32 %v12580_v43, %v1556_v1  ;;  %v1324_v60 = vpop.f32.mrf.mxu0  ;;  %10959 = vmatprep.mubr.msk.f32.mxu0 %vm1403_vm2, %v12864_v58  ;;  %v1574_v41 = vmax.f32 %v1572_v37, %v1573_v52  ;;  %v15470_v39 = vld [vmem:[#allocation21_spill] sm:$0xff] }
 0x1cd   :  { %1792 = vst.msk [vmem:[#allocation2 + $0xac] sm:$0xf0] %vm1741_vm5, %v1715_v51  ;;  %v1549_v50 = vsel %vm1403_vm2, %v1324_v60, -inf  ;;  %v1587_v62 = vsel %vm1403_vm2, %v15470_v39, -inf }
 0x1ce   :  { %1739 = vst.msk [vmem:[#allocation2 + $0xc8] sm:$0xf] %vm1736_vm4, %v1718_v10  ;;  %v1717_v28 = vmax.f32 %v1681_v59, 0.0  ;;  %v1684_v43 = vadd.f32 %v12652_v7, %v1557_v57  ;;  %v1550_v16 = vmax.f32 %v1548_v6, %v1549_v50  ;;  %v10647_v27 = vpop.f32.mrf.mxu0  ;;  %v1576_v25 = vmax.f32 %v1574_v41, %v1575_v47  ;;  %v15474_v41 = vld [vmem:[#allocation23_spill] sm:$0xff] }
 0x1cf   :  { %1744 = vst.msk [vmem:[#allocation2 + $0xcc] sm:$0xf0] %vm1741_vm5, %v1718_v10  ;;  %v1570_v45 = vsel %vm1403_vm2, %v10647_v27, -inf  ;;  %v12883_v20 = vld [vmem:[#allocation2 + $0x90] sm:$0xff]  ;;  %v1589_v57 = vsel %vm1403_vm2, %v12606_v46, -inf }
 0x1d0   :  { %1738 = vst.msk [vmem:[#allocation2 + $0xc0] sm:$0xff] %vm1403_vm2, %v1717_v28  ;;  %v1720_v48 = vmax.f32 %v1684_v43, 0.0  ;;  %v1683_v2 = vadd.f32 %v12652_v7, %v1550_v16  ;;  %v1571_v31 = vmax.f32 %v12588_v34, %v1570_v45  ;;  %v1334_v53 = vpop.f32.mrf.mxu0  ;;  %10960 = vmatmul.mubr.msk.f32.gmra.mxu0 %vm1403_vm2, %v12883_v20  ;;  %v15471_v10 = vld [vmem:[#allocation11_spill] sm:$0xff]  ;;  %v15472_v28 = vld [vmem:[#allocation22_spill] sm:$0xff] }
 0x1d1   :  { %v1563_v44 = vsel %vm1403_vm2, %v1334_v53, -inf  ;;  %v1586_v59 = vsel %vm1403_vm2, %v15471_v10, -inf }
 0x1d2   :  { %1749 = vst.msk [vmem:[#allocation2 + $0xe0] sm:$0xff] %vm1403_vm2, %v1720_v48  ;;  %v1719_v32 = vmax.f32 %v1683_v2, 0.0  ;;  %v1686_v36 = vadd.f32 %v12652_v7, %v1571_v31  ;;  %v1564_v51 = vmax.f32 %v1562_v18, %v1563_v44  ;;  %v10650_v34 = vpop.f32.mrf.mxu0  ;;  %v1588_v23 = vmax.f32 %v1586_v59, %v1587_v62  ;;  %v15473_v18 = vld [vmem:[#allocation12_spill] sm:$0xff] }
 0x1d3   :  { %v1584_v24 = vsel %vm1403_vm2, %v10650_v34, -inf  ;;  %v1600_v48 = vsel %vm1403_vm2, %v15473_v18, -inf  ;;  %v1603_v2 = vsel %vm1403_vm2, %v12614_v55, -inf  ;;  %v1615_v55 = vsel %vm1403_vm2, %v15474_v41, -inf }
 0x1d4   :  { %1745 = vst.msk [vmem:[#allocation2 + $0xd4] sm:$0xff] %vm1403_vm2, %v1719_v32  ;;  %v1722_v11 = vmax.f32 %v1686_v36, 0.0  ;;  %v1685_v30 = vadd.f32 %v12652_v7, %v1564_v51  ;;  %v1585_v1 = vmax.f32 %v12596_v4, %v1584_v24  ;;  %v1344_v6 = vpop.f32.mrf.mxu0  ;;  %v1601_v4 = vsel %vm1403_vm2, %v15472_v28, -inf }
 0x1d5   :  { %v1577_v60 = vsel %vm1403_vm2, %v1344_v6, -inf  ;;  %v1590_v27 = vmax.f32 %v1588_v23, %v1589_v57  ;;  %v1602_v40 = vmax.f32 %v1600_v48, %v1601_v4 }
 0x1d6   :  { %1755 = vst.msk [vmem:[#allocation2 + $0xf4] sm:$0xff] %vm1403_vm2, %v1722_v11  ;;  %v1721_v17 = vmax.f32 %v1685_v30, 0.0  ;;  %v1688_v63 = vadd.f32 %v12652_v7, %v1585_v1  ;;  %v1578_v50 = vmax.f32 %v1576_v25, %v1577_v60  ;;  %v10653_v33 = vpop.f32.mrf.mxu0  ;;  %v15475_v25 = vld [vmem:[#allocation13_spill] sm:$0xff]  ;;  %v1617_v30 = vsel %vm1403_vm2, %v12622_v22, -inf  ;;  %v15476_v60 = vld [vmem:[#allocation24_spill] sm:$0xff] }
 0x1d7   :  { %v1598_v43 = vsel %vm1403_vm2, %v10653_v33, -inf  ;;  %v1822_v16 = vld [vmem:[#allocation2 + $0xc1] sm:$0xff]  ;;  %v1604_v51 = vmax.f32 %v1602_v40, %v1603_v2  ;;  %v1614_v11 = vsel %vm1403_vm2, %v15475_v25, -inf  ;;  %v1629_v23 = vsel %vm1403_vm2, %v15476_v60, -inf }
 0x1d8   :  { %1750 = vst.msk [vmem:[#allocation2 + $0xe8] sm:$0xf] %vm1736_vm4, %v1721_v17  ;;  %v1724_v46 = vmax.f32 %v1688_v63, 0.0  ;;  %v1687_v38 = vadd.f32 %v12652_v7, %v1578_v50  ;;  %v1599_v52 = vmax.f32 %v12604_v3, %v1598_v43  ;;  %v1354_v45 = vpop.f32.mrf.mxu0  ;;  %10682 = vmatprep.mubr.msk.f32.mxu1 %vm1403_vm2, %v1822_v16  ;;  %v1616_v6 = vmax.f32 %v1614_v11, %v1615_v55 }
 0x1d9   :  { %1754 = vst.msk [vmem:[#allocation2 + $0xec] sm:$0xf0] %vm1741_vm5, %v1721_v17  ;;  %v1591_v31 = vsel %vm1403_vm2, %v1354_v45, -inf  ;;  %v12923_v53 = vld [vmem:[#allocation2 + $0xe0] sm:$0xff] }
 0x1da   :  { %1760 = vst.msk [vmem:[#allocation2 + $0x108] sm:$0xf] %vm1736_vm4, %v1724_v46  ;;  %v1723_v37 = vmax.f32 %v1687_v38, 0.0  ;;  %v1690_v3 = vadd.f32 %v12652_v7, %v1599_v52  ;;  %v1592_v47 = vmax.f32 %v1590_v27, %v1591_v31  ;;  %v10656_v44 = vpop.f32.mrf.mxu0  ;;  %10962 = vmatprep.mubr.msk.f32.mxu0 %vm1403_vm2, %v12923_v53  ;;  %v1618_v33 = vmax.f32 %v1616_v6, %v1617_v30  ;;  %v15477_v27 = vld [vmem:[#allocation14_spill] sm:$0xff]  ;;  %v15478_v31 = vld [vmem:[#allocation25_spill] sm:$0xff] }
 0x1db   :  { %1764 = vst.msk [vmem:[#allocation2 + $0x10c] sm:$0xf0] %vm1741_vm5, %v1724_v46  ;;  %v1612_v32 = vsel %vm1403_vm2, %v10656_v44, -inf  ;;  %v12933_v36 = vld [vmem:[#allocation2 + $0xd1] sm:$0xff]  ;;  %v1628_v46 = vsel %vm1403_vm2, %v15477_v27, -inf  ;;  %v1631_v38 = vsel %vm1403_vm2, %v12630_v42, -inf }
 0x1dc   :  { %1759 = vst.msk [vmem:[#allocation2 + $0x100] sm:$0xff] %vm1403_vm2, %v1723_v37  ;;  %v1726_v34 = vmax.f32 %v1690_v3, 0.0  ;;  %v1689_v39 = vadd.f32 %v12652_v7, %v1592_v47  ;;  %v1613_v62 = vmax.f32 %v12612_v12, %v1612_v32  ;;  %v1364_v24 = vpop.f32.mrf.mxu0  ;;  %10683 = vmatmul.mubr.msk.f32.gmra.mxu1 %vm1403_vm2, %v12933_v36  ;;  %v1630_v45 = vmax.f32 %v1628_v46, %v1629_v23 }
 0x1dd   :  { %v1605_v1 = vsel %vm1403_vm2, %v1364_v24, -inf  ;;  %v1643_v40 = vsel %vm1403_vm2, %v15478_v31, -inf  ;;  %v9273_v31 = vld [vmem:[%s15391_s3 + $0x38] sm:$0x3] }
 0x1de   :  { %1769 = vst.msk [vmem:[#allocation2 + $0x120] sm:$0xff] %vm1403_vm2, %v1726_v34  ;;  %v1725_v10 = vmax.f32 %v1689_v39, 0.0  ;;  %v1692_v59 = vadd.f32 %v12652_v7, %v1613_v62  ;;  %v1606_v57 = vmax.f32 %v1604_v51, %v1605_v1  ;;  %v10659_v12 = vpop.f32.mrf.mxu0  ;;  %v1632_v47 = vmax.f32 %v1630_v45, %v1631_v38  ;;  %v15479_v51 = vld [vmem:[#allocation15_spill] sm:$0xff]  ;;  %v1796_v45 = vld [vmem:[#allocation2] sm:$0xff] }
 0x1df   :  { %v1626_v17 = vsel %vm1403_vm2, %v10659_v12, -inf  ;;  %v12950_v63 = vld [vmem:[#allocation2 + $0xe1] sm:$0xff]  ;;  %v1642_v34 = vsel %vm1403_vm2, %v15479_v51, -inf  ;;  %v1645_v39 = vsel %vm1403_vm2, %v12640_v29, -inf  ;;  %v15480_v12 = vld [vmem:[#allocation27_spill] sm:$0xff]  ;;  %v13109_v51 = vld [vmem:[#allocation2 + $0x92] sm:$0xff] }
 0x1e0   :  { %v12952_v50 = vld [vmem:[#allocation2 + $0xf0] sm:$0xff]  ;;  %1765 = vst.msk [vmem:[#allocation2 + $0x114] sm:$0xff] %vm1403_vm2, %v1725_v10  ;;  %v1728_v28 = vmax.f32 %v1692_v59, 0.0  ;;  %v1691_v4 = vadd.f32 %v12652_v7, %v1606_v57  ;;  %v1627_v43 = vmax.f32 %v12620_v15, %v1626_v17  ;;  %v1374_v16 = vpop.f32.mrf.mxu0  ;;  %10685 = vmatprep.mubr.msk.f32.mxu1 %vm1403_vm2, %v12950_v63  ;;  %v1644_v24 = vmax.f32 %v1642_v34, %v1643_v40  ;;  %v13054_v40 = vld [vmem:[#allocation2 + $0x22] sm:$0xff] }
 0x1e1   :  { %v12954_v22 = vld [vmem:[#allocation2 + $0xf1] sm:$0xff]  ;;  %10963 = vmatmul.mubr.msk.f32.gmra.mxu0 %vm1403_vm2, %v12952_v50  ;;  %v1619_v52 = vsel %vm1403_vm2, %v1374_v16, -inf  ;;  %15481 = vst [vmem:[#allocation26_spill] sm:$0xff] %v13054_v40  ;;  %v13113_v34 = vld [vmem:[#allocation2 + $0xe2] sm:$0xff] }
 0x1e2   :  { %10686 = vmatmul.mubr.msk.f32.gmra.mxu1 %vm1403_vm2, %v12954_v22  ;;  %1775 = vst.msk [vmem:[#allocation2 + $0x134] sm:$0xff] %vm1403_vm2, %v1728_v28  ;;  %v1727_v15 = vmax.f32 %v1691_v4, 0.0  ;;  %v1694_v18 = vadd.f32 %v12652_v7, %v1627_v43  ;;  %v1620_v48 = vmax.f32 %v1618_v33, %v1619_v52  ;;  %v10662_v2 = vpop.f32.mrf.mxu0  ;;  %v1646_v59 = vmax.f32 %v1644_v24, %v1645_v39  ;;  %v13121_v39 = vld [vmem:[#allocation2 + $0xf2] sm:$0xff] }
 0x1e3   :  { %v1640_v37 = vsel %vm1403_vm2, %v10662_v2, -inf  ;;  %v12975_v3 = vld [vmem:[#allocation2 + $0x101] sm:$0xff]  ;;  %15483 = vst [vmem:[#allocation6_spill] sm:$0xff] %v13113_v34  ;;  %15484 = vst [vmem:[#allocation17_spill] sm:$0xff] %v13121_v39 }
 0x1e4   :  { %v12977_v42 = vld [vmem:[#allocation2 + $0x100] sm:$0xff]  ;;  %1770 = vst.msk [vmem:[#allocation2 + $0x128] sm:$0xf] %vm1736_vm4, %v1727_v15  ;;  %v1730_v44 = vmax.f32 %v1694_v18, 0.0  ;;  %v1693_v41 = vadd.f32 %v12652_v7, %v1620_v48  ;;  %v1641_v55 = vmax.f32 %v12628_v19, %v1640_v37  ;;  %v1384_v32 = vpop.f32.mrf.mxu0  ;;  %10688 = vmatprep.mubr.msk.f32.mxu1 %vm1403_vm2, %v12975_v3 }
 0x1e5   :  { %1774 = vst.msk [vmem:[#allocation2 + $0x12c] sm:$0xf0] %vm1741_vm5, %v1727_v15  ;;  %10965 = vmatprep.mubr.msk.f32.mxu0 %vm1403_vm2, %v12977_v42  ;;  %v1633_v62 = vsel %vm1403_vm2, %v1384_v32, -inf  ;;  %v13007_v17 = vld [vmem:[#allocation2 + $0x120] sm:$0xff] }
 0x1e6   :  { %1780 = vst.msk [vmem:[#allocation2 + $0x148] sm:$0xf] %vm1736_vm4, %v1730_v44  ;;  %v1729_v19 = vmax.f32 %v1693_v41, 0.0  ;;  %v1696_v25 = vadd.f32 %v12652_v7, %v1641_v55  ;;  %v1634_v11 = vmax.f32 %v1632_v47, %v1633_v62  ;;  %v10665_v30 = vpop.f32.mrf.mxu0  ;;  %v9253_v48 = vld [vmem:[%s15391_s3 + $0x20] sm:$0xff]  ;;  %v13099_v55 = vld [vmem:[#allocation2 + $0xd0] sm:$0xff] }
 0x1e7   :  { %1784 = vst.msk [vmem:[#allocation2 + $0x14c] sm:$0xf0] %vm1741_vm5, %v1730_v44  ;;  %v1654_v1 = vsel %vm1403_vm2, %v10665_v30, -inf  ;;  %v12996_v6 = vld [vmem:[#allocation2 + $0x111] sm:$0xff]  ;;  %v9481_v37 = vld [vmem:[%s15391_s3 + $0xe0] sm:$0xff] }
 0x1e8   :  { %v12998_v10 = vld [vmem:[#allocation2 + $0x110] sm:$0xff]  ;;  %1779 = vst.msk [vmem:[#allocation2 + $0x140] sm:$0xff] %vm1403_vm2, %v1729_v19  ;;  %v1732_v29 = vmax.f32 %v1696_v25, 0.0  ;;  %v1695_v57 = vadd.f32 %v12652_v7, %v1634_v11  ;;  %v1655_v60 = vmax.f32 %v15480_v12, %v1654_v1  ;;  %v1394_v23 = vpop.f32.mrf.mxu0  ;;  %10689 = vmatmul.mubr.msk.f32.gmra.mxu1 %vm1403_vm2, %v12996_v6  ;;  %v13084_v47 = vld [vmem:[#allocation2 + $0x62] sm:$0xff] }
 0x1e9   :  { %10966 = vmatmul.mubr.msk.f32.gmra.mxu0 %vm1403_vm2, %v12998_v10  ;;  %v1647_v33 = vsel %vm1403_vm2, %v1394_v23, -inf  ;;  %v9520_v44 = vld [vmem:[%s15391_s3 + $0x108] sm:$0x3]  ;;  %v1804_v41 = vld [vmem:[#allocation2 + $0xc0] sm:$0xff]  ;;  %v13133_v24 = vld [vmem:[#allocation2 + $0x112] sm:$0xff] }
 0x1ea   :  { %10968 = vmatprep.mubr.msk.f32.mxu0 %vm1403_vm2, %v13007_v17  ;;  %1789 = vst.msk [vmem:[#allocation2 + $0x160] sm:$0xff] %vm1403_vm2, %v1732_v29  ;;  %v1731_v28 = vmax.f32 %v1695_v57, 0.0  ;;  %v1698_v4 = vadd.f32 %v12652_v7, %v1655_v60  ;;  %v1648_v43 = vmax.f32 %v1646_v59, %v1647_v33  ;;  %v13101_v32 = vld [vmem:[#allocation2 + $0x82] sm:$0xff]  ;;  %v13148_v30 = vld [vmem:[#allocation2 + $0x12] sm:$0xff] }
 0x1eb   :  { %v13014_v16 = vld [vmem:[#allocation2 + $0x121] sm:$0xff]  ;;  %15485 = vst [vmem:[#allocation7_spill] sm:$0xff] %v13148_v30  ;;  %v9272_v59 = vld [vmem:[%s15391_s3 + $0x30] sm:$0xff] }
 0x1ec   :  { %v13016_v27 = vld [vmem:[#allocation2 + $0x130] sm:$0xff]  ;;  %1785 = vst.msk [vmem:[#allocation2 + $0x154] sm:$0xff] %vm1403_vm2, %v1731_v28  ;;  %v1734_v38 = vmax.f32 %v1698_v4, 0.0  ;;  %v1697_v52 = vadd.f32 %v12652_v7, %v1648_v43  ;;  %10691 = vmatprep.mubr.msk.f32.mxu1 %vm1403_vm2, %v13014_v16  ;;  %v13125_v62 = vld [vmem:[#allocation2 + $0x102] sm:$0xff] }
 0x1ed   :  { %v13018_v46 = vld [vmem:[#allocation2 + $0x131] sm:$0xff]  ;;  %10969 = vmatmul.mubr.msk.f32.gmra.mxu0 %vm1403_vm2, %v13016_v27  ;;  %v13137_v19 = vld [vmem:[#allocation2 + $0x122] sm:$0xff] }
 0x1ee   :  { %10692 = vmatmul.mubr.msk.f32.gmra.mxu1 %vm1403_vm2, %v13018_v46  ;;  %1795 = vst.msk [vmem:[#allocation2 + $0x174] sm:$0xff] %vm1403_vm2, %v1734_v38  ;;  %v1733_v15 = vmax.f32 %v1697_v52, 0.0  ;;  %v13036_v7 = vld [vmem:[#allocation2 + $0x10] sm:$0xff]  ;;  %v2226_v25 = vld [vmem:[#allocation2 + $0x2] sm:$0xff] }
 0x1ef   :  { %10698 = vmatprep.mubr.msk.f32.mxu1 %vm1403_vm2, %v1796_v45  ;;  %v13030_v18 = vld [vmem:[#allocation2 + $0x140] sm:$0xff]  ;;  %v13144_v11 = vld [vmem:[#allocation2 + $0x132] sm:$0xff]  ;;  %v9292_v57 = vld [vmem:[%s15391_s3 + $0x48] sm:$0x3] }
 0x1f0   :  { %1790 = vst.msk [vmem:[#allocation2 + $0x168] sm:$0xf] %vm1736_vm4, %v1733_v15  ;;  %10971 = vmatprep.mubr.msk.f32.mxu0 %vm1403_vm2, %v13030_v18  ;;  %v13150_v1 = vld [vmem:[#allocation2 + $0x142] sm:$0xff]  ;;  %v13178_v60 = vld [vmem:[#allocation2 + $0x34] sm:$0xff] }
 0x1f1   :  { %1794 = vst.msk [vmem:[#allocation2 + $0x16c] sm:$0xf0] %vm1741_vm5, %v1733_v15  ;;  %15486 = vst [vmem:[#allocation18_spill] sm:$0xff] %v13150_v1  ;;  %v13169_v12 = vld [vmem:[#allocation2 + $0x24] sm:$0xff]  ;;  %v13194_v28 = vld [vmem:[#allocation2 + $0x54] sm:$0xff] }
 0x1f2   :  { %10699 = vmatmul.mubr.msk.f32.vlgmr.msra.gmra.mxu1 %vm1403_vm2, %v13036_v7  ;;  %v13182_v23 = vld [vmem:[#allocation2 + $0x44] sm:$0xff]  ;;  %v13208_v52 = vld [vmem:[#allocation2 + $0x74] sm:$0xff] }
 0x1f3   :  { %10723 = vmatpush3.msk.msra.mxu1 %vm1881_vm3, %v12776_v5  ;;  %10701 = vmatprep.mubr.msk.f32.mxu1 %vm1403_vm2, %v12726_v26  ;;  %v13047_v2 = vld [vmem:[#allocation2 + $0x150] sm:$0xff]  ;;  %v13067_v5 = vld [vmem:[#allocation2 + $0x42] sm:$0xff] }
 0x1f4   :  { %10724 = vmatprep.subr.mxu1 %v9253_v48  ;;  %10972 = vmatmul.mubr.msk.f32.gmra.mxu0 %vm1403_vm2, %v13047_v2  ;;  %v13063_v26 = vld [vmem:[#allocation2 + $0x32] sm:$0xff]  ;;  %v9519_v33 = vld [vmem:[%s15391_s3 + $0x100] sm:$0xff]  ;;  %v9558_v43 = vld [vmem:[%s15391_s3 + $0x128] sm:$0x3] }
 0x1f5   :  { %10725 = vmatpush3.msra.mxu1 %v9253_v48  ;;  %11006 = vmatprep.mubr.msk.f32.mxu0 %vm1403_vm2, %v13054_v40  ;;  %15482 = vst [vmem:[#allocation16_spill] sm:$0xff] %v13063_v26  ;;  %v13162_v29 = vld [vmem:[#allocation2 + $0x152] sm:$0xff]  ;;  %v13198_v4 = vld [vmem:[#allocation2 + $0x64] sm:$0xff] }
 0x1f6   :  { %10702 = vmatmul.mubr.msk.f32.gmra.mxu1 %vm1403_vm2, %v12745_v14  ;;  %10750 = vmatprep.subr.msk.mxu1 %vm1881_vm3, %v9273_v31  ;;  %v13080_v14 = vld [vmem:[#allocation2 + $0x52] sm:$0xff]  ;;  %15487 = vst [vmem:[#allocation8_spill] sm:$0xff] %v13162_v29  ;;  %v2234_v38 = vld [vmem:[#allocation2 + $0xc2] sm:$0xff] }
 0x1f7   :  { %10704 = vmatprep.mubr.msk.f32.mxu1 %vm1403_vm2, %v12784_v9  ;;  %v13213_v45 = vld [vmem:[#allocation2 + $0xd2] sm:$0xff]  ;;  %v13215_v15 = vld [vmem:[#allocation2 + $0x84] sm:$0xff] }
 0x1f8   :  { %11007 = vmatmul.mubr.msk.f32.vlgmr.msra.gmra.mxu0 %vm1403_vm2, %v13063_v26  ;;  %15488 = vst [vmem:[#allocation19_spill] sm:$0xff] %v13213_v45  ;;  %15489 = vst [vmem:[#allocation9_spill] sm:$0xff] %v13215_v15  ;;  %v13223_v48 = vld [vmem:[#allocation2 + $0x94] sm:$0xff] }
 0x1f9   :  { %11009 = vmatprep.mubr.msk.f32.mxu0 %vm1403_vm2, %v13067_v5  ;;  %11059 = vmatpush3.msk.msra.mxu0 %vm1881_vm3, %v12789_v0  ;;  %v13094_v0 = vld [vmem:[#allocation2 + $0x72] sm:$0xff]  ;;  %15490 = vst [vmem:[#allocation20_spill] sm:$0xff] %v13223_v48 }
 0x1fa   :  { %10705 = vmatmul.mubr.msk.f32.gmra.mxu1 %vm1403_vm2, %v12816_v49  ;;  %11060 = vmatprep.subr.mxu0 %v9481_v37 }
 0x1fb   :  { %10707 = vmatprep.mubr.msk.f32.mxu1 %vm1403_vm2, %v12825_v54  ;;  %11061 = vmatpush3.msra.mxu0 %v9481_v37  ;;  %v13235_v37 = vld [vmem:[#allocation2 + $0xf4] sm:$0xff] }
 0x1fc   :  { %11010 = vmatmul.mubr.msk.f32.gmra.mxu0 %vm1403_vm2, %v13080_v14  ;;  %11114 = vmatprep.subr.msk.mxu0 %vm1881_vm3, %v9520_v44 }
 0x1fd   :  { %11012 = vmatprep.mubr.msk.f32.mxu0 %vm1403_vm2, %v13084_v47 }
 0x1fe   :  { %10708 = vmatmul.mubr.msk.f32.gmra.mxu1 %vm1403_vm2, %v12841_v35 }
 0x1ff   :  { %10710 = vmatprep.mubr.msk.f32.mxu1 %vm1403_vm2, %v1804_v41  ;;  %v13247_v41 = vld [vmem:[#allocation2 + $0x114] sm:$0xff] }
 0x200   :  { %11013 = vmatmul.mubr.msk.f32.gmra.mxu0 %vm1403_vm2, %v13094_v0 }
 0x201   :  { %11015 = vmatprep.mubr.msk.f32.mxu0 %vm1403_vm2, %v13101_v32 }
 0x202   :  { %10711 = vmatmul.mubr.msk.f32.gmra.mxu1 %vm1403_vm2, %v13099_v55 }
 0x203   :  { %10713 = vmatprep.mubr.msk.f32.mxu1 %vm1403_vm2, %v12923_v53 }
 0x204   :  { %11016 = vmatmul.mubr.msk.f32.gmra.mxu0 %vm1403_vm2, %v13109_v51 }
 0x205   :  { %11018 = vmatprep.mubr.msk.f32.mxu0 %vm1403_vm2, %v13113_v34 }
 0x206   :  { %10714 = vmatmul.mubr.msk.f32.gmra.mxu1 %vm1403_vm2, %v12952_v50 }
 0x207   :  { %10716 = vmatprep.mubr.msk.f32.mxu1 %vm1403_vm2, %v12977_v42 }
 0x208   :  { %11019 = vmatmul.mubr.msk.f32.gmra.mxu0 %vm1403_vm2, %v13121_v39 }
 0x209   :  { %11021 = vmatprep.mubr.msk.f32.mxu0 %vm1403_vm2, %v13125_v62 }
 0x20a   :  { %10717 = vmatmul.mubr.msk.f32.gmra.mxu1 %vm1403_vm2, %v12998_v10 }
 0x20b   :  { %10719 = vmatprep.mubr.msk.f32.mxu1 %vm1403_vm2, %v13007_v17 }
 0x20c   :  { %11022 = vmatmul.mubr.msk.f32.gmra.mxu0 %vm1403_vm2, %v13133_v24 }
 0x20d   :  { %11024 = vmatprep.mubr.msk.f32.mxu0 %vm1403_vm2, %v13137_v19 }
 0x20e   :  { %10720 = vmatmul.mubr.msk.f32.gmra.mxu1 %vm1403_vm2, %v13016_v27 }
 0x20f   :  { %10726 = vmatprep.mubr.msk.f32.mxu1 %vm1403_vm2, %v2226_v25  ;;  %v13251_v25 = vld [vmem:[#allocation2 + $0x124] sm:$0xff] }
 0x210   :  { %11025 = vmatmul.mubr.msk.f32.gmra.mxu0 %vm1403_vm2, %v13144_v11 }
 0x211   :  { %11027 = vmatprep.mubr.msk.f32.mxu0 %vm1403_vm2, %v13150_v1  ;;  %v9330_v1 = vld [vmem:[%s15391_s3 + $0x68] sm:$0x3] }
 0x212   :  { %10727 = vmatmul.mubr.msk.f32.vlgmr.msra.gmra.mxu1 %vm1403_vm2, %v13148_v30  ;;  %v9310_v30 = vld [vmem:[%s15391_s3 + $0x50] sm:$0xff] }
 0x213   :  { %10751 = vmatpush3.msk.msra.mxu1 %vm1881_vm3, %v9273_v31  ;;  %10729 = vmatprep.mubr.msk.f32.mxu1 %vm1403_vm2, %v13054_v40  ;;  %v13227_v31 = vld [vmem:[#allocation2 + $0xe4] sm:$0xff]  ;;  %v13374_v40 = vld [vmem:[#allocation2 + $0x14] sm:$0xff] }
 0x214   :  { %10752 = vmatprep.subr.mxu1 %v9272_v59  ;;  %11028 = vmatmul.mubr.msk.f32.gmra.mxu0 %vm1403_vm2, %v13162_v29  ;;  %v5474_v29 = vld [vmem:[#allocation2 + $0x151] sm:$0xff] }
 0x215   :  { %10753 = vmatpush3.msra.mxu1 %v9272_v59  ;;  %11062 = vmatprep.mubr.msk.f32.mxu0 %vm1403_vm2, %v13169_v12  ;;  %v2457_v59 = vld [vmem:[#allocation2 + $0x3] sm:$0xff] }
 0x216   :  { %10730 = vmatmul.mubr.msk.f32.gmra.mxu1 %vm1403_vm2, %v13063_v26  ;;  %10778 = vmatprep.subr.msk.mxu1 %vm1881_vm3, %v9292_v57  ;;  %v13370_v26 = vld [vmem:[#allocation2 + $0x141] sm:$0xff] }
 0x217   :  { %10732 = vmatprep.mubr.msk.f32.mxu1 %vm1403_vm2, %v13067_v5 }
 0x218   :  { %11063 = vmatmul.mubr.msk.f32.vlgmr.msra.gmra.mxu0 %vm1403_vm2, %v13178_v60 }
 0x219   :  { %11065 = vmatprep.mubr.msk.f32.mxu0 %vm1403_vm2, %v13182_v23  ;;  %11115 = vmatpush3.msk.msra.mxu0 %vm1881_vm3, %v9520_v44  ;;  %v13239_v44 = vld [vmem:[#allocation2 + $0x104] sm:$0xff] }
 0x21a   :  { %10733 = vmatmul.mubr.msk.f32.gmra.mxu1 %vm1403_vm2, %v13080_v14  ;;  %11116 = vmatprep.subr.mxu0 %v9519_v33 }
 0x21b   :  { %10735 = vmatprep.mubr.msk.f32.mxu1 %vm1403_vm2, %v13084_v47  ;;  %11117 = vmatpush3.msra.mxu0 %v9519_v33  ;;  %v13258_v33 = vld [vmem:[#allocation2 + $0x134] sm:$0xff] }
 0x21c   :  { %11066 = vmatmul.mubr.msk.f32.gmra.mxu0 %vm1403_vm2, %v13194_v28  ;;  %11170 = vmatprep.subr.msk.mxu0 %vm1881_vm3, %v9558_v43 }
 0x21d   :  { %11068 = vmatprep.mubr.msk.f32.mxu0 %vm1403_vm2, %v13198_v4 }
 0x21e   :  { %10736 = vmatmul.mubr.msk.f32.gmra.mxu1 %vm1403_vm2, %v13094_v0 }
 0x21f   :  { %10738 = vmatprep.mubr.msk.f32.mxu1 %vm1403_vm2, %v2234_v38  ;;  %v13262_v38 = vld [vmem:[#allocation2 + $0x13] sm:$0xff] }
 0x220   :  { %11069 = vmatmul.mubr.msk.f32.gmra.mxu0 %vm1403_vm2, %v13208_v52  ;;  %15491 = vst [vmem:[#allocation10_spill] sm:$0xff] %v13262_v38 }
 0x221   :  { %11071 = vmatprep.mubr.msk.f32.mxu0 %vm1403_vm2, %v13215_v15  ;;  %v13345_v15 = vld [vmem:[#allocation2 + $0x103] sm:$0xff] }
 0x222   :  { %10739 = vmatmul.mubr.msk.f32.gmra.mxu1 %vm1403_vm2, %v13213_v45  ;;  %v9311_v45 = vld [vmem:[%s15391_s3 + $0x58] sm:$0x3] }
 0x223   :  { %10741 = vmatprep.mubr.msk.f32.mxu1 %vm1403_vm2, %v13113_v34  ;;  %v9291_v34 = vld [vmem:[%s15391_s3 + $0x40] sm:$0xff] }
 0x224   :  { %11072 = vmatmul.mubr.msk.f32.gmra.mxu0 %vm1403_vm2, %v13223_v48  ;;  %v13278_v48 = vld [vmem:[#allocation2 + $0x154] sm:$0xff] }
 0x225   :  { %11074 = vmatprep.mubr.msk.f32.mxu0 %vm1403_vm2, %v13227_v31  ;;  %15494 = vst [vmem:[#allocation22_spill] sm:$0xff] %v13278_v48 }
 0x226   :  { %10742 = vmatmul.mubr.msk.f32.gmra.mxu1 %vm1403_vm2, %v13121_v39  ;;  %v13264_v39 = vld [vmem:[#allocation2 + $0x144] sm:$0xff] }
 0x227   :  { %10744 = vmatprep.mubr.msk.f32.mxu1 %vm1403_vm2, %v13125_v62  ;;  %15492 = vst [vmem:[#allocation21_spill] sm:$0xff] %v13264_v39 }
 0x228   :  { %11075 = vmatmul.mubr.msk.f32.gmra.mxu0 %vm1403_vm2, %v13235_v37 }
 0x229   :  { %11077 = vmatprep.mubr.msk.f32.mxu0 %vm1403_vm2, %v13239_v44 }
 0x22a   :  { %10745 = vmatmul.mubr.msk.f32.gmra.mxu1 %vm1403_vm2, %v13133_v24 }
 0x22b   :  { %10747 = vmatprep.mubr.msk.f32.mxu1 %vm1403_vm2, %v13137_v19 }
 0x22c   :  { %11078 = vmatmul.mubr.msk.f32.gmra.mxu0 %vm1403_vm2, %v13247_v41 }
 0x22d   :  { %11080 = vmatprep.mubr.msk.f32.mxu0 %vm1403_vm2, %v13251_v25 }
 0x22e   :  { %10748 = vmatmul.mubr.msk.f32.gmra.mxu1 %vm1403_vm2, %v13144_v11 }
 0x22f   :  { %10754 = vmatprep.mubr.msk.f32.mxu1 %vm1403_vm2, %v2457_v59  ;;  %v13273_v59 = vld [vmem:[#allocation2 + $0x23] sm:$0xff] }
 0x230   :  { %11081 = vmatmul.mubr.msk.f32.gmra.mxu0 %vm1403_vm2, %v13258_v33  ;;  %15493 = vst [vmem:[#allocation11_spill] sm:$0xff] %v13273_v59 }
 0x231   :  { %11083 = vmatprep.mubr.msk.f32.mxu0 %vm1403_vm2, %v13264_v39  ;;  %v5466_v39 = vld [vmem:[#allocation2 + $0x91] sm:$0xff] }
 0x232   :  { %10755 = vmatmul.mubr.msk.f32.vlgmr.msra.gmra.mxu1 %vm1403_vm2, %v13262_v38  ;;  %v13285_v38 = vld [vmem:[#allocation2 + $0x33] sm:$0xff] }
 0x233   :  { %10779 = vmatpush3.msk.msra.mxu1 %vm1881_vm3, %v9292_v57  ;;  %10757 = vmatprep.mubr.msk.f32.mxu1 %vm1403_vm2, %v13273_v59  ;;  %v13291_v57 = vld [vmem:[#allocation2 + $0x43] sm:$0xff]  ;;  %v13298_v59 = vld [vmem:[#allocation2 + $0x53] sm:$0xff] }
 0x234   :  { %10780 = vmatprep.subr.mxu1 %v9291_v34  ;;  %11084 = vmatmul.mubr.msk.f32.gmra.mxu0 %vm1403_vm2, %v13278_v48  ;;  %v9596_v48 = vld [vmem:[%s15391_s3 + $0x148] sm:$0x3] }
 0x235   :  { %10781 = vmatpush3.msra.mxu1 %v9291_v34  ;;  %11118 = vmatprep.mubr.msk.f32.mxu0 %vm1403_vm2, %v12747_v8  ;;  %v9557_v34 = vld [vmem:[%s15391_s3 + $0x120] sm:$0xff] }
 0x236   :  { %10758 = vmatmul.mubr.msk.f32.gmra.mxu1 %vm1403_vm2, %v13285_v38  ;;  %10806 = vmatprep.subr.msk.mxu1 %vm1881_vm3, %v9311_v45  ;;  %v13307_v8 = vld [vmem:[#allocation2 + $0x63] sm:$0xff] }
 0x237   :  { %10760 = vmatprep.mubr.msk.f32.mxu1 %vm1403_vm2, %v13291_v57 }
 0x238   :  { %11119 = vmatmul.mubr.msk.f32.vlgmr.msra.gmra.mxu0 %vm1403_vm2, %v12782_v61  ;;  %v13314_v61 = vld [vmem:[#allocation2 + $0x73] sm:$0xff] }
 0x239   :  { %11121 = vmatprep.mubr.msk.f32.mxu0 %vm1403_vm2, %v12814_v56  ;;  %11171 = vmatpush3.msk.msra.mxu0 %vm1881_vm3, %v9558_v43  ;;  %v2465_v56 = vld [vmem:[#allocation2 + $0xc3] sm:$0xff] }
 0x23a   :  { %10761 = vmatmul.mubr.msk.f32.gmra.mxu1 %vm1403_vm2, %v13298_v59  ;;  %11172 = vmatprep.subr.mxu0 %v9557_v34  ;;  %v13324_v43 = vld [vmem:[#allocation2 + $0x81] sm:$0xff] }
 0x23b   :  { %10763 = vmatprep.mubr.msk.f32.mxu1 %vm1403_vm2, %v13307_v8  ;;  %11173 = vmatpush3.msra.mxu0 %v9557_v34  ;;  %v5467_v34 = vld [vmem:[#allocation2 + $0xa1] sm:$0xff] }
 0x23c   :  { %11122 = vmatmul.mubr.msk.f32.gmra.mxu0 %vm1403_vm2, %v12839_v13  ;;  %11226 = vmatprep.subr.msk.mxu0 %vm1881_vm3, %v9596_v48  ;;  %v13329_v13 = vld [vmem:[#allocation2 + $0xd3] sm:$0xff] }
 0x23d   :  { %11124 = vmatprep.mubr.msk.f32.mxu0 %vm1403_vm2, %v12843_v21  ;;  %15495 = vst [vmem:[#allocation12_spill] sm:$0xff] %v13329_v13  ;;  %v13334_v21 = vld [vmem:[#allocation2 + $0xe3] sm:$0xff] }
 0x23e   :  { %10764 = vmatmul.mubr.msk.f32.gmra.mxu1 %vm1403_vm2, %v13314_v61  ;;  %15496 = vst [vmem:[#allocation23_spill] sm:$0xff] %v13334_v21 }
 0x23f   :  { %10766 = vmatprep.mubr.msk.f32.mxu1 %vm1403_vm2, %v2465_v56  ;;  %v13339_v56 = vld [vmem:[#allocation2 + $0xf3] sm:$0xff] }
 0x240   :  { %11125 = vmatmul.mubr.msk.f32.gmra.mxu0 %vm1403_vm2, %v13324_v43 }
 0x241   :  { %11127 = vmatprep.mubr.msk.f32.mxu0 %vm1403_vm2, %v5466_v39  ;;  %v13351_v39 = vld [vmem:[#allocation2 + $0x113] sm:$0xff] }
 0x242   :  { %10767 = vmatmul.mubr.msk.f32.gmra.mxu1 %vm1403_vm2, %v13329_v13  ;;  %v2688_v13 = vld [vmem:[#allocation2 + $0x4] sm:$0xff] }
 0x243   :  { %10769 = vmatprep.mubr.msk.f32.mxu1 %vm1403_vm2, %v13334_v21  ;;  %v13363_v21 = vld [vmem:[#allocation2 + $0x133] sm:$0xff] }
 0x244   :  { %11128 = vmatmul.mubr.msk.f32.gmra.mxu0 %vm1403_vm2, %v5467_v34  ;;  %v13357_v34 = vld [vmem:[#allocation2 + $0x123] sm:$0xff] }
 0x245   :  { %11130 = vmatprep.mubr.msk.f32.mxu0 %vm1403_vm2, %v12954_v22 }
 0x246   :  { %10770 = vmatmul.mubr.msk.f32.gmra.mxu1 %vm1403_vm2, %v13339_v56 }
 0x247   :  { %10772 = vmatprep.mubr.msk.f32.mxu1 %vm1403_vm2, %v13345_v15 }
 0x248   :  { %11131 = vmatmul.mubr.msk.f32.gmra.mxu0 %vm1403_vm2, %v12975_v3 }
 0x249   :  { %11133 = vmatprep.mubr.msk.f32.mxu0 %vm1403_vm2, %v12996_v6 }
 0x24a   :  { %10773 = vmatmul.mubr.msk.f32.gmra.mxu1 %vm1403_vm2, %v13351_v39 }
 0x24b   :  { %10775 = vmatprep.mubr.msk.f32.mxu1 %vm1403_vm2, %v13357_v34 }
 0x24c   :  { %11134 = vmatmul.mubr.msk.f32.gmra.mxu0 %vm1403_vm2, %v13014_v16 }
 0x24d   :  { %11136 = vmatprep.mubr.msk.f32.mxu0 %vm1403_vm2, %v13018_v46 }
 0x24e   :  { %10776 = vmatmul.mubr.msk.f32.gmra.mxu1 %vm1403_vm2, %v13363_v21 }
 0x24f   :  { %10782 = vmatprep.mubr.msk.f32.mxu1 %vm1403_vm2, %v2688_v13  ;;  %v5475_v13 = vld [vmem:[#allocation2 + $0x161] sm:$0xff] }
 0x250   :  { %11137 = vmatmul.mubr.msk.f32.gmra.mxu0 %vm1403_vm2, %v13370_v26 }
 0x251   :  { %11139 = vmatprep.mubr.msk.f32.mxu0 %vm1403_vm2, %v5474_v29  ;;  %v9595_v29 = vld [vmem:[%s15391_s3 + $0x140] sm:$0xff] }
 0x252   :  { %10783 = vmatmul.mubr.msk.f32.vlgmr.msra.gmra.mxu1 %vm1403_vm2, %v13374_v40 }
 0x253   :  { %10807 = vmatpush3.msk.msra.mxu1 %vm1881_vm3, %v9311_v45  ;;  %10785 = vmatprep.mubr.msk.f32.mxu1 %vm1403_vm2, %v13169_v12  ;;  %v2696_v12 = vld [vmem:[#allocation2 + $0xc4] sm:$0xff]  ;;  %v13423_v45 = vld [vmem:[#allocation2 + $0xd4] sm:$0xff] }
 0x254   :  { %10808 = vmatprep.subr.mxu1 %v9310_v30  ;;  %11140 = vmatmul.mubr.msk.f32.gmra.mxu0 %vm1403_vm2, %v5475_v13  ;;  %v5929_v13 = vld [vmem:[#allocation2 + $0xa3] sm:$0xff] }
 0x255   :  { %10809 = vmatpush3.msra.mxu1 %v9310_v30  ;;  %11174 = vmatprep.mubr.msk.f32.mxu0 %vm1403_vm2, %v13285_v38  ;;  %v9634_v30 = vld [vmem:[%s15391_s3 + $0x168] sm:$0x3] }
 0x256   :  { %10786 = vmatmul.mubr.msk.f32.gmra.mxu1 %vm1403_vm2, %v13178_v60  ;;  %10834 = vmatprep.subr.msk.mxu1 %vm1881_vm3, %v9330_v1  ;;  %v13418_v60 = vld [vmem:[#allocation2 + $0x83] sm:$0xff] }
 0x257   :  { %10788 = vmatprep.mubr.msk.f32.mxu1 %vm1403_vm2, %v13182_v23 }
 0x258   :  { %11175 = vmatmul.mubr.msk.f32.vlgmr.msra.gmra.mxu0 %vm1403_vm2, %v13291_v57 }
 0x259   :  { %11177 = vmatprep.mubr.msk.f32.mxu0 %vm1403_vm2, %v13298_v59  ;;  %11227 = vmatpush3.msk.msra.mxu0 %vm1881_vm3, %v9596_v48  ;;  %v5928_v48 = vld [vmem:[#allocation2 + $0x93] sm:$0xff] }
 0x25a   :  { %10789 = vmatmul.mubr.msk.f32.gmra.mxu1 %vm1403_vm2, %v13194_v28  ;;  %11228 = vmatprep.subr.mxu0 %v9595_v29 }
 0x25b   :  { %10791 = vmatprep.mubr.msk.f32.mxu1 %vm1403_vm2, %v13198_v4  ;;  %11229 = vmatpush3.msra.mxu0 %v9595_v29  ;;  %v5936_v29 = vld [vmem:[#allocation2 + $0x153] sm:$0xff] }
 0x25c   :  { %11178 = vmatmul.mubr.msk.f32.gmra.mxu0 %vm1403_vm2, %v13307_v8  ;;  %11282 = vmatprep.subr.msk.mxu0 %vm1881_vm3, %v9634_v30 }
 0x25d   :  { %11180 = vmatprep.mubr.msk.f32.mxu0 %vm1403_vm2, %v13314_v61 }
 0x25e   :  { %10792 = vmatmul.mubr.msk.f32.gmra.mxu1 %vm1403_vm2, %v13208_v52 }
 0x25f   :  { %10794 = vmatprep.mubr.msk.f32.mxu1 %vm1403_vm2, %v2696_v12  ;;  %v9329_v12 = vld [vmem:[%s15391_s3 + $0x60] sm:$0xff] }
 0x260   :  { %11181 = vmatmul.mubr.msk.f32.gmra.mxu0 %vm1403_vm2, %v13418_v60 }
 0x261   :  { %11183 = vmatprep.mubr.msk.f32.mxu0 %vm1403_vm2, %v5928_v48  ;;  %v11538_v48 = vld [vmem:[#allocation2 + $0x30] sm:$0xff] }
 0x262   :  { %10795 = vmatmul.mubr.msk.f32.gmra.mxu1 %vm1403_vm2, %v13423_v45 }
 0x263   :  { %10797 = vmatprep.mubr.msk.f32.mxu1 %vm1403_vm2, %v13227_v31  ;;  %v13453_v31 = vld [vmem:[#allocation2 + $0x143] sm:$0xff] }
 0x264   :  { %11184 = vmatmul.mubr.msk.f32.gmra.mxu0 %vm1403_vm2, %v5929_v13  ;;  %v9349_v13 = vld [vmem:[%s15391_s3 + $0x78] sm:$0x3] }
 0x265   :  { %11186 = vmatprep.mubr.msk.f32.mxu0 %vm1403_vm2, %v13339_v56 }
 0x266   :  { %10798 = vmatmul.mubr.msk.f32.gmra.mxu1 %vm1403_vm2, %v13235_v37  ;;  %v2920_v37 = vld [vmem:[#allocation2 + $0x20] sm:$0xff] }
 0x267   :  { %10800 = vmatprep.mubr.msk.f32.mxu1 %vm1403_vm2, %v13239_v44 }
 0x268   :  { %11187 = vmatmul.mubr.msk.f32.gmra.mxu0 %vm1403_vm2, %v13345_v15 }
 0x269   :  { %11189 = vmatprep.mubr.msk.f32.mxu0 %vm1403_vm2, %v13351_v39 }
 0x26a   :  { %10801 = vmatmul.mubr.msk.f32.gmra.mxu1 %vm1403_vm2, %v13247_v41 }
 0x26b   :  { %10803 = vmatprep.mubr.msk.f32.mxu1 %vm1403_vm2, %v13251_v25 }
 0x26c   :  { %11190 = vmatmul.mubr.msk.f32.gmra.mxu0 %vm1403_vm2, %v13357_v34 }
 0x26d   :  { %11192 = vmatprep.mubr.msk.f32.mxu0 %vm1403_vm2, %v13363_v21 }
 0x26e   :  { %10804 = vmatmul.mubr.msk.f32.gmra.mxu1 %vm1403_vm2, %v13258_v33 }
 0x26f   :  { %10810 = vmatprep.mubr.msk.f32.mxu1 %vm1403_vm2, %v13036_v7  ;;  %v5937_v7 = vld [vmem:[#allocation2 + $0x163] sm:$0xff] }
 0x270   :  { %11193 = vmatmul.mubr.msk.f32.gmra.mxu0 %vm1403_vm2, %v13453_v31 }
 0x271   :  { %11195 = vmatprep.mubr.msk.f32.mxu0 %vm1403_vm2, %v5936_v29  ;;  %v13573_v29 = vld [vmem:[#allocation2 + $0x61] sm:$0xff] }
 0x272   :  { %10811 = vmatmul.mubr.msk.f32.vlgmr.msra.gmra.mxu1 %vm1403_vm2, %v2920_v37 }
 0x273   :  { %10835 = vmatpush3.msk.msra.mxu1 %vm1881_vm3, %v9330_v1  ;;  %10813 = vmatprep.mubr.msk.f32.mxu1 %vm1403_vm2, %v11538_v48  ;;  %v9633_v1 = vld [vmem:[%s15391_s3 + $0x160] sm:$0xff]  ;;  %v13582_v48 = vld [vmem:[#allocation2 + $0x71] sm:$0xff] }
 0x274   :  { %10836 = vmatprep.subr.mxu1 %v9329_v12  ;;  %11196 = vmatmul.mubr.msk.f32.gmra.mxu0 %vm1403_vm2, %v5937_v7 }
 0x275   :  { %10837 = vmatpush3.msra.mxu1 %v9329_v12  ;;  %11230 = vmatprep.mubr.msk.f32.mxu0 %vm1403_vm2, %v12784_v9  ;;  %v9671_v12 = vld [vmem:[%s15391_s3 + $0x180] sm:$0xff] }
 0x276   :  { %10814 = vmatmul.mubr.msk.f32.gmra.mxu1 %vm1403_vm2, %v12784_v9  ;;  %10862 = vmatprep.subr.msk.mxu1 %vm1881_vm3, %v9349_v13  ;;  %v9672_v9 = vld [vmem:[%s15391_s3 + $0x188] sm:$0x3] }
 0x277   :  { %10816 = vmatprep.mubr.msk.f32.mxu1 %vm1403_vm2, %v12816_v49 }
 0x278   :  { %11231 = vmatmul.mubr.msk.f32.vlgmr.msra.gmra.mxu0 %vm1403_vm2, %v12816_v49  ;;  %v6390_v49 = vld [vmem:[#allocation2 + $0xa0] sm:$0xff]  ;;  %v10672_v7 = vpop.f32.mrf.mxu0 }
 0x279   :  { %11233 = vmatprep.mubr.msk.f32.mxu0 %vm1403_vm2, %v12825_v54  ;;  %11283 = vmatpush3.msk.msra.mxu0 %vm1881_vm3, %v9634_v30  ;;  %v13563_v30 = vld [vmem:[#allocation2 + $0x51] sm:$0xff] }
 0x27a   :  { %10817 = vmatmul.mubr.msk.f32.gmra.mxu1 %vm1403_vm2, %v12825_v54  ;;  %11284 = vmatprep.subr.mxu0 %v9633_v1  ;;  %v6391_v54 = vld [vmem:[#allocation2 + $0xb0] sm:$0xff] }
 0x27b   :  { %10819 = vmatprep.mubr.msk.f32.mxu1 %vm1403_vm2, %v12841_v35  ;;  %11285 = vmatpush3.msra.mxu0 %v9633_v1 }
 0x27c   :  { %11234 = vmatmul.mubr.msk.f32.gmra.mxu0 %vm1403_vm2, %v12841_v35  ;;  %11338 = vmatprep.subr.msk.mxu0 %vm1881_vm3, %v9672_v9 }
 0x27d   :  { %11236 = vmatprep.mubr.msk.f32.mxu0 %vm1403_vm2, %v12864_v58 }
 0x27e   :  { %10820 = vmatmul.mubr.msk.f32.gmra.mxu1 %vm1403_vm2, %v12864_v58  ;;  %v13513_v35 = vpop.f32.mrf.mxu1 }
 0x27f   :  { %10822 = vmatprep.mubr.msk.f32.mxu1 %vm1403_vm2, %v13099_v55  ;;  %v13557_v55 = vld [vmem:[#allocation2 + $0x41] sm:$0xff] }
 0x280   :  { %11237 = vmatmul.mubr.msk.f32.gmra.mxu0 %vm1403_vm2, %v12883_v20  ;;  %v13523_v58 = vpop.f32.mrf.mxu1  ;;  %v3150_v20 = vld [vmem:[#allocation2 + $0x11] sm:$0xff] }
 0x281   :  { %11239 = vmatprep.mubr.msk.f32.mxu0 %vm1403_vm2, %v6390_v49  ;;  %v1951_v49 = vpop.f32.mrf.mxu0 }
 0x282   :  { %10823 = vmatmul.mubr.msk.f32.gmra.mxu1 %vm1403_vm2, %v12923_v53 }
 0x283   :  { %10825 = vmatprep.mubr.msk.f32.mxu1 %vm1403_vm2, %v12952_v50  ;;  %v13536_v50 = vld [vmem:[#allocation2 + $0x21] sm:$0xff] }
 0x284   :  { %11240 = vmatmul.mubr.msk.f32.gmra.mxu0 %vm1403_vm2, %v6391_v54  ;;  %v13531_v53 = vpop.f32.mrf.mxu1 }
 0x285   :  { %11242 = vmatprep.mubr.msk.f32.mxu0 %vm1403_vm2, %v12977_v42 }
 0x286   :  { %10826 = vmatmul.mubr.msk.f32.gmra.mxu1 %vm1403_vm2, %v12977_v42  ;;  %v6398_v42 = vld [vmem:[#allocation2 + $0x160] sm:$0xff] }
 0x287   :  { %10828 = vmatprep.mubr.msk.f32.mxu1 %vm1403_vm2, %v12998_v10 }
 0x288   :  { %11243 = vmatmul.mubr.msk.f32.gmra.mxu0 %vm1403_vm2, %v12998_v10  ;;  %v9348_v10 = vld [vmem:[%s15391_s3 + $0x70] sm:$0xff] }
 0x289   :  { %11245 = vmatprep.mubr.msk.f32.mxu0 %vm1403_vm2, %v13007_v17 }
 0x28a   :  { %10829 = vmatmul.mubr.msk.f32.gmra.mxu1 %vm1403_vm2, %v13007_v17  ;;  %v13544_v17 = vld [vmem:[#allocation2 + $0x31] sm:$0xff] }
 0x28b   :  { %10831 = vmatprep.mubr.msk.f32.mxu1 %vm1403_vm2, %v13016_v27 }
 0x28c   :  { %11246 = vmatmul.mubr.msk.f32.gmra.mxu0 %vm1403_vm2, %v13016_v27  ;;  %v13546_v27 = vpop.f32.mrf.mxu1 }
 0x28d   :  { %11248 = vmatprep.mubr.msk.f32.mxu0 %vm1403_vm2, %v13030_v18 }
 0x28e   :  { %10832 = vmatmul.mubr.msk.f32.gmra.mxu1 %vm1403_vm2, %v13030_v18  ;;  %v6399_v18 = vld [vmem:[#allocation2 + $0x170] sm:$0xff]  ;;  %v13565_v37 = vpop.f32.mrf.mxu1 }
 0x28f   :  { %10838 = vmatprep.mubr.msk.f32.mxu1 %vm1403_vm2, %v3150_v20 }
 0x290   :  { %11249 = vmatmul.mubr.msk.f32.gmra.mxu0 %vm1403_vm2, %v13047_v2  ;;  %v13554_v2 = vld [vmem:[%s15391_s3 + $0x88] sm:$0x3] }
 0x291   :  { %11251 = vmatprep.mubr.msk.f32.mxu0 %vm1403_vm2, %v6398_v42  ;;  %v6853_v42 = vld [vmem:[#allocation2 + $0xb2] sm:$0xff] }
 0x292   :  { %10839 = vmatmul.mubr.msk.f32.vlgmr.msra.gmra.mxu1 %vm1403_vm2, %v13536_v50 }
 0x293   :  { %10863 = vmatpush3.msk.msra.mxu1 %vm1881_vm3, %v9349_v13  ;;  %10841 = vmatprep.mubr.msk.f32.mxu1 %vm1403_vm2, %v13544_v17  ;;  %v13584_v13 = vpop.f32.mrf.mxu1 }
 0x294   :  { %10864 = vmatprep.subr.mxu1 %v9348_v10  ;;  %11252 = vmatmul.mubr.msk.f32.gmra.mxu0 %vm1403_vm2, %v6399_v18  ;;  %v15500_v18 = vld [vmem:[#allocation18_spill] sm:$0xff] }
 0x295   :  { %10865 = vmatpush3.msra.mxu1 %v9348_v10  ;;  %11286 = vmatprep.mubr.msk.f32.mxu0 %vm1403_vm2, %v13067_v5 }
 0x296   :  { %10842 = vmatmul.mubr.msk.f32.gmra.mxu1 %vm1403_vm2, %v13557_v55  ;;  %10890 = vmatprep.subr.msk.mxu1 %vm1881_vm3, %v13554_v2 }
 0x297   :  { %10844 = vmatprep.mubr.msk.f32.mxu1 %vm1403_vm2, %v13563_v30 }
 0x298   :  { %11287 = vmatmul.mubr.msk.f32.vlgmr.msra.gmra.mxu0 %vm1403_vm2, %v13080_v14 }
 0x299   :  { %11289 = vmatprep.mubr.msk.f32.mxu0 %vm1403_vm2, %v13084_v47  ;;  %11339 = vmatpush3.msk.msra.mxu0 %vm1881_vm3, %v9672_v9  ;;  %v6852_v9 = vld [vmem:[#allocation2 + $0xa2] sm:$0xff] }
 0x29a   :  { %10845 = vmatmul.mubr.msk.f32.gmra.mxu1 %vm1403_vm2, %v13573_v29  ;;  %11340 = vmatprep.subr.mxu0 %v9671_v12 }
 0x29b   :  { %10847 = vmatprep.mubr.msk.f32.mxu1 %vm1403_vm2, %v13582_v48  ;;  %11341 = vmatpush3.msra.mxu0 %v9671_v12 }
 0x29c   :  { %v13589_v1 = vpop.f32.mrf.mxu1  ;;  %11290 = vmatmul.mubr.msk.f32.gmra.mxu0 %vm1403_vm2, %v13094_v0 }
 0x29d   :  { %11292 = vmatprep.mubr.msk.f32.mxu0 %vm1403_vm2, %v13101_v32 }
 0x29e   :  { %10848 = vmatmul.mubr.msk.f32.gmra.mxu1 %vm1403_vm2, %v13324_v43  ;;  %v13597_v54 = vpop.f32.mrf.mxu1  ;;  %v13606_v43 = vpop.f32.mrf.mxu0 }
 0x29f   :  { %10850 = vmatprep.mubr.msk.f32.mxu1 %vm1403_vm2, %v12933_v36 }
 0x2a0   :  { %11293 = vmatmul.mubr.msk.f32.gmra.mxu0 %vm1403_vm2, %v13109_v51  ;;  %v13617_v36 = vpop.f32.mrf.mxu0 }
 0x2a1   :  { %11295 = vmatprep.mubr.msk.f32.mxu0 %vm1403_vm2, %v6852_v9  ;;  %15497 = vst [vmem:[#allocation13_spill] sm:$0xff] %v13617_v36  ;;  %v6860_v9 = vld [vmem:[#allocation2 + $0x162] sm:$0xff] }
 0x2a2   :  { %10851 = vmatmul.mubr.msk.f32.gmra.mxu1 %vm1403_vm2, %v12950_v63  ;;  %v13608_v20 = vpop.f32.mrf.mxu1  ;;  %v13623_v51 = vpop.f32.mrf.mxu0 }
 0x2a3   :  { %10853 = vmatprep.mubr.msk.f32.mxu1 %vm1403_vm2, %v12954_v22  ;;  %15498 = vst [vmem:[#allocation24_spill] sm:$0xff] %v13623_v51 }
 0x2a4   :  { %11296 = vmatmul.mubr.msk.f32.gmra.mxu0 %vm1403_vm2, %v6853_v42  ;;  %v13619_v63 = vpop.f32.mrf.mxu1  ;;  %v9367_v42 = vld [vmem:[%s15391_s3 + $0x80] sm:$0xff] }
 0x2a5   :  { %11298 = vmatprep.mubr.msk.f32.mxu0 %vm1403_vm2, %v13125_v62 }
 0x2a6   :  { %10854 = vmatmul.mubr.msk.f32.gmra.mxu1 %vm1403_vm2, %v12975_v3  ;;  %v13637_v3 = vpop.f32.mrf.mxu0 }
 0x2a7   :  { %10856 = vmatprep.mubr.msk.f32.mxu1 %vm1403_vm2, %v12996_v6  ;;  %15499 = vst [vmem:[#allocation14_spill] sm:$0xff] %v13637_v3  ;;  %v6861_v3 = vld [vmem:[#allocation2 + $0x172] sm:$0xff] }
 0x2a8   :  { %v13625_v10 = vpop.f32.mrf.mxu1  ;;  %11299 = vmatmul.mubr.msk.f32.gmra.mxu0 %vm1403_vm2, %v13133_v24  ;;  %v13651_v12 = vpop.f32.mrf.mxu0 }
 0x2a9   :  { %11301 = vmatprep.mubr.msk.f32.mxu0 %vm1403_vm2, %v13137_v19  ;;  %15502 = vst [vmem:[#allocation25_spill] sm:$0xff] %v13651_v12  ;;  %v13670_v12 = vld [vmem:[%s15391_s3 + $0x98] sm:$0x3] }
 0x2aa   :  { %10857 = vmatmul.mubr.msk.f32.gmra.mxu1 %vm1403_vm2, %v13014_v16  ;;  %v13633_v22 = vpop.f32.mrf.mxu1  ;;  %v15501_v16 = vld [vmem:[#allocation7_spill] sm:$0xff]  ;;  %v13672_v51 = vpop.f32.mrf.mxu0 }
 0x2ab   :  { %10859 = vmatprep.mubr.msk.f32.mxu1 %vm1403_vm2, %v13018_v46  ;;  %v15503_v46 = vld [vmem:[#allocation8_spill] sm:$0xff]  ;;  %15506 = vst [vmem:[#allocation15_spill] sm:$0xff] %v13672_v51 }
 0x2ac   :  { %11302 = vmatmul.mubr.msk.f32.gmra.mxu0 %vm1403_vm2, %v13144_v11 }
 0x2ad   :  { %11304 = vmatprep.mubr.msk.f32.mxu0 %vm1403_vm2, %v15500_v18 }
 0x2ae   :  { %v13641_v6 = vpop.f32.mrf.mxu1  ;;  %10860 = vmatmul.mubr.msk.f32.gmra.mxu1 %vm1403_vm2, %v13370_v26  ;;  %v15504_v26 = vld [vmem:[#allocation26_spill] sm:$0xff] }
 0x2af   :  { %10866 = vmatprep.mubr.msk.f32.mxu1 %vm1403_vm2, %v15501_v16  ;;  %v15505_v16 = vld [vmem:[#allocation16_spill] sm:$0xff] }
 0x2b0   :  { %v13649_v19 = vpop.f32.mrf.mxu1  ;;  %11305 = vmatmul.mubr.msk.f32.gmra.mxu0 %vm1403_vm2, %v15503_v46 }
 0x2b1   :  { %11307 = vmatprep.mubr.msk.f32.mxu0 %vm1403_vm2, %v6860_v9 }
 0x2b2   :  { %v10700_v36 = vpop.f32.mrf.mxu1  ;;  %10867 = vmatmul.mubr.msk.f32.vlgmr.msra.gmra.mxu1 %vm1403_vm2, %v15504_v26 }
 0x2b3   :  { %v13661_v18 = vadd.f32 %v10700_v36, %v10672_v7  ;;  %10891 = vmatpush3.msk.msra.mxu1 %vm1881_vm3, %v13554_v2  ;;  %10869 = vmatprep.mubr.msk.f32.mxu1 %vm1403_vm2, %v15505_v16  ;;  %v13681_v2 = vpop.f32.mrf.mxu0  ;;  %v7314_v16 = vld [vmem:[#allocation2 + $0xa4] sm:$0xff] }
 0x2b4   :  { %v2147_v46 = vpop.f32.mrf.mxu1  ;;  %10892 = vmatprep.subr.mxu1 %v9367_v42  ;;  %11308 = vmatmul.mubr.msk.f32.gmra.mxu0 %vm1403_vm2, %v6861_v3 }
 0x2b5   :  { %v13674_v26 = vadd.f32 %v2147_v46, %v1951_v49  ;;  %10893 = vmatpush3.msra.mxu1 %v9367_v42  ;;  %11342 = vmatprep.mubr.msk.f32.mxu0 %vm1403_vm2, %v13182_v23  ;;  %v13699_v23 = vpop.f32.mrf.mxu0  ;;  %v15512_v46 = vld [vmem:[#allocation6_spill] sm:$0xff] }
 0x2b6   :  { %v10703_v7 = vpop.f32.mrf.mxu1  ;;  %10870 = vmatmul.mubr.msk.f32.gmra.mxu1 %vm1403_vm2, %v13067_v5  ;;  %10918 = vmatprep.subr.msk.mxu1 %vm1881_vm3, %v13670_v12  ;;  %15507 = vst [vmem:[#allocation27_spill] sm:$0xff] %v13699_v23  ;;  %v14213_v23 = vld [vmem:[#allocation2 + $0x143] sm:$0xff] }
 0x2b7   :  { %v13684_v36 = vadd.f32 %v10703_v7, %v13513_v35  ;;  %10872 = vmatprep.mubr.msk.f32.mxu1 %vm1403_vm2, %v13080_v14 }
 0x2b8   :  { %v2157_v49 = vpop.f32.mrf.mxu1  ;;  %11343 = vmatmul.mubr.msk.f32.vlgmr.msra.gmra.mxu0 %vm1403_vm2, %v13194_v28 }
 0x2b9   :  { %v13691_v3 = vadd.f32 %v2157_v49, %v13523_v58  ;;  %11345 = vmatprep.mubr.msk.f32.mxu0 %vm1403_vm2, %v13198_v4  ;;  %v13706_v58 = vpop.f32.mrf.mxu0  ;;  %v15508_v4 = vld [vmem:[#allocation9_spill] sm:$0xff] }
 0x2ba   :  { %v10706_v5 = vpop.f32.mrf.mxu1  ;;  %10873 = vmatmul.mubr.msk.f32.gmra.mxu1 %vm1403_vm2, %v13084_v47  ;;  %v15513_v49 = vld [vmem:[#allocation17_spill] sm:$0xff] }
 0x2bb   :  { %v13702_v14 = vadd.f32 %v10706_v5, %v13531_v53  ;;  %10875 = vmatprep.mubr.msk.f32.mxu1 %vm1403_vm2, %v13094_v0  ;;  %v15509_v0 = vld [vmem:[#allocation19_spill] sm:$0xff]  ;;  %v13722_v42 = vpop.f32.mrf.mxu0  ;;  %v7315_v5 = vld [vmem:[#allocation2 + $0xb4] sm:$0xff] }
 0x2bc   :  { %v2167_v35 = vpop.f32.mrf.mxu1  ;;  %11346 = vmatmul.mubr.msk.f32.gmra.mxu0 %vm1403_vm2, %v13208_v52  ;;  %15510 = vst [vmem:[#allocation18_spill] sm:$0xff] %v13722_v42  ;;  %v15511_v52 = vld [vmem:[#allocation20_spill] sm:$0xff] }
 0x2bd   :  { %v13709_v28 = vadd.f32 %v2167_v35, %v13546_v27  ;;  %11348 = vmatprep.mubr.msk.f32.mxu0 %vm1403_vm2, %v15508_v4 }
 0x2be   :  { %v10709_v47 = vpop.f32.mrf.mxu1  ;;  %10876 = vmatmul.mubr.msk.f32.gmra.mxu1 %vm1403_vm2, %v13101_v32 }
 0x2bf   :  { %v13718_v53 = vadd.f32 %v10709_v47, %v13565_v37  ;;  %10878 = vmatprep.mubr.msk.f32.mxu1 %vm1403_vm2, %v15509_v0  ;;  %v13732_v37 = vpop.f32.mrf.mxu0 }
 0x2c0   :  { %v2177_v9 = vpop.f32.mrf.mxu1  ;;  %11349 = vmatmul.mubr.msk.f32.gmra.mxu0 %vm1403_vm2, %v15511_v52 }
 0x2c1   :  { %v13725_v27 = vadd.f32 %v2177_v9, %v13584_v13  ;;  %11351 = vmatprep.mubr.msk.f32.mxu0 %vm1403_vm2, %v7314_v16  ;;  %v13747_v4 = vpop.f32.mrf.mxu0  ;;  %v3394_v9 = vld [vmem:[#allocation2 + $0x122] sm:$0xff] }
 0x2c2   :  { %v10712_v32 = vpop.f32.mrf.mxu1  ;;  %10879 = vmatmul.mubr.msk.f32.gmra.mxu1 %vm1403_vm2, %v15512_v46  ;;  %15514 = vst [vmem:[#allocation7_spill] sm:$0xff] %v13747_v4  ;;  %v14155_v4 = vld [vmem:[#allocation2 + $0x83] sm:$0xff] }
 0x2c3   :  { %v13735_v7 = vadd.f32 %v10712_v32, %v13589_v1  ;;  %10881 = vmatprep.mubr.msk.f32.mxu1 %vm1403_vm2, %v15513_v49  ;;  %v15517_v32 = vld [vmem:[#allocation10_spill] sm:$0xff] }
 0x2c4   :  { %v2187_v13 = vpop.f32.mrf.mxu1  ;;  %11352 = vmatmul.mubr.msk.f32.gmra.mxu0 %vm1403_vm2, %v7315_v5  ;;  %v7322_v49 = vld [vmem:[#allocation2 + $0x164] sm:$0xff] }
 0x2c5   :  { %v13740_v35 = vadd.f32 %v2187_v13, %v13597_v54  ;;  %11354 = vmatprep.mubr.msk.f32.mxu0 %vm1403_vm2, %v13239_v44  ;;  %v13762_v44 = vpop.f32.mrf.mxu0  ;;  %v9386_v13 = vld [vmem:[%s15391_s3 + $0x90] sm:$0xff] }
 0x2c6   :  { %v10715_v47 = vpop.f32.mrf.mxu1  ;;  %10882 = vmatmul.mubr.msk.f32.gmra.mxu1 %vm1403_vm2, %v13125_v62 }
 0x2c7   :  { %v13750_v1 = vadd.f32 %v10715_v47, %v13608_v20  ;;  %10884 = vmatprep.mubr.msk.f32.mxu1 %vm1403_vm2, %v13133_v24  ;;  %v13777_v16 = vpop.f32.mrf.mxu0  ;;  %v15520_v47 = vld [vmem:[#allocation11_spill] sm:$0xff] }
 0x2c8   :  { %v2197_v0 = vpop.f32.mrf.mxu1  ;;  %11355 = vmatmul.mubr.msk.f32.gmra.mxu0 %vm1403_vm2, %v13247_v41  ;;  %v3396_v41 = vld [vmem:[#allocation2 + $0x142] sm:$0xff]  ;;  %15516 = vst [vmem:[#allocation8_spill] sm:$0xff] %v13777_v16 }
 0x2c9   :  { %v13755_v54 = vadd.f32 %v2197_v0, %v13619_v63  ;;  %11357 = vmatprep.mubr.msk.f32.mxu0 %vm1403_vm2, %v13251_v25  ;;  %v15515_v25 = vld [vmem:[#allocation21_spill] sm:$0xff] }
 0x2ca   :  { %v10718_v62 = vpop.f32.mrf.mxu1  ;;  %10885 = vmatmul.mubr.msk.f32.gmra.mxu1 %vm1403_vm2, %v3394_v9  ;;  %v7323_v9 = vld [vmem:[#allocation2 + $0x174] sm:$0xff] }
 0x2cb   :  { %v13765_v20 = vadd.f32 %v10718_v62, %v13625_v10  ;;  %10887 = vmatprep.mubr.msk.f32.mxu1 %vm1403_vm2, %v13144_v11 }
 0x2cc   :  { %v2207_v24 = vpop.f32.mrf.mxu1  ;;  %11358 = vmatmul.mubr.msk.f32.gmra.mxu0 %vm1403_vm2, %v13258_v33  ;;  %v15519_v33 = vld [vmem:[#allocation22_spill] sm:$0xff] }
 0x2cd   :  { %v13770_v63 = vadd.f32 %v2207_v24, %v13633_v22  ;;  %11360 = vmatprep.mubr.msk.f32.mxu0 %vm1403_vm2, %v15515_v25  ;;  %v13782_v22 = vpop.f32.mrf.mxu0 }
 0x2ce   :  { %v10721_v52 = vpop.f32.mrf.mxu1  ;;  %10888 = vmatmul.mubr.msk.f32.gmra.mxu1 %vm1403_vm2, %v3396_v41  ;;  %15518 = vst [vmem:[#allocation26_spill] sm:$0xff] %v13782_v22  ;;  %v5231_v22 = vld [vmem:[#allocation2 + $0x50] sm:$0xff] }
 0x2cf   :  { %v2223_v10 = vadd.f32 %v10721_v52, %v13641_v6  ;;  %10894 = vmatprep.mubr.msk.f32.mxu1 %vm1403_vm2, %v15517_v32  ;;  %v13801_v62 = vpop.f32.mrf.mxu0 }
 0x2d0   :  { %v2217_v11 = vpop.f32.mrf.mxu1  ;;  %11361 = vmatmul.mubr.msk.f32.gmra.mxu0 %vm1403_vm2, %v15519_v33  ;;  %15521 = vst [vmem:[#allocation16_spill] sm:$0xff] %v13801_v62  ;;  %v14085_v62 = vld [vmem:[#allocation2 + $0x141] sm:$0xff] }
 0x2d1   :  { %v2218_v46 = vadd.f32 %v2217_v11, %v13649_v19  ;;  %11363 = vmatprep.mubr.msk.f32.mxu0 %vm1403_vm2, %v7322_v49  ;;  %v9425_v19 = vld [vmem:[%s15391_s3 + $0xb8] sm:$0x3]  ;;  %v15523_v11 = vld [vmem:[#allocation23_spill] sm:$0xff] }
 0x2d2   :  { %v10728_v5 = vpop.f32.mrf.mxu1  ;;  %10895 = vmatmul.mubr.msk.f32.vlgmr.msra.gmra.mxu1 %vm1403_vm2, %v15520_v47  ;;  %v13886_v47 = vpop.f32.mrf.mxu0 }
 0x2d3   :  { %v2442_v6 = vadd.f32 %v10728_v5, %v13661_v18  ;;  %10919 = vmatpush3.msk.msra.mxu1 %vm1881_vm3, %v13670_v12  ;;  %10897 = vmatprep.mubr.msk.f32.mxu1 %vm1403_vm2, %v13285_v38  ;;  %15524 = vst [vmem:[#allocation9_spill] sm:$0xff] %v13886_v47 }
 0x2d4   :  { %v2362_v0 = vpop.f32.mrf.mxu1  ;;  %10920 = vmatprep.subr.mxu1 %v9386_v13  ;;  %11364 = vmatmul.mubr.msk.f32.gmra.mxu0 %vm1403_vm2, %v7323_v9 }
 0x2d5   :  { %v2441_v24 = vadd.f32 %v2362_v0, %v13674_v26  ;;  %10921 = vmatpush3.msra.mxu1 %v9386_v13 }
 0x2d6   :  { %v10731_v18 = vpop.f32.mrf.mxu1  ;;  %10898 = vmatmul.mubr.msk.f32.gmra.mxu1 %vm1403_vm2, %v13291_v57  ;;  %10974 = vmatprep.subr.msk.mxu1 %vm1881_vm3, %v9425_v19 }
 0x2d7   :  { %v2444_v38 = vadd.f32 %v10731_v18, %v13684_v36  ;;  %10900 = vmatprep.mubr.msk.f32.mxu1 %vm1403_vm2, %v13298_v59  ;;  %v15522_v36 = vld [vmem:[#allocation12_spill] sm:$0xff]  ;;  %v13900_v18 = vld [vmem:[#allocation2 + $0x64] sm:$0xff] }
 0x2d8   :  { %v2372_v12 = vpop.f32.mrf.mxu1 }
 0x2d9   :  { %v2443_v41 = vadd.f32 %v2372_v12, %v13691_v3  ;;  %v13902_v12 = vpop.f32.mrf.mxu0 }
 0x2da   :  { %v10734_v52 = vpop.f32.mrf.mxu1  ;;  %10901 = vmatmul.mubr.msk.f32.gmra.mxu1 %vm1403_vm2, %v13307_v8  ;;  %15525 = vst [vmem:[#allocation19_spill] sm:$0xff] %v13902_v12 }
 0x2db   :  { %v2446_v26 = vadd.f32 %v10734_v52, %v13702_v14  ;;  %10903 = vmatprep.mubr.msk.f32.mxu1 %vm1403_vm2, %v13314_v61 }
 0x2dc   :  { %v2382_v57 = vpop.f32.mrf.mxu1 }
 0x2dd   :  { %v2445_v25 = vadd.f32 %v2382_v57, %v13709_v28  ;;  %v13906_v57 = vld [vmem:[#allocation2 + $0x74] sm:$0xff] }
 0x2de   :  { %v10737_v32 = vpop.f32.mrf.mxu1  ;;  %10904 = vmatmul.mubr.msk.f32.gmra.mxu1 %vm1403_vm2, %v13418_v60 }
 0x2df   :  { %v13821_v59 = vadd.f32 %v10737_v32, %v13718_v53  ;;  %10906 = vmatprep.mubr.msk.f32.mxu1 %vm1403_vm2, %v15522_v36 }
 0x2e0   :  { %v2392_v3 = vpop.f32.mrf.mxu1 }
 0x2e1   :  { %v13826_v8 = vadd.f32 %v2392_v3, %v13725_v27  ;;  %v13916_v3 = vpop.f32.mrf.mxu0 }
 0x2e2   :  { %v10740_v14 = vpop.f32.mrf.mxu1  ;;  %10907 = vmatmul.mubr.msk.f32.gmra.mxu1 %vm1403_vm2, %v15523_v11  ;;  %15526 = vst [vmem:[#allocation20_spill] sm:$0xff] %v13916_v3  ;;  %v5229_v3 = vld [vmem:[#allocation2 + $0x30] sm:$0xff] }
 0x2e3   :  { %v13831_v61 = vadd.f32 %v10740_v14, %v13735_v7  ;;  %10909 = vmatprep.mubr.msk.f32.mxu1 %vm1403_vm2, %v13339_v56 }
 0x2e4   :  { %v2402_v60 = vpop.f32.mrf.mxu1 }
 0x2e5   :  { %v13836_v28 = vadd.f32 %v2402_v60, %v13740_v35 }
 0x2e6   :  { %v10743_v53 = vpop.f32.mrf.mxu1  ;;  %10910 = vmatmul.mubr.msk.f32.gmra.mxu1 %vm1403_vm2, %v13345_v15 }
 0x2e7   :  { %v13841_v27 = vadd.f32 %v10743_v53, %v13750_v1  ;;  %10912 = vmatprep.mubr.msk.f32.mxu1 %vm1403_vm2, %v13351_v39  ;;  %v13928_v53 = vpop.f32.mrf.mxu0 }
 0x2e8   :  { %v2412_v33 = vpop.f32.mrf.mxu1  ;;  %15527 = vst [vmem:[#allocation6_spill] sm:$0xff] %v13928_v53 }
 0x2e9   :  { %v13846_v7 = vadd.f32 %v2412_v33, %v13755_v54 }
 0x2ea   :  { %v10746_v49 = vpop.f32.mrf.mxu1  ;;  %10913 = vmatmul.mubr.msk.f32.gmra.mxu1 %vm1403_vm2, %v13357_v34 }
 0x2eb   :  { %v13851_v56 = vadd.f32 %v10746_v49, %v13765_v20  ;;  %10915 = vmatprep.mubr.msk.f32.mxu1 %vm1403_vm2, %v13363_v21  ;;  %v3844_v20 = vld [vmem:[#allocation2 + $0x24] sm:$0xff]  ;;  %v9424_v21 = vld [vmem:[%s15391_s3 + $0xb0] sm:$0xff] }
 0x2ec   :  { %v2422_v15 = vpop.f32.mrf.mxu1  ;;  %v13931_v49 = vld [vmem:[#allocation2 + $0xf4] sm:$0xff] }
 0x2ed   :  { %v13856_v35 = vadd.f32 %v2422_v15, %v13770_v63  ;;  %v13870_v63 = vld [vmem:[#allocation2 + $0x34] sm:$0xff] }
 0x2ee   :  { %v10749_v1 = vpop.f32.mrf.mxu1  ;;  %10916 = vmatmul.mubr.msk.f32.gmra.mxu1 %vm1403_vm2, %v13453_v31 }
 0x2ef   :  { %v13860_v39 = vadd.f32 %v10749_v1, %v2223_v10  ;;  %10922 = vmatprep.mubr.msk.f32.mxu1 %vm1403_vm2, %v13374_v40  ;;  %v13880_v40 = vld [vmem:[%s15391_s3 + $0xd8] sm:$0x3]  ;;  %v13943_v1 = vpop.f32.mrf.mxu0 }
 0x2f0   :  { %v2432_v34 = vpop.f32.mrf.mxu1  ;;  %15528 = vst [vmem:[#allocation17_spill] sm:$0xff] %v13943_v1 }
 0x2f1   :  { %v13864_v54 = vadd.f32 %v2432_v34, %v2218_v46  ;;  %v13884_v46 = vld [vmem:[#allocation2 + $0x44] sm:$0xff] }
 0x2f2   :  { %v10756_v13 = vpop.f32.mrf.mxu1  ;;  %10923 = vmatmul.mubr.msk.f32.vlgmr.msra.gmra.mxu1 %vm1403_vm2, %v3844_v20  ;;  %v13947_v20 = vld [vmem:[#allocation2 + $0x114] sm:$0xff] }
 0x2f3   :  { %v13872_v5 = vadd.f32 %v10756_v13, %v2442_v6  ;;  %10975 = vmatpush3.msk.msra.mxu1 %vm1881_vm3, %v9425_v19  ;;  %10925 = vmatprep.mubr.msk.f32.mxu1 %vm1403_vm2, %v13870_v63  ;;  %v13890_v19 = vld [vmem:[#allocation2 + $0x54] sm:$0xff]  ;;  %v13957_v13 = vld [vmem:[#allocation2 + $0x124] sm:$0xff] }
 0x2f4   :  { %v2593_v31 = vpop.f32.mrf.mxu1  ;;  %10976 = vmatprep.subr.mxu1 %v9424_v21 }
 0x2f5   :  { %v13882_v10 = vadd.f32 %v2593_v31, %v2441_v24  ;;  %10977 = vmatpush3.msra.mxu1 %v9424_v21  ;;  %v13959_v31 = vpop.f32.mrf.mxu0 }
 0x2f6   :  { %v10759_v6 = vpop.f32.mrf.mxu1  ;;  %10926 = vmatmul.mubr.msk.f32.gmra.mxu1 %vm1403_vm2, %v13884_v46  ;;  %11030 = vmatprep.subr.msk.mxu1 %vm1881_vm3, %v13880_v40  ;;  %15529 = vst [vmem:[#allocation21_spill] sm:$0xff] %v13959_v31 }
 0x2f7   :  { %v13894_v0 = vadd.f32 %v10759_v6, %v2444_v38  ;;  %10928 = vmatprep.mubr.msk.f32.mxu1 %vm1403_vm2, %v13890_v19 }
 0x2f8   :  { %v2603_v9 = vpop.f32.mrf.mxu1 }
 0x2f9   :  { %v13898_v24 = vadd.f32 %v2603_v9, %v2443_v41  ;;  %v13914_v41 = vld [vmem:[#allocation2 + $0x84] sm:$0xff]  ;;  %v13963_v9 = vld [vmem:[#allocation2 + $0x134] sm:$0xff] }
 0x2fa   :  { %v10762_v52 = vpop.f32.mrf.mxu1  ;;  %10929 = vmatmul.mubr.msk.f32.gmra.mxu1 %vm1403_vm2, %v13900_v18 }
 0x2fb   :  { %v13908_v32 = vadd.f32 %v10762_v52, %v2446_v26  ;;  %10931 = vmatprep.mubr.msk.f32.mxu1 %vm1403_vm2, %v13906_v57 }
 0x2fc   :  { %v2613_v38 = vpop.f32.mrf.mxu1 }
 0x2fd   :  { %v13912_v36 = vadd.f32 %v2613_v38, %v2445_v25  ;;  %v3852_v25 = vld [vmem:[#allocation2 + $0xe4] sm:$0xff] }
 0x2fe   :  { %v10765_v14 = vpop.f32.mrf.mxu1  ;;  %10932 = vmatmul.mubr.msk.f32.gmra.mxu1 %vm1403_vm2, %v13914_v41  ;;  %v13973_v38 = vld [vmem:[#allocation2 + $0x144] sm:$0xff] }
 0x2ff   :  { %v13921_v11 = vadd.f32 %v10765_v14, %v13821_v59  ;;  %10934 = vmatprep.mubr.msk.f32.mxu1 %vm1403_vm2, %v13423_v45  ;;  %v13975_v14 = vpop.f32.mrf.mxu0 }
 0x300   :  { %v2623_v26 = vpop.f32.mrf.mxu1  ;;  %15530 = vst [vmem:[#allocation10_spill] sm:$0xff] %v13975_v14  ;;  %v4775_v14 = vld [vmem:[#allocation2 + $0xe3] sm:$0xff] }
 0x301   :  { %v13926_v60 = vadd.f32 %v2623_v26, %v13826_v8  ;;  %v13941_v8 = vld [vmem:[#allocation2 + $0x104] sm:$0xff] }
 0x302   :  { %v10768_v33 = vpop.f32.mrf.mxu1  ;;  %10935 = vmatmul.mubr.msk.f32.gmra.mxu1 %vm1403_vm2, %v3852_v25 }
 0x303   :  { %v13934_v15 = vadd.f32 %v10768_v33, %v13831_v61  ;;  %10937 = vmatprep.mubr.msk.f32.mxu1 %vm1403_vm2, %v13931_v49 }
 0x304   :  { %v2633_v59 = vpop.f32.mrf.mxu1 }
 0x305   :  { %v13939_v45 = vadd.f32 %v2633_v59, %v13836_v28  ;;  %v13990_v59 = vpop.f32.mrf.mxu0 }
 0x306   :  { %v10771_v34 = vpop.f32.mrf.mxu1  ;;  %10938 = vmatmul.mubr.msk.f32.gmra.mxu1 %vm1403_vm2, %v13941_v8  ;;  %15531 = vst [vmem:[#allocation22_spill] sm:$0xff] %v13990_v59 }
 0x307   :  { %v13950_v61 = vadd.f32 %v10771_v34, %v13841_v27  ;;  %10940 = vmatprep.mubr.msk.f32.mxu1 %vm1403_vm2, %v13947_v20 }
 0x308   :  { %v2643_v21 = vpop.f32.mrf.mxu1 }
 0x309   :  { %v13955_v28 = vadd.f32 %v2643_v21, %v13846_v7 }
 0x30a   :  { %v10774_v6 = vpop.f32.mrf.mxu1  ;;  %10941 = vmatmul.mubr.msk.f32.gmra.mxu1 %vm1403_vm2, %v13957_v13 }
 0x30b   :  { %v13966_v27 = vadd.f32 %v10774_v6, %v13851_v56  ;;  %10943 = vmatprep.mubr.msk.f32.mxu1 %vm1403_vm2, %v13963_v9 }
 0x30c   :  { %v2653_v52 = vpop.f32.mrf.mxu1 }
 0x30d   :  { %v13971_v7 = vadd.f32 %v2653_v52, %v13856_v35  ;;  %v9462_v35 = vld [vmem:[%s15391_s3 + $0xd0] sm:$0xff] }
 0x30e   :  { %v10777_v26 = vpop.f32.mrf.mxu1  ;;  %10944 = vmatmul.mubr.msk.f32.gmra.mxu1 %vm1403_vm2, %v13973_v38 }
 0x30f   :  { %v13980_v25 = vadd.f32 %v10777_v26, %v13860_v39  ;;  %10978 = vmatprep.mubr.msk.f32.mxu1 %vm1403_vm2, %v13536_v50  ;;  %v14004_v50 = vld [vmem:[%s15391_s3 + $0xf8] sm:$0x3] }
 0x310   :  { %v2663_v56 = vpop.f32.mrf.mxu1 }
 0x311   :  { %v13985_v33 = vadd.f32 %v2663_v56, %v13864_v54 }
 0x312   :  { %v10784_v34 = vpop.f32.mrf.mxu1  ;;  %10979 = vmatmul.mubr.msk.f32.vlgmr.msra.gmra.mxu1 %vm1403_vm2, %v13544_v17  ;;  %v14009_v17 = vpop.f32.mrf.mxu0 }
 0x313   :  { %v13995_v39 = vadd.f32 %v10784_v34, %v13872_v5  ;;  %11031 = vmatpush3.msk.msra.mxu1 %vm1881_vm3, %v13880_v40  ;;  %10981 = vmatprep.mubr.msk.f32.mxu1 %vm1403_vm2, %v13557_v55  ;;  %15532 = vst [vmem:[#allocation11_spill] sm:$0xff] %v14009_v17  ;;  %v14114_v17 = vld [vmem:[#allocation2 + $0x43] sm:$0xff] }
 0x314   :  { %v2824_v54 = vpop.f32.mrf.mxu1  ;;  %11032 = vmatprep.subr.mxu1 %v9462_v35  ;;  %v14023_v6 = vpop.f32.mrf.mxu0 }
 0x315   :  { %v14007_v21 = vadd.f32 %v2824_v54, %v13882_v10  ;;  %11033 = vmatpush3.msra.mxu1 %v9462_v35  ;;  %15533 = vst [vmem:[#allocation12_spill] sm:$0xff] %v14023_v6 }
 0x316   :  { %v10787_v5 = vpop.f32.mrf.mxu1  ;;  %10982 = vmatmul.mubr.msk.f32.gmra.mxu1 %vm1403_vm2, %v13563_v30  ;;  %11086 = vmatprep.subr.msk.mxu1 %vm1881_vm3, %v14004_v50  ;;  %v14027_v30 = vld [vmem:[#allocation2 + $0x81] sm:$0xff]  ;;  %v14039_v56 = vpop.f32.mrf.mxu0 }
 0x317   :  { %v14016_v55 = vadd.f32 %v10787_v5, %v13894_v0  ;;  %10984 = vmatprep.mubr.msk.f32.mxu1 %vm1403_vm2, %v13573_v29  ;;  %15534 = vst [vmem:[#allocation23_spill] sm:$0xff] %v14039_v56  ;;  %v4767_v56 = vld [vmem:[#allocation2 + $0x23] sm:$0xff] }
 0x318   :  { %v2834_v40 = vpop.f32.mrf.mxu1  ;;  %v14050_v5 = vpop.f32.mrf.mxu0 }
 0x319   :  { %v14021_v10 = vadd.f32 %v2834_v40, %v13898_v24  ;;  %v14037_v24 = vld [vmem:[#allocation2 + $0x91] sm:$0xff]  ;;  %15535 = vst [vmem:[#allocation28_spill] sm:$0xff] %v14050_v5 }
 0x31a   :  { %v10790_v52 = vpop.f32.mrf.mxu1  ;;  %10985 = vmatmul.mubr.msk.f32.gmra.mxu1 %vm1403_vm2, %v13582_v48  ;;  %v4313_v48 = vld [vmem:[#allocation2 + $0xe1] sm:$0xff] }
 0x31b   :  { %v14030_v26 = vadd.f32 %v10790_v52, %v13908_v32  ;;  %10987 = vmatprep.mubr.msk.f32.mxu1 %vm1403_vm2, %v14027_v30  ;;  %v14053_v52 = vld [vmem:[#allocation2 + $0x101] sm:$0xff] }
 0x31c   :  { %v2844_v0 = vpop.f32.mrf.mxu1 }
 0x31d   :  { %v14035_v29 = vadd.f32 %v2844_v0, %v13912_v36  ;;  %v4314_v36 = vld [vmem:[#allocation2 + $0xf1] sm:$0xff] }
 0x31e   :  { %v10793_v35 = vpop.f32.mrf.mxu1  ;;  %10988 = vmatmul.mubr.msk.f32.gmra.mxu1 %vm1403_vm2, %v14037_v24 }
 0x31f   :  { %v14044_v34 = vadd.f32 %v10793_v35, %v13921_v11  ;;  %10990 = vmatprep.mubr.msk.f32.mxu1 %vm1403_vm2, %v4313_v48  ;;  %v14065_v48 = vpop.f32.mrf.mxu0 }
 0x320   :  { %v2854_v32 = vpop.f32.mrf.mxu1  ;;  %15536 = vst [vmem:[#allocation29_spill] sm:$0xff] %v14065_v48 }
 0x321   :  { %v14048_v54 = vadd.f32 %v2854_v32, %v13926_v60  ;;  %v14063_v60 = vld [vmem:[#allocation2 + $0x111] sm:$0xff]  ;;  %v14081_v12 = vpop.f32.mrf.mxu0 }
 0x322   :  { %v10796_v40 = vpop.f32.mrf.mxu1  ;;  %10991 = vmatmul.mubr.msk.f32.gmra.mxu1 %vm1403_vm2, %v4314_v36  ;;  %v14069_v36 = vld [vmem:[#allocation2 + $0x121] sm:$0xff]  ;;  %15537 = vst [vmem:[#allocation30_spill] sm:$0xff] %v14081_v12 }
 0x323   :  { %v14056_v0 = vadd.f32 %v10796_v40, %v13934_v15  ;;  %10993 = vmatprep.mubr.msk.f32.mxu1 %vm1403_vm2, %v14053_v52  ;;  %v14097_v5 = vpop.f32.mrf.mxu0 }
 0x324   :  { %v2864_v11 = vpop.f32.mrf.mxu1  ;;  %15538 = vst [vmem:[#allocation31_spill] sm:$0xff] %v14097_v5 }
 0x325   :  { %v14061_v35 = vadd.f32 %v2864_v11, %v13939_v45  ;;  %v14079_v11 = vld [vmem:[#allocation2 + $0x131] sm:$0xff]  ;;  %v14111_v5 = vpop.f32.mrf.mxu0 }
 0x326   :  { %v10799_v32 = vpop.f32.mrf.mxu1  ;;  %10994 = vmatmul.mubr.msk.f32.gmra.mxu1 %vm1403_vm2, %v14063_v60  ;;  %15539 = vst [vmem:[#allocation32_spill] sm:$0xff] %v14111_v5 }
 0x327   :  { %v14072_v15 = vadd.f32 %v10799_v32, %v13950_v61  ;;  %10996 = vmatprep.mubr.msk.f32.mxu1 %vm1403_vm2, %v14069_v36 }
 0x328   :  { %v2874_v40 = vpop.f32.mrf.mxu1 }
 0x329   :  { %v14077_v45 = vadd.f32 %v2874_v40, %v13955_v28  ;;  %v14095_v40 = vld [vmem:[#allocation2 + $0x151] sm:$0xff] }
 0x32a   :  { %v10802_v48 = vpop.f32.mrf.mxu1  ;;  %10997 = vmatmul.mubr.msk.f32.gmra.mxu1 %vm1403_vm2, %v14079_v11 }
 0x32b   :  { %v14088_v61 = vadd.f32 %v10802_v48, %v13966_v27  ;;  %10999 = vmatprep.mubr.msk.f32.mxu1 %vm1403_vm2, %v14085_v62 }
 0x32c   :  { %v2884_v32 = vpop.f32.mrf.mxu1 }
 0x32d   :  { %v14093_v28 = vadd.f32 %v2884_v32, %v13971_v7  ;;  %v4768_v7 = vld [vmem:[#allocation2 + $0x33] sm:$0xff] }
 0x32e   :  { %v10805_v12 = vpop.f32.mrf.mxu1  ;;  %11000 = vmatmul.mubr.msk.f32.gmra.mxu1 %vm1403_vm2, %v14095_v40  ;;  %v9500_v32 = vld [vmem:[%s15391_s3 + $0xf0] sm:$0xff] }
 0x32f   :  { %v14102_v16 = vadd.f32 %v10805_v12, %v13980_v25  ;;  %11034 = vmatprep.mubr.msk.f32.mxu1 %vm1403_vm2, %v4767_v56  ;;  %v14126_v25 = vld [vmem:[%s15391_s3 + $0x118] sm:$0x3] }
 0x330   :  { %v2894_v27 = vpop.f32.mrf.mxu1 }
 0x331   :  { %v14106_v48 = vadd.f32 %v2894_v27, %v13985_v33  ;;  %v14131_v27 = vld [vmem:[#allocation2 + $0x53] sm:$0xff] }
 0x332   :  { %v10812_v6 = vpop.f32.mrf.mxu1  ;;  %11035 = vmatmul.mubr.msk.f32.vlgmr.msra.gmra.mxu1 %vm1403_vm2, %v4768_v7 }
 0x333   :  { %v14117_v12 = vadd.f32 %v10812_v6, %v13995_v39  ;;  %11087 = vmatpush3.msk.msra.mxu1 %vm1881_vm3, %v14004_v50  ;;  %11037 = vmatprep.mubr.msk.f32.mxu1 %vm1403_vm2, %v14114_v17  ;;  %v14133_v39 = vpop.f32.mrf.mxu0  ;;  %v14137_v50 = vld [vmem:[#allocation2 + $0x63] sm:$0xff] }
 0x334   :  { %v3055_v33 = vpop.f32.mrf.mxu1  ;;  %11088 = vmatprep.subr.mxu1 %v9500_v32  ;;  %15540 = vst [vmem:[#allocation33_spill] sm:$0xff] %v14133_v39 }
 0x335   :  { %v14129_v56 = vadd.f32 %v3055_v33, %v14007_v21  ;;  %11089 = vmatpush3.msra.mxu1 %v9500_v32  ;;  %v14149_v33 = vld [vmem:[#allocation2 + $0x73] sm:$0xff]  ;;  %v14151_v39 = vpop.f32.mrf.mxu0 }
 0x336   :  { %v10815_v6 = vpop.f32.mrf.mxu1  ;;  %11038 = vmatmul.mubr.msk.f32.gmra.mxu1 %vm1403_vm2, %v14131_v27  ;;  %11142 = vmatprep.subr.msk.mxu1 %vm1881_vm3, %v14126_v25  ;;  %15541 = vst [vmem:[#allocation34_spill] sm:$0xff] %v14151_v39 }
 0x337   :  { %v14142_v7 = vadd.f32 %v10815_v6, %v14016_v55  ;;  %11040 = vmatprep.mubr.msk.f32.mxu1 %vm1403_vm2, %v14137_v50  ;;  %v14167_v59 = vpop.f32.mrf.mxu0 }
 0x338   :  { %v3065_v21 = vpop.f32.mrf.mxu1  ;;  %15542 = vst [vmem:[#allocation35_spill] sm:$0xff] %v14167_v59  ;;  %v14181_v59 = vld [vmem:[#allocation2 + $0x103] sm:$0xff] }
 0x339   :  { %v14147_v32 = vadd.f32 %v3065_v21, %v14021_v10  ;;  %v14165_v21 = vld [vmem:[#allocation2 + $0x93] sm:$0xff] }
 0x33a   :  { %v10818_v5 = vpop.f32.mrf.mxu1  ;;  %11041 = vmatmul.mubr.msk.f32.gmra.mxu1 %vm1403_vm2, %v14149_v33 }
 0x33b   :  { %v14158_v55 = vadd.f32 %v10818_v5, %v14030_v26  ;;  %11043 = vmatprep.mubr.msk.f32.mxu1 %vm1403_vm2, %v14155_v4 }
 0x33c   :  { %v3075_v6 = vpop.f32.mrf.mxu1 }
 0x33d   :  { %v14163_v10 = vadd.f32 %v3075_v6, %v14035_v29  ;;  %v4776_v29 = vld [vmem:[#allocation2 + $0xf3] sm:$0xff]  ;;  %v14178_v6 = vpop.f32.mrf.mxu0 }
 0x33e   :  { %v10821_v39 = vpop.f32.mrf.mxu1  ;;  %11044 = vmatmul.mubr.msk.f32.gmra.mxu1 %vm1403_vm2, %v14165_v21  ;;  %15543 = vst [vmem:[#allocation36_spill] sm:$0xff] %v14178_v6 }
 0x33f   :  { %v14172_v42 = vadd.f32 %v10821_v39, %v14044_v34  ;;  %11046 = vmatprep.mubr.msk.f32.mxu1 %vm1403_vm2, %v4775_v14  ;;  %v14193_v39 = vpop.f32.mrf.mxu0 }
 0x340   :  { %v3085_v26 = vpop.f32.mrf.mxu1  ;;  %15544 = vst [vmem:[#allocation37_spill] sm:$0xff] %v14193_v39 }
 0x341   :  { %v14176_v5 = vadd.f32 %v3085_v26, %v14048_v54  ;;  %v14191_v54 = vld [vmem:[#allocation2 + $0x113] sm:$0xff]  ;;  %v14209_v6 = vpop.f32.mrf.mxu0 }
 0x342   :  { %v10824_v31 = vpop.f32.mrf.mxu1  ;;  %11047 = vmatmul.mubr.msk.f32.gmra.mxu1 %vm1403_vm2, %v4776_v29  ;;  %v14197_v29 = vld [vmem:[#allocation2 + $0x123] sm:$0xff]  ;;  %15545 = vst [vmem:[#allocation38_spill] sm:$0xff] %v14209_v6 }
 0x343   :  { %v14184_v1 = vadd.f32 %v10824_v31, %v14056_v0  ;;  %11049 = vmatprep.mubr.msk.f32.mxu1 %vm1403_vm2, %v14181_v59  ;;  %v14225_v53 = vpop.f32.mrf.mxu0 }
 0x344   :  { %v3095_v34 = vpop.f32.mrf.mxu1  ;;  %15547 = vst [vmem:[#allocation40_spill] sm:$0xff] %v14225_v53 }
 0x345   :  { %v14189_v14 = vadd.f32 %v3095_v34, %v14061_v35  ;;  %v14207_v34 = vld [vmem:[#allocation2 + $0x133] sm:$0xff]  ;;  %v14239_v53 = vpop.f32.mrf.mxu0 }
 0x346   :  { %v10827_v26 = vpop.f32.mrf.mxu1  ;;  %11050 = vmatmul.mubr.msk.f32.gmra.mxu1 %vm1403_vm2, %v14191_v54  ;;  %15548 = vst [vmem:[#allocation41_spill] sm:$0xff] %v14239_v53 }
 0x347   :  { %v14200_v31 = vadd.f32 %v10827_v26, %v14072_v15  ;;  %11052 = vmatprep.mubr.msk.f32.mxu1 %vm1403_vm2, %v14197_v29 }
 0x348   :  { %v3105_v0 = vpop.f32.mrf.mxu1 }
 0x349   :  { %v14205_v35 = vadd.f32 %v3105_v0, %v14077_v45  ;;  %v14223_v0 = vld [vmem:[#allocation2 + $0x153] sm:$0xff] }
 0x34a   :  { %v10830_v39 = vpop.f32.mrf.mxu1  ;;  %11053 = vmatmul.mubr.msk.f32.gmra.mxu1 %vm1403_vm2, %v14207_v34  ;;  %15546 = vst [vmem:[#allocation39_spill] sm:$0xff] %v14223_v0 }
 0x34b   :  { %v14216_v15 = vadd.f32 %v10830_v39, %v14088_v61  ;;  %11055 = vmatprep.mubr.msk.f32.mxu1 %vm1403_vm2, %v14213_v23 }
 0x34c   :  { %v3115_v26 = vpop.f32.mrf.mxu1 }
 0x34d   :  { %v14221_v45 = vadd.f32 %v3115_v26, %v14093_v28  ;;  %v5230_v28 = vld [vmem:[#allocation2 + $0x40] sm:$0xff]  ;;  %v9538_v26 = vld [vmem:[%s15391_s3 + $0x110] sm:$0xff] }
 0x34e   :  { %v10833_v6 = vpop.f32.mrf.mxu1  ;;  %11056 = vmatmul.mubr.msk.f32.gmra.mxu1 %vm1403_vm2, %v14223_v0 }
 0x34f   :  { %v14230_v51 = vadd.f32 %v10833_v6, %v14102_v16  ;;  %11090 = vmatprep.mubr.msk.f32.mxu1 %vm1403_vm2, %v5229_v3  ;;  %v14251_v3 = vld [vmem:[%s15391_s3 + $0x138] sm:$0x3] }
 0x350   :  { %v3125_v61 = vpop.f32.mrf.mxu1 }
 0x351   :  { %v14234_v39 = vadd.f32 %v3125_v61, %v14106_v48  ;;  %v5232_v61 = vld [vmem:[#allocation2 + $0x60] sm:$0xff] }
 0x352   :  { %v10840_v47 = vpop.f32.mrf.mxu1  ;;  %11091 = vmatmul.mubr.msk.f32.vlgmr.msra.gmra.mxu1 %vm1403_vm2, %v5230_v28  ;;  %v14256_v28 = vpop.f32.mrf.mxu0 }
 0x353   :  { %v14243_v16 = vadd.f32 %v10840_v47, %v14117_v12  ;;  %11143 = vmatpush3.msk.msra.mxu1 %vm1881_vm3, %v14126_v25  ;;  %11093 = vmatprep.mubr.msk.f32.mxu1 %vm1403_vm2, %v5231_v22  ;;  %15549 = vst [vmem:[#allocation42_spill] sm:$0xff] %v14256_v28  ;;  %v5233_v12 = vld [vmem:[#allocation2 + $0x70] sm:$0xff] }
 0x354   :  { %v3286_v48 = vpop.f32.mrf.mxu1  ;;  %11144 = vmatprep.subr.mxu1 %v9538_v26 }
 0x355   :  { %v14254_v6 = vadd.f32 %v3286_v48, %v14129_v56  ;;  %11145 = vmatpush3.msra.mxu1 %v9538_v26  ;;  %v5234_v48 = vld [vmem:[#allocation2 + $0x80] sm:$0xff]  ;;  %v14268_v26 = vpop.f32.mrf.mxu0 }
 0x356   :  { %v10843_v47 = vpop.f32.mrf.mxu1  ;;  %11094 = vmatmul.mubr.msk.f32.gmra.mxu1 %vm1403_vm2, %v5232_v61  ;;  %11198 = vmatprep.subr.msk.mxu1 %vm1881_vm3, %v14251_v3  ;;  %15550 = vst [vmem:[#allocation43_spill] sm:$0xff] %v14268_v26  ;;  %v5235_v61 = vld [vmem:[#allocation2 + $0x90] sm:$0xff] }
 0x357   :  { %v14262_v22 = vadd.f32 %v10843_v47, %v14142_v7  ;;  %11096 = vmatprep.mubr.msk.f32.mxu1 %vm1403_vm2, %v5233_v12  ;;  %v5236_v12 = vld [vmem:[#allocation2 + $0xa0] sm:$0xff]  ;;  %v14278_v0 = vpop.f32.mrf.mxu0 }
 0x358   :  { %v3296_v25 = vpop.f32.mrf.mxu1  ;;  %15551 = vst [vmem:[#allocation44_spill] sm:$0xff] %v14278_v0 }
 0x359   :  { %v14266_v56 = vadd.f32 %v3296_v25, %v14147_v32  ;;  %v5237_v25 = vld [vmem:[#allocation2 + $0xf0] sm:$0xff] }
 0x35a   :  { %v10846_v28 = vpop.f32.mrf.mxu1  ;;  %11097 = vmatmul.mubr.msk.f32.gmra.mxu1 %vm1403_vm2, %v5234_v48  ;;  %v5238_v48 = vld [vmem:[#allocation2 + $0x100] sm:$0xff] }
 0x35b   :  { %v14272_v53 = vadd.f32 %v10846_v28, %v14158_v55  ;;  %11099 = vmatprep.mubr.msk.f32.mxu1 %vm1403_vm2, %v5235_v61  ;;  %v14288_v61 = vpop.f32.mrf.mxu0 }
 0x35c   :  { %v3306_v7 = vpop.f32.mrf.mxu1  ;;  %15552 = vst [vmem:[#allocation45_spill] sm:$0xff] %v14288_v61 }
 0x35d   :  { %v14276_v47 = vadd.f32 %v3306_v7, %v14163_v10  ;;  %v5239_v7 = vld [vmem:[#allocation2 + $0x110] sm:$0xff] }
 0x35e   :  { %v10849_v32 = vpop.f32.mrf.mxu1  ;;  %11100 = vmatmul.mubr.msk.f32.gmra.mxu1 %vm1403_vm2, %v5236_v12 }
 0x35f   :  { %v14282_v26 = vadd.f32 %v10849_v32, %v14172_v42  ;;  %11102 = vmatprep.mubr.msk.f32.mxu1 %vm1403_vm2, %v5237_v25  ;;  %v5240_v32 = vld [vmem:[#allocation2 + $0x120] sm:$0xff]  ;;  %v14298_v25 = vpop.f32.mrf.mxu0 }
 0x360   :  { %v3316_v55 = vpop.f32.mrf.mxu1  ;;  %15553 = vst [vmem:[#allocation46_spill] sm:$0xff] %v14298_v25 }
 0x361   :  { %v14286_v28 = vadd.f32 %v3316_v55, %v14176_v5  ;;  %v5241_v55 = vld [vmem:[#allocation2 + $0x130] sm:$0xff] }
 0x362   :  { %v10852_v10 = vpop.f32.mrf.mxu1  ;;  %11103 = vmatmul.mubr.msk.f32.gmra.mxu1 %vm1403_vm2, %v5238_v48 }
 0x363   :  { %v14292_v0 = vadd.f32 %v10852_v10, %v14184_v1  ;;  %11105 = vmatprep.mubr.msk.f32.mxu1 %vm1403_vm2, %v5239_v7  ;;  %v5242_v10 = vld [vmem:[#allocation2 + $0x140] sm:$0xff]  ;;  %v14308_v7 = vpop.f32.mrf.mxu0 }
 0x364   :  { %v3326_v42 = vpop.f32.mrf.mxu1  ;;  %15554 = vst [vmem:[#allocation47_spill] sm:$0xff] %v14308_v7 }
 0x365   :  { %v14296_v12 = vadd.f32 %v3326_v42, %v14189_v14  ;;  %v5243_v42 = vld [vmem:[#allocation2 + $0x150] sm:$0xff] }
 0x366   :  { %v10855_v5 = vpop.f32.mrf.mxu1  ;;  %11106 = vmatmul.mubr.msk.f32.gmra.mxu1 %vm1403_vm2, %v5240_v32 }
 0x367   :  { %v14302_v61 = vadd.f32 %v10855_v5, %v14200_v31  ;;  %11108 = vmatprep.mubr.msk.f32.mxu1 %vm1403_vm2, %v5241_v55  ;;  %v5244_v5 = vld [vmem:[#allocation2 + $0x160] sm:$0xff]  ;;  %v14318_v55 = vpop.f32.mrf.mxu0 }
 0x368   :  { %v3336_v1 = vpop.f32.mrf.mxu1  ;;  %15555 = vst [vmem:[#allocation48_spill] sm:$0xff] %v14318_v55 }
 0x369   :  { %v14306_v48 = vadd.f32 %v3336_v1, %v14205_v35  ;;  %v5691_v1 = vld [vmem:[#allocation2 + $0x32] sm:$0xff] }
 0x36a   :  { %v10858_v14 = vpop.f32.mrf.mxu1  ;;  %11109 = vmatmul.mubr.msk.f32.gmra.mxu1 %vm1403_vm2, %v5242_v10 }
 0x36b   :  { %v14312_v25 = vadd.f32 %v10858_v14, %v14216_v15  ;;  %11111 = vmatprep.mubr.msk.f32.mxu1 %vm1403_vm2, %v5243_v42  ;;  %v5692_v14 = vld [vmem:[#allocation2 + $0x42] sm:$0xff]  ;;  %v14331_v42 = vpop.f32.mrf.mxu0 }
 0x36c   :  { %v3346_v31 = vpop.f32.mrf.mxu1  ;;  %15556 = vst [vmem:[#allocation49_spill] sm:$0xff] %v14331_v42 }
 0x36d   :  { %v14316_v32 = vadd.f32 %v3346_v31, %v14221_v45  ;;  %v9576_v45 = vld [vmem:[%s15391_s3 + $0x130] sm:$0xff] }
 0x36e   :  { %v10861_v35 = vpop.f32.mrf.mxu1  ;;  %11112 = vmatmul.mubr.msk.f32.gmra.mxu1 %vm1403_vm2, %v5244_v5  ;;  %v5693_v5 = vld [vmem:[#allocation2 + $0x52] sm:$0xff] }
 0x36f   :  { %v14322_v7 = vadd.f32 %v10861_v35, %v14230_v51  ;;  %11146 = vmatprep.mubr.msk.f32.mxu1 %vm1403_vm2, %v5691_v1 }
 0x370   :  { %v3356_v15 = vpop.f32.mrf.mxu1 }
 0x371   :  { %v14326_v10 = vadd.f32 %v3356_v15, %v14234_v39  ;;  %v14343_v39 = vld [vmem:[%s15391_s3 + $0x158] sm:$0x3]  ;;  %v5694_v15 = vld [vmem:[#allocation2 + $0x62] sm:$0xff] }
 0x372   :  { %v10868_v31 = vpop.f32.mrf.mxu1  ;;  %11147 = vmatmul.mubr.msk.f32.vlgmr.msra.gmra.mxu1 %vm1403_vm2, %v5692_v14  ;;  %v14348_v14 = vpop.f32.mrf.mxu0 }
 0x373   :  { %v14335_v51 = vadd.f32 %v10868_v31, %v14243_v16  ;;  %11199 = vmatpush3.msk.msra.mxu1 %vm1881_vm3, %v14251_v3  ;;  %11149 = vmatprep.mubr.msk.f32.mxu1 %vm1403_vm2, %v5693_v5  ;;  %15557 = vst [vmem:[#allocation50_spill] sm:$0xff] %v14348_v14  ;;  %v5695_v3 = vld [vmem:[#allocation2 + $0x72] sm:$0xff] }
 0x374   :  { %v3517_v35 = vpop.f32.mrf.mxu1  ;;  %11200 = vmatprep.subr.mxu1 %v9576_v45 }
 0x375   :  { %v14346_v1 = vadd.f32 %v3517_v35, %v14254_v6  ;;  %11201 = vmatpush3.msra.mxu1 %v9576_v45  ;;  %v5696_v35 = vld [vmem:[#allocation2 + $0x82] sm:$0xff]  ;;  %v14360_v45 = vpop.f32.mrf.mxu0 }
 0x376   :  { %v10871_v16 = vpop.f32.mrf.mxu1  ;;  %11150 = vmatmul.mubr.msk.f32.gmra.mxu1 %vm1403_vm2, %v5694_v15  ;;  %11254 = vmatprep.subr.msk.mxu1 %vm1881_vm3, %v14343_v39  ;;  %15558 = vst [vmem:[#allocation51_spill] sm:$0xff] %v14360_v45  ;;  %v5697_v15 = vld [vmem:[#allocation2 + $0x92] sm:$0xff] }
 0x377   :  { %v14354_v31 = vadd.f32 %v10871_v16, %v14262_v22  ;;  %11152 = vmatprep.mubr.msk.f32.mxu1 %vm1403_vm2, %v5695_v3  ;;  %v5698_v3 = vld [vmem:[#allocation2 + $0xa2] sm:$0xff]  ;;  %v14370_v55 = vpop.f32.mrf.mxu0 }
 0x378   :  { %v3527_v5 = vpop.f32.mrf.mxu1  ;;  %15559 = vst [vmem:[#allocation52_spill] sm:$0xff] %v14370_v55 }
 0x379   :  { %v14358_v6 = vadd.f32 %v3527_v5, %v14266_v56  ;;  %v5699_v5 = vld [vmem:[#allocation2 + $0xf2] sm:$0xff] }
 0x37a   :  { %v10874_v14 = vpop.f32.mrf.mxu1  ;;  %11153 = vmatmul.mubr.msk.f32.gmra.mxu1 %vm1403_vm2, %v5696_v35  ;;  %v5700_v35 = vld [vmem:[#allocation2 + $0x102] sm:$0xff] }
 0x37b   :  { %v14364_v42 = vadd.f32 %v10874_v14, %v14272_v53  ;;  %11155 = vmatprep.mubr.msk.f32.mxu1 %vm1403_vm2, %v5697_v15  ;;  %v14380_v15 = vpop.f32.mrf.mxu0 }
 0x37c   :  { %v3537_v22 = vpop.f32.mrf.mxu1  ;;  %15560 = vst [vmem:[#allocation53_spill] sm:$0xff] %v14380_v15 }
 0x37d   :  { %v14368_v16 = vadd.f32 %v3537_v22, %v14276_v47  ;;  %v5701_v22 = vld [vmem:[#allocation2 + $0x112] sm:$0xff] }
 0x37e   :  { %v10877_v56 = vpop.f32.mrf.mxu1  ;;  %11156 = vmatmul.mubr.msk.f32.gmra.mxu1 %vm1403_vm2, %v5698_v3 }
 0x37f   :  { %v14374_v45 = vadd.f32 %v10877_v56, %v14282_v26  ;;  %11158 = vmatprep.mubr.msk.f32.mxu1 %vm1403_vm2, %v5699_v5  ;;  %v5702_v56 = vld [vmem:[#allocation2 + $0x122] sm:$0xff]  ;;  %v14390_v5 = vpop.f32.mrf.mxu0 }
 0x380   :  { %v3547_v53 = vpop.f32.mrf.mxu1  ;;  %15561 = vst [vmem:[#allocation54_spill] sm:$0xff] %v14390_v5 }
 0x381   :  { %v14378_v14 = vadd.f32 %v3547_v53, %v14286_v28  ;;  %v5703_v53 = vld [vmem:[#allocation2 + $0x132] sm:$0xff] }
 0x382   :  { %v10880_v47 = vpop.f32.mrf.mxu1  ;;  %11159 = vmatmul.mubr.msk.f32.gmra.mxu1 %vm1403_vm2, %v5700_v35 }
 0x383   :  { %v14384_v55 = vadd.f32 %v10880_v47, %v14292_v0  ;;  %11161 = vmatprep.mubr.msk.f32.mxu1 %vm1403_vm2, %v5701_v22  ;;  %v5704_v47 = vld [vmem:[#allocation2 + $0x142] sm:$0xff]  ;;  %v14400_v22 = vpop.f32.mrf.mxu0 }
 0x384   :  { %v3557_v26 = vpop.f32.mrf.mxu1 }
 0x385   :  { %v14388_v3 = vadd.f32 %v3557_v26, %v14296_v12  ;;  %v5705_v26 = vld [vmem:[#allocation2 + $0x152] sm:$0xff] }
 0x386   :  { %v10883_v28 = vpop.f32.mrf.mxu1  ;;  %11162 = vmatmul.mubr.msk.f32.gmra.mxu1 %vm1403_vm2, %v5702_v56 }
 0x387   :  { %v14394_v15 = vadd.f32 %v10883_v28, %v14302_v61  ;;  %11164 = vmatprep.mubr.msk.f32.mxu1 %vm1403_vm2, %v5703_v53  ;;  %v5706_v28 = vld [vmem:[#allocation2 + $0x162] sm:$0xff]  ;;  %v14410_v53 = vpop.f32.mrf.mxu0 }
 0x388   :  { %v3567_v0 = vpop.f32.mrf.mxu1 }
 0x389   :  { %v14398_v35 = vadd.f32 %v3567_v0, %v14306_v48 }
 0x38a   :  { %v10886_v12 = vpop.f32.mrf.mxu1  ;;  %11165 = vmatmul.mubr.msk.f32.gmra.mxu1 %vm1403_vm2, %v5704_v47 }
 0x38b   :  { %v14404_v5 = vadd.f32 %v10886_v12, %v14312_v25  ;;  %11167 = vmatprep.mubr.msk.f32.mxu1 %vm1403_vm2, %v5705_v26  ;;  %v14424_v12 = vpop.f32.mrf.mxu0 }
 0x38c   :  { %v3577_v61 = vpop.f32.mrf.mxu1 }
 0x38d   :  { %v14408_v56 = vadd.f32 %v3577_v61, %v14316_v32  ;;  %v9614_v32 = vld [vmem:[%s15391_s3 + $0x150] sm:$0xff] }
 0x38e   :  { %v10889_v48 = vpop.f32.mrf.mxu1  ;;  %11168 = vmatmul.mubr.msk.f32.gmra.mxu1 %vm1403_vm2, %v5706_v28 }
 0x38f   :  { %v14414_v0 = vadd.f32 %v10889_v48, %v14322_v7  ;;  %11202 = vmatprep.mubr.msk.f32.mxu1 %vm1403_vm2, %v13870_v63  ;;  %v14438_v63 = vld [vmem:[%s15391_s3 + $0x178] sm:$0x3] }
 0x390   :  { %v3587_v25 = vpop.f32.mrf.mxu1 }
 0x391   :  { %v14419_v47 = vadd.f32 %v3587_v25, %v14326_v10 }
 0x392   :  { %v10896_v26 = vpop.f32.mrf.mxu1  ;;  %11203 = vmatmul.mubr.msk.f32.vlgmr.msra.gmra.mxu1 %vm1403_vm2, %v13884_v46  ;;  %v14443_v46 = vpop.f32.mrf.mxu0 }
 0x393   :  { %v14429_v7 = vadd.f32 %v10896_v26, %v14335_v51  ;;  %11255 = vmatpush3.msk.msra.mxu1 %vm1881_vm3, %v14343_v39  ;;  %11205 = vmatprep.mubr.msk.f32.mxu1 %vm1403_vm2, %v13890_v19 }
 0x394   :  { %v3748_v10 = vpop.f32.mrf.mxu1  ;;  %11256 = vmatprep.subr.mxu1 %v9614_v32  ;;  %v14457_v28 = vpop.f32.mrf.mxu0 }
 0x395   :  { %v14441_v61 = vadd.f32 %v3748_v10, %v14346_v1  ;;  %11257 = vmatpush3.msra.mxu1 %v9614_v32 }
 0x396   :  { %v10899_v51 = vpop.f32.mrf.mxu1  ;;  %11206 = vmatmul.mubr.msk.f32.gmra.mxu1 %vm1403_vm2, %v13900_v18  ;;  %11310 = vmatprep.subr.msk.mxu1 %vm1881_vm3, %v14438_v63  ;;  %v6159_v18 = vld [vmem:[#allocation2 + $0x94] sm:$0xff]  ;;  %v14468_v26 = vpop.f32.mrf.mxu0 }
 0x397   :  { %v14450_v19 = vadd.f32 %v10899_v51, %v14354_v31  ;;  %11208 = vmatprep.mubr.msk.f32.mxu1 %vm1403_vm2, %v13906_v57  ;;  %v6160_v57 = vld [vmem:[#allocation2 + $0xa4] sm:$0xff] }
 0x398   :  { %v3758_v39 = vpop.f32.mrf.mxu1  ;;  %v14479_v51 = vpop.f32.mrf.mxu0 }
 0x399   :  { %v14455_v1 = vadd.f32 %v3758_v39, %v14358_v6 }
 0x39a   :  { %v10902_v48 = vpop.f32.mrf.mxu1  ;;  %11209 = vmatmul.mubr.msk.f32.gmra.mxu1 %vm1403_vm2, %v13914_v41 }
 0x39b   :  { %v14462_v25 = vadd.f32 %v10902_v48, %v14364_v42  ;;  %11211 = vmatprep.mubr.msk.f32.mxu1 %vm1403_vm2, %v6159_v18 }
 0x39c   :  { %v3768_v31 = vpop.f32.mrf.mxu1 }
 0x39d   :  { %v14466_v32 = vadd.f32 %v3768_v31, %v14368_v16  ;;  %v6167_v31 = vld [vmem:[#allocation2 + $0x154] sm:$0xff] }
 0x39e   :  { %v10905_v6 = vpop.f32.mrf.mxu1  ;;  %11212 = vmatmul.mubr.msk.f32.gmra.mxu1 %vm1403_vm2, %v6160_v57 }
 0x39f   :  { %v14472_v10 = vadd.f32 %v10905_v6, %v14374_v45  ;;  %11214 = vmatprep.mubr.msk.f32.mxu1 %vm1403_vm2, %v13931_v49  ;;  %v14491_v49 = vpop.f32.mrf.mxu0 }
 0x3a0   :  { %v3778_v41 = vpop.f32.mrf.mxu1 }
 0x3a1   :  { %v14477_v42 = vadd.f32 %v3778_v41, %v14378_v14  ;;  %v6615_v41 = vld [vmem:[#allocation2 + $0x41] sm:$0xff] }
 0x3a2   :  { %v10908_v16 = vpop.f32.mrf.mxu1  ;;  %11215 = vmatmul.mubr.msk.f32.gmra.mxu1 %vm1403_vm2, %v13941_v8 }
 0x3a3   :  { %v14484_v39 = vadd.f32 %v10908_v16, %v14384_v55  ;;  %11217 = vmatprep.mubr.msk.f32.mxu1 %vm1403_vm2, %v13947_v20  ;;  %v14503_v20 = vpop.f32.mrf.mxu0 }
 0x3a4   :  { %v3788_v45 = vpop.f32.mrf.mxu1 }
 0x3a5   :  { %v14489_v48 = vadd.f32 %v3788_v45, %v14388_v3  ;;  %v14514_v6 = vpop.f32.mrf.mxu0  ;;  %v6616_v45 = vld [vmem:[#allocation2 + $0x51] sm:$0xff] }
 0x3a6   :  { %v10911_v14 = vpop.f32.mrf.mxu1  ;;  %11218 = vmatmul.mubr.msk.f32.gmra.mxu1 %vm1403_vm2, %v13957_v13 }
 0x3a7   :  { %v14496_v18 = vadd.f32 %v10911_v14, %v14394_v15  ;;  %11220 = vmatprep.mubr.msk.f32.mxu1 %vm1403_vm2, %v13963_v9  ;;  %v6168_v9 = vld [vmem:[#allocation2 + $0x164] sm:$0xff]  ;;  %v14527_v14 = vpop.f32.mrf.mxu0 }
 0x3a8   :  { %v3798_v8 = vpop.f32.mrf.mxu1 }
 0x3a9   :  { %v14501_v55 = vadd.f32 %v3798_v8, %v14398_v35 }
 0x3aa   :  { %v10914_v3 = vpop.f32.mrf.mxu1  ;;  %11221 = vmatmul.mubr.msk.f32.gmra.mxu1 %vm1403_vm2, %v13973_v38 }
 0x3ab   :  { %v14508_v57 = vadd.f32 %v10914_v3, %v14404_v5  ;;  %11223 = vmatprep.mubr.msk.f32.mxu1 %vm1403_vm2, %v6167_v31  ;;  %v6617_v3 = vld [vmem:[#allocation2 + $0x61] sm:$0xff] }
 0x3ac   :  { %v3808_v13 = vpop.f32.mrf.mxu1 }
 0x3ad   :  { %v14512_v15 = vadd.f32 %v3808_v13, %v14408_v56  ;;  %v9652_v56 = vld [vmem:[%s15391_s3 + $0x170] sm:$0xff] }
 0x3ae   :  { %v10917_v35 = vpop.f32.mrf.mxu1  ;;  %11224 = vmatmul.mubr.msk.f32.gmra.mxu1 %vm1403_vm2, %v6168_v9  ;;  %v6618_v13 = vld [vmem:[#allocation2 + $0x71] sm:$0xff]  ;;  %v14537_v9 = vpop.f32.mrf.mxu0 }
 0x3af   :  { %v14518_v16 = vadd.f32 %v10917_v35, %v14414_v0  ;;  %11258 = vmatprep.mubr.msk.f32.mxu1 %vm1403_vm2, %v6615_v41 }
 0x3b0   :  { %v3818_v38 = vpop.f32.mrf.mxu1 }
 0x3b1   :  { %v14522_v5 = vadd.f32 %v3818_v38, %v14419_v47  ;;  %v14546_v38 = vpop.f32.mrf.mxu0 }
 0x3b2   :  { %v10924_v8 = vpop.f32.mrf.mxu1  ;;  %11259 = vmatmul.mubr.msk.f32.vlgmr.msra.gmra.mxu1 %vm1403_vm2, %v6616_v45  ;;  %v6621_v45 = vld [vmem:[#allocation2 + $0xa1] sm:$0xff] }
 0x3b3   :  { %v4059_v0 = vadd.f32 %v10924_v8, %v14429_v7  ;;  %11311 = vmatpush3.msk.msra.mxu1 %vm1881_vm3, %v14438_v63  ;;  %11261 = vmatprep.mubr.msk.f32.mxu1 %vm1403_vm2, %v6617_v3  ;;  %v14555_v3 = vpop.f32.mrf.mxu0 }
 0x3b4   :  { %v3979_v47 = vpop.f32.mrf.mxu1  ;;  %11312 = vmatprep.subr.mxu1 %v9652_v56 }
 0x3b5   :  { %v14535_v31 = vadd.f32 %v3979_v47, %v14441_v61  ;;  %11313 = vmatpush3.msra.mxu1 %v9652_v56 }
 0x3b6   :  { %v10927_v35 = vpop.f32.mrf.mxu1  ;;  %11262 = vmatmul.mubr.msk.f32.gmra.mxu1 %vm1403_vm2, %v6618_v13  ;;  %v14564_v13 = vpop.f32.mrf.mxu0 }
 0x3b7   :  { %v4061_v41 = vadd.f32 %v10927_v35, %v14450_v19  ;;  %11264 = vmatprep.mubr.msk.f32.mxu1 %vm1403_vm2, %v14027_v30  ;;  %v6622_v30 = vld [vmem:[#allocation2 + $0xb1] sm:$0xff] }
 0x3b8   :  { %v3989_v7 = vpop.f32.mrf.mxu1 }
 0x3b9   :  { %v14544_v63 = vadd.f32 %v3989_v7, %v14455_v1 }
 0x3ba   :  { %v10930_v61 = vpop.f32.mrf.mxu1  ;;  %11265 = vmatmul.mubr.msk.f32.gmra.mxu1 %vm1403_vm2, %v14037_v24 }
 0x3bb   :  { %v4063_v56 = vadd.f32 %v10930_v61, %v14462_v25  ;;  %11267 = vmatprep.mubr.msk.f32.mxu1 %vm1403_vm2, %v6621_v45 }
 0x3bc   :  { %v3999_v8 = vpop.f32.mrf.mxu1 }
 0x3bd   :  { %v14553_v19 = vadd.f32 %v3999_v8, %v14466_v32 }
 0x3be   :  { %v10933_v1 = vpop.f32.mrf.mxu1  ;;  %11268 = vmatmul.mubr.msk.f32.gmra.mxu1 %vm1403_vm2, %v6622_v30 }
 0x3bf   :  { %v4065_v47 = vadd.f32 %v10933_v1, %v14472_v10  ;;  %11270 = vmatprep.mubr.msk.f32.mxu1 %vm1403_vm2, %v14053_v52  ;;  %v14574_v52 = vpop.f32.mrf.mxu0 }
 0x3c0   :  { %v4009_v24 = vpop.f32.mrf.mxu1 }
 0x3c1   :  { %v14562_v25 = vadd.f32 %v4009_v24, %v14477_v42  ;;  %v4290_v24 = vadd.f32 %v13606_v43, %v4059_v0 }
 0x3c2   :  { %v10936_v35 = vpop.f32.mrf.mxu1  ;;  %11271 = vmatmul.mubr.msk.f32.gmra.mxu1 %vm1403_vm2, %v14063_v60 }
 0x3c3   :  { %v4067_v32 = vadd.f32 %v10936_v35, %v14484_v39  ;;  %11273 = vmatprep.mubr.msk.f32.mxu1 %vm1403_vm2, %v14069_v36  ;;  %v14584_v36 = vpop.f32.mrf.mxu0 }
 0x3c4   :  { %v4019_v7 = vpop.f32.mrf.mxu1 }
 0x3c5   :  { %v14572_v10 = vadd.f32 %v4019_v7, %v14489_v48  ;;  %v6629_v48 = vld [vmem:[#allocation2 + $0x161] sm:$0xff]  ;;  %v14593_v30 = vpop.f32.mrf.mxu0 }
 0x3c6   :  { %v10939_v61 = vpop.f32.mrf.mxu1  ;;  %11274 = vmatmul.mubr.msk.f32.gmra.mxu1 %vm1403_vm2, %v14079_v11 }
 0x3c7   :  { %v4069_v42 = vadd.f32 %v10939_v61, %v14496_v18  ;;  %11276 = vmatprep.mubr.msk.f32.mxu1 %vm1403_vm2, %v14085_v62  ;;  %v6630_v62 = vld [vmem:[#allocation2 + $0x171] sm:$0xff]  ;;  %v14603_v35 = vpop.f32.mrf.mxu0 }
 0x3c8   :  { %v4029_v60 = vpop.f32.mrf.mxu1  ;;  %v15562_v61 = vld [vmem:[#allocation24_spill] sm:$0xff] }
 0x3c9   :  { %v14582_v39 = vadd.f32 %v4029_v60, %v14501_v55  ;;  %v14612_v60 = vpop.f32.mrf.mxu0 }
 0x3ca   :  { %v10942_v45 = vpop.f32.mrf.mxu1  ;;  %11277 = vmatmul.mubr.msk.f32.gmra.mxu1 %vm1403_vm2, %v14095_v40  ;;  %15563 = vst [vmem:[#allocation24_spill] sm:$0xff] %v14612_v60 }
 0x3cb   :  { %v4071_v8 = vadd.f32 %v10942_v45, %v14508_v57  ;;  %11279 = vmatprep.mubr.msk.f32.mxu1 %vm1403_vm2, %v6629_v48  ;;  %v14619_v48 = vpop.f32.mrf.mxu0 }
 0x3cc   :  { %v4039_v11 = vpop.f32.mrf.mxu1 }
 0x3cd   :  { %v14591_v18 = vadd.f32 %v4039_v11, %v14512_v15 }
 0x3ce   :  { %v10945_v55 = vpop.f32.mrf.mxu1  ;;  %11280 = vmatmul.mubr.msk.f32.gmra.mxu1 %vm1403_vm2, %v6630_v62 }
 0x3cf   :  { %v4073_v1 = vadd.f32 %v10945_v55, %v14518_v16  ;;  %11314 = vmatprep.mubr.msk.f32.mxu1 %vm1403_vm2, %v14114_v17  ;;  %v4292_v17 = vadd.f32 %v15562_v61, %v4061_v41  ;;  %v7083_v41 = vld [vmem:[#allocation2 + $0xa3] sm:$0xff]  ;;  %v7084_v55 = vld [vmem:[#allocation2 + $0xb3] sm:$0xff] }
 0x3d0   :  { %v4049_v40 = vpop.f32.mrf.mxu1 }
 0x3d1   :  { %v14600_v57 = vadd.f32 %v4049_v40, %v14522_v5  ;;  %v14625_v40 = vpop.f32.mrf.mxu0 }
 0x3d2   :  { %v10980_v15 = vpop.f32.mrf.mxu1  ;;  %11315 = vmatmul.mubr.msk.f32.vlgmr.msra.gmra.mxu1 %vm1403_vm2, %v14131_v27  ;;  %v15564_v27 = vld [vmem:[#allocation25_spill] sm:$0xff] }
 0x3d3   :  { %v4521_v7 = vadd.f32 %v10980_v15, %v4290_v24  ;;  %11317 = vmatprep.mubr.msk.f32.mxu1 %vm1403_vm2, %v14137_v50  ;;  %v4294_v45 = vadd.f32 %v15564_v27, %v4063_v56  ;;  %15565 = vst [vmem:[#allocation25_spill] sm:$0xff] %v14619_v48  ;;  %v14631_v15 = vpop.f32.mrf.mxu0  ;;  %v15573_v48 = vld [vmem:[#allocation20_spill] sm:$0xff] }
 0x3d4   :  { %v14609_v16 = vpop.f32.mrf.mxu1 }
 0x3d6   :  { %v10983_v5 = vpop.f32.mrf.mxu1  ;;  %11318 = vmatmul.mubr.msk.f32.gmra.mxu1 %vm1403_vm2, %v14149_v33  ;;  %v4296_v33 = vadd.f32 %v13681_v2, %v4065_v47 }
 0x3d7   :  { %v4523_v43 = vadd.f32 %v10983_v5, %v4292_v17  ;;  %11320 = vmatprep.mubr.msk.f32.mxu1 %vm1403_vm2, %v14155_v4  ;;  %v4300_v17 = vadd.f32 %v13732_v37, %v4069_v42  ;;  %v14638_v5 = vpop.f32.mrf.mxu0  ;;  %v7091_v37 = vld [vmem:[#allocation2 + $0x163] sm:$0xff] }
 0x3d8   :  { %v4451_v0 = vpop.f32.mrf.mxu1 }
 0x3da   :  { %v10986_v50 = vpop.f32.mrf.mxu1  ;;  %11321 = vmatmul.mubr.msk.f32.gmra.mxu1 %vm1403_vm2, %v14165_v21  ;;  %v4298_v21 = vadd.f32 %v13706_v58, %v4067_v32  ;;  %v14645_v32 = vpop.f32.mrf.mxu0 }
 0x3db   :  { %v4525_v11 = vadd.f32 %v10986_v50, %v4294_v45  ;;  %11323 = vmatprep.mubr.msk.f32.mxu1 %vm1403_vm2, %v7083_v41 }
 0x3dc   :  { %v4461_v62 = vpop.f32.mrf.mxu1 }
 0x3de   :  { %v10989_v4 = vpop.f32.mrf.mxu1  ;;  %11324 = vmatmul.mubr.msk.f32.gmra.mxu1 %vm1403_vm2, %v7084_v55  ;;  %v14653_v55 = vpop.f32.mrf.mxu0 }
 0x3df   :  { %v4527_v56 = vadd.f32 %v10989_v4, %v4296_v33  ;;  %11326 = vmatprep.mubr.msk.f32.mxu1 %vm1403_vm2, %v14181_v59  ;;  %v7092_v33 = vld [vmem:[#allocation2 + $0x173] sm:$0xff]  ;;  %v15569_v4 = vld [vmem:[#allocation14_spill] sm:$0xff] }
 0x3e0   :  { %v4471_v24 = vpop.f32.mrf.mxu1 }
 0x3e2   :  { %v10992_v61 = vpop.f32.mrf.mxu1  ;;  %11327 = vmatmul.mubr.msk.f32.gmra.mxu1 %vm1403_vm2, %v14191_v54  ;;  %v4302_v54 = vadd.f32 %v13762_v44, %v4071_v8 }
 0x3e3   :  { %v4529_v2 = vadd.f32 %v10992_v61, %v4298_v21  ;;  %11329 = vmatprep.mubr.msk.f32.mxu1 %vm1403_vm2, %v14197_v29  ;;  %v15566_v29 = vld [vmem:[#allocation39_spill] sm:$0xff]  ;;  %v4291_v21 = vadd.f32 %v15569_v4, %v14544_v63  ;;  %v15570_v61 = vld [vmem:[#allocation9_spill] sm:$0xff]  ;;  %v15574_v63 = vld [vmem:[#allocation6_spill] sm:$0xff] }
 0x3e4   :  { %v4481_v47 = vpop.f32.mrf.mxu1  ;;  %15568 = vst [vmem:[#allocation39_spill] sm:$0xff] %v14653_v55 }
 0x3e6   :  { %v10995_v27 = vpop.f32.mrf.mxu1  ;;  %11330 = vmatmul.mubr.msk.f32.gmra.mxu1 %vm1403_vm2, %v14207_v34  ;;  %v15567_v34 = vld [vmem:[#allocation26_spill] sm:$0xff] }
 0x3e7   :  { %v4531_v58 = vadd.f32 %v10995_v27, %v4300_v17  ;;  %11332 = vmatprep.mubr.msk.f32.mxu1 %vm1403_vm2, %v14213_v23  ;;  %v4304_v41 = vadd.f32 %v15567_v34, %v4073_v1  ;;  %v4752_v17 = vadd.f32 %v15570_v61, %v4521_v7  ;;  %v14661_v27 = vpop.f32.mrf.mxu0  ;;  %v15575_v61 = vld [vmem:[#allocation27_spill] sm:$0xff] }
 0x3e8   :  { %v4491_v59 = vpop.f32.mrf.mxu1  ;;  %15571 = vst [vmem:[#allocation26_spill] sm:$0xff] %v14661_v27 }
 0x3ea   :  { %v10998_v45 = vpop.f32.mrf.mxu1  ;;  %11333 = vmatmul.mubr.msk.f32.gmra.mxu1 %vm1403_vm2, %v15566_v29 }
 0x3eb   :  { %v14649_v42 = vadd.f32 %v10998_v45, %v4302_v54  ;;  %11335 = vmatprep.mubr.msk.f32.mxu1 %vm1403_vm2, %v7091_v37  ;;  %v4522_v45 = vadd.f32 %v4451_v0, %v4291_v21  ;;  %v15572_v37 = vld [vmem:[#allocation15_spill] sm:$0xff]  ;;  %v4295_v0 = vadd.f32 %v15575_v61, %v14562_v25 }
 0x3ec   :  { %v4501_v50 = vpop.f32.mrf.mxu1  ;;  %v4293_v34 = vadd.f32 %v15572_v37, %v14553_v19  ;;  %v15577_v37 = vld [vmem:[#allocation21_spill] sm:$0xff] }
 0x3ed   :  { %v4753_v7 = vadd.f32 %v15574_v63, %v4522_v45  ;;  %v15579_v63 = vld [vmem:[#allocation10_spill] sm:$0xff] }
 0x3ee   :  { %v11001_v23 = vpop.f32.mrf.mxu1  ;;  %11336 = vmatmul.mubr.msk.f32.gmra.mxu1 %vm1403_vm2, %v7092_v33  ;;  %v4754_v33 = vadd.f32 %v15573_v48, %v4523_v43  ;;  %v4524_v60 = vadd.f32 %v4461_v62, %v4293_v34  ;;  %v4526_v43 = vadd.f32 %v4471_v24, %v4295_v0  ;;  %v4758_v25 = vadd.f32 %v15579_v63, %v4527_v56  ;;  %v15584_v63 = vld [vmem:[#allocation12_spill] sm:$0xff] }
 0x3ef   :  { %v14656_v44 = vadd.f32 %v11001_v23, %v4304_v41  ;;  %v14668_v41 = vpop.f32.mrf.mxu0 }
 0x3f0   :  { %v4511_v8 = vpop.f32.mrf.mxu1  ;;  %v4755_v62 = vadd.f32 %v15577_v37, %v4524_v60  ;;  %v15583_v37 = vld [vmem:[#allocation11_spill] sm:$0xff] }
 0x3f1   :  { %v14678_v27 = vpop.f32.mrf.mxu0 }
 0x3f2   :  { %v11036_v54 = vpop.f32.mrf.mxu1 }
 0x3f3   :  { %v14663_v29 = vadd.f32 %v11036_v54, %v4752_v17  ;;  %v15576_v17 = vld [vmem:[#allocation17_spill] sm:$0xff] }
 0x3f4   :  { %v4903_v1 = vpop.f32.mrf.mxu1  ;;  %v4756_v54 = vadd.f32 %v15576_v17, %v4525_v11  ;;  %v15581_v17 = vld [vmem:[#allocation22_spill] sm:$0xff] }
 0x3f5   :  { %v4757_v24 = vadd.f32 %v15581_v17, %v4526_v43 }
 0x3f6   :  { %v11039_v23 = vpop.f32.mrf.mxu1 }
 0x3f7   :  { %v14670_v55 = vadd.f32 %v11039_v23, %v4754_v33  ;;  %v15578_v33 = vld [vmem:[#allocation18_spill] sm:$0xff] }
 0x3f8   :  { %v4913_v4 = vpop.f32.mrf.mxu1  ;;  %v4297_v45 = vadd.f32 %v15578_v33, %v14572_v10  ;;  %v4760_v10 = vadd.f32 %v15583_v37, %v4529_v2  ;;  %v15587_v2 = vld [vmem:[#allocation13_spill] sm:$0xff] }
 0x3f9   :  { %v14675_v21 = vadd.f32 %v4913_v4, %v4753_v7  ;;  %v14688_v7 = vpop.f32.mrf.mxu0 }
 0x3fa   :  { %v11042_v19 = vpop.f32.mrf.mxu1  ;;  %15580 = vst [vmem:[#allocation14_spill] sm:$0xff] %v14688_v7  ;;  %v4528_v11 = vadd.f32 %v4481_v47, %v4297_v45  ;;  %v15585_v45 = vld [vmem:[#allocation8_spill] sm:$0xff] }
 0x3fb   :  { %v14680_v48 = vadd.f32 %v11042_v19, %v4756_v54  ;;  %v15582_v54 = vld [vmem:[#allocation7_spill] sm:$0xff] }
 0x3fc   :  { %v4923_v34 = vpop.f32.mrf.mxu1  ;;  %v4299_v60 = vadd.f32 %v15582_v54, %v14582_v39  ;;  %v4759_v7 = vadd.f32 %v15584_v63, %v4528_v11 }
 0x3fd   :  { %v14685_v23 = vadd.f32 %v4923_v34, %v4755_v62  ;;  %v14698_v62 = vpop.f32.mrf.mxu0 }
 0x3fe   :  { %v11045_v4 = vpop.f32.mrf.mxu1  ;;  %v4530_v56 = vadd.f32 %v4491_v59, %v4299_v60  ;;  %v15588_v59 = vld [vmem:[#allocation28_spill] sm:$0xff] }
 0x3ff   :  { %v14690_v61 = vadd.f32 %v11045_v4, %v4758_v25  ;;  %v4301_v25 = vadd.f32 %v15585_v45, %v14591_v18  ;;  %v15586_v4 = vld [vmem:[#allocation23_spill] sm:$0xff]  ;;  %v14706_v39 = vpop.f32.mrf.mxu0  ;;  %v15589_v18 = vld [vmem:[#allocation16_spill] sm:$0xff] }
 0x400   :  { %v4933_v0 = vpop.f32.mrf.mxu1  ;;  %v4762_v17 = vadd.f32 %v15586_v4, %v4531_v58  ;;  %v4761_v60 = vadd.f32 %v15588_v59, %v4530_v56  ;;  %v15590_v58 = vld [vmem:[#allocation29_spill] sm:$0xff] }
 0x401   :  { %v14695_v19 = vadd.f32 %v4933_v0, %v4757_v24  ;;  %v4289_v0 = vadd.f32 %v15587_v2, %v14535_v31  ;;  %v4532_v54 = vadd.f32 %v4501_v50, %v4301_v25  ;;  %v4764_v63 = vadd.f32 %v15590_v58, %v14649_v42  ;;  %v15591_v25 = vld [vmem:[#allocation30_spill] sm:$0xff] }
 0x402   :  { %v11048_v34 = vpop.f32.mrf.mxu1 }
 0x403   :  { %v4991_v33 = vadd.f32 %v11048_v34, %v4760_v10  ;;  %v4520_v10 = vadd.f32 %v14609_v16, %v4289_v0  ;;  %v4763_v4 = vadd.f32 %v15591_v25, %v4532_v54  ;;  %v15595_v54 = vld [vmem:[#allocation33_spill] sm:$0xff] }
 0x404   :  { %v4943_v47 = vpop.f32.mrf.mxu1  ;;  %v5214_v58 = vadd.f32 %v15595_v54, %v14663_v29  ;;  %v15598_v29 = vld [vmem:[#allocation36_spill] sm:$0xff] }
 0x405   :  { %v14703_v43 = vadd.f32 %v4943_v47, %v4759_v7  ;;  %v4303_v7 = vadd.f32 %v15589_v18, %v14600_v57  ;;  %v14720_v47 = vpop.f32.mrf.mxu0  ;;  %v15593_v57 = vld [vmem:[#allocation31_spill] sm:$0xff] }
 0x406   :  { %v11051_v24 = vpop.f32.mrf.mxu1  ;;  %v4766_v2 = vadd.f32 %v15593_v57, %v14656_v44  ;;  %v15596_v44 = vld [vmem:[#allocation34_spill] sm:$0xff] }
 0x407   :  { %v14710_v37 = vadd.f32 %v11051_v24, %v4762_v17  ;;  %v4534_v31 = vadd.f32 %v4511_v8, %v4303_v7  ;;  %v15592_v17 = vld [vmem:[#allocation19_spill] sm:$0xff]  ;;  %v14730_v0 = vpop.f32.mrf.mxu0 }
 0x408   :  { %v4953_v11 = vpop.f32.mrf.mxu1  ;;  %v4751_v24 = vadd.f32 %v15592_v17, %v4520_v10 }
 0x409   :  { %v14716_v34 = vadd.f32 %v4953_v11, %v4761_v60  ;;  %v15594_v11 = vld [vmem:[#allocation32_spill] sm:$0xff]  ;;  %v14739_v10 = vpop.f32.mrf.mxu0 }
 0x40a   :  { %v11054_v45 = vpop.f32.mrf.mxu1  ;;  %v4982_v42 = vadd.f32 %v4903_v1, %v4751_v24  ;;  %v4765_v8 = vadd.f32 %v15594_v11, %v4534_v31  ;;  %v15597_v1 = vld [vmem:[#allocation35_spill] sm:$0xff] }
 0x40b   :  { %v14722_v50 = vadd.f32 %v11054_v45, %v4764_v63  ;;  %v5216_v17 = vadd.f32 %v15597_v1, %v14670_v55  ;;  %v14748_v31 = vpop.f32.mrf.mxu0  ;;  %v15600_v55 = vld [vmem:[#allocation38_spill] sm:$0xff] }
 0x40c   :  { %v4963_v56 = vpop.f32.mrf.mxu1  ;;  %v5213_v25 = vadd.f32 %v15596_v44, %v4982_v42 }
 0x40d   :  { %v14726_v16 = vadd.f32 %v4963_v56, %v4763_v4 }
 0x40e   :  { %v11057_v59 = vpop.f32.mrf.mxu1 }
 0x40f   :  { %v14732_v60 = vadd.f32 %v11057_v59, %v4766_v2  ;;  %v5215_v2 = vadd.f32 %v15598_v29, %v14675_v21 }
 0x410   :  { %v4973_v18 = vpop.f32.mrf.mxu1 }
 0x411   :  { %v14735_v7 = vadd.f32 %v4973_v18, %v4765_v8  ;;  %v15599_v8 = vld [vmem:[#allocation37_spill] sm:$0xff]  ;;  %v14758_v18 = vpop.f32.mrf.mxu0 }
 0x412   :  { %v11092_v63 = vpop.f32.mrf.mxu1  ;;  %v5218_v42 = vadd.f32 %v15599_v8, %v14680_v48  ;;  %v15603_v48 = vld [vmem:[#allocation41_spill] sm:$0xff]  ;;  %v15604_v8 = vld [vmem:[#allocation42_spill] sm:$0xff] }
 0x413   :  { %v14741_v45 = vadd.f32 %v11092_v63, %v5214_v58  ;;  %v5217_v63 = vadd.f32 %v15600_v55, %v14685_v23  ;;  %v14768_v1 = vpop.f32.mrf.mxu0  ;;  %v5219_v29 = vadd.f32 %v15603_v48, %v14695_v19  ;;  %v9693_v23 = vld [vmem:[%s15393_s5 + $0x28] sm:$0xf]  ;;  %v15416_v55 = vmov 0.0   ;;  %v7576_v48 = vld [vmem:[%s15393_s5 + $0x10] sm:$0xf] }
 0x414   :  { %v5365_v4 = vpop.f32.mrf.mxu1  ;;  %15602 = vst [vmem:[#allocation9_spill] sm:$0xff] %v14768_v1  ;;  %11366 = vmatprep.subr.mxu1 %v15416_v55  ;;  %11375 = vmatprep.subr.mxu0 %v15416_v55  ;;  %v15606_v19 = vld [vmem:[#allocation43_spill] sm:$0xff]  ;;  %v15619_v1 = vld [vmem:[#allocation53_spill] sm:$0xff] }
 0x415   :  { %v14744_v56 = vadd.f32 %v5365_v4, %v5213_v25  ;;  %v15601_v4 = vld [vmem:[#allocation40_spill] sm:$0xff]  ;;  %11367 = vmatpush3.msk.msra.mxu1 %vm7590_vm6, %v9693_v23  ;;  %11376 = vmatpush3.msk.msra.mxu0 %vm7590_vm6, %v7576_v48  ;;  %v15612_v48 = vld [vmem:[#allocation47_spill] sm:$0xff] }
 0x416   :  { %v11095_v24 = vpop.f32.mrf.mxu1  ;;  %v5220_v21 = vadd.f32 %v15601_v4, %v14690_v61  ;;  %11368 = vmatprep.subr.mxu1 %v15416_v55  ;;  %11377 = vmatprep.subr.mxu0 %v15416_v55 }
 0x417   :  { %v14750_v57 = vadd.f32 %v11095_v24, %v5216_v17 }
 0x418   :  { %v5375_v59 = vpop.f32.mrf.mxu1 }
 0x419   :  { %v14754_v11 = vadd.f32 %v5375_v59, %v5215_v2 }
 0x41a   :  { %v11098_v54 = vpop.f32.mrf.mxu1 }
 0x41b   :  { %v14760_v58 = vadd.f32 %v11098_v54, %v5218_v42  ;;  %v5222_v42 = vadd.f32 %v15604_v8, %v4991_v33  ;;  %v14780_v54 = vpop.f32.mrf.mxu0  ;;  %v15609_v8 = vld [vmem:[#allocation45_spill] sm:$0xff] }
 0x41c   :  { %v5385_v44 = vpop.f32.mrf.mxu1  ;;  %15605 = vst [vmem:[#allocation15_spill] sm:$0xff] %v14780_v54 }
 0x41d   :  { %v14764_v25 = vadd.f32 %v5385_v44, %v5217_v63  ;;  %v5221_v44 = vadd.f32 %v15606_v19, %v14703_v43 }
 0x41e   :  { %v11101_v17 = vpop.f32.mrf.mxu1 }
 0x41f   :  { %v14770_v24 = vadd.f32 %v11101_v17, %v5220_v21  ;;  %v15607_v21 = vld [vmem:[#allocation44_spill] sm:$0xff] }
 0x420   :  { %v5395_v2 = vpop.f32.mrf.mxu1  ;;  %v5224_v17 = vadd.f32 %v15607_v21, %v14710_v37  ;;  %v15610_v37 = vld [vmem:[#allocation46_spill] sm:$0xff] }
 0x421   :  { %v14774_v59 = vadd.f32 %v5395_v2, %v5219_v29  ;;  %v14797_v29 = vpop.f32.mrf.mxu0  ;;  %v5226_v19 = vadd.f32 %v15610_v37, %v14722_v50  ;;  %v7575_v50 = vld [vmem:[%s15393_s5 + $0x8] sm:$0xff] }
 0x422   :  { %v11104_v61 = vpop.f32.mrf.mxu1  ;;  %15608 = vst [vmem:[#allocation20_spill] sm:$0xff] %v14797_v29  ;;  %11378 = vmatpush3.msra.mxu0 %v7575_v50 }
 0x423   :  { %v14784_v63 = vadd.f32 %v11104_v61, %v5222_v42  ;;  %v5223_v42 = vadd.f32 %v15609_v8, %v14716_v34  ;;  %v15613_v34 = vld [vmem:[#allocation48_spill] sm:$0xff]  ;;  %11379 = vmatprep.subr.mxu0 %v15416_v55 }
 0x424   :  { %v5405_v33 = vpop.f32.mrf.mxu1  ;;  %v5228_v8 = vadd.f32 %v15613_v34, %v14732_v60 }
 0x425   :  { %v14790_v4 = vadd.f32 %v5405_v33, %v5221_v44  ;;  %v14809_v44 = vpop.f32.mrf.mxu0 }
 0x426   :  { %v11107_v2 = vpop.f32.mrf.mxu1  ;;  %15611 = vst [vmem:[#allocation6_spill] sm:$0xff] %v14809_v44 }
 0x427   :  { %v14800_v43 = vadd.f32 %v11107_v2, %v5224_v17  ;;  %v5225_v17 = vadd.f32 %v15612_v48, %v14726_v16 }
 0x428   :  { %v5415_v23 = vpop.f32.mrf.mxu1 }
 0x429   :  { %v14805_v61 = vadd.f32 %v5415_v23, %v5223_v42  ;;  %v9692_v42 = vld [vmem:[%s15393_s5 + $0x20] sm:$0xff]  ;;  %v14825_v23 = vpop.f32.mrf.mxu0 }
 0x42a   :  { %v11110_v33 = vpop.f32.mrf.mxu1  ;;  %11369 = vmatpush3.msra.mxu1 %v9692_v42 }
 0x42b   :  { %v14811_v21 = vadd.f32 %v11110_v33, %v5226_v19  ;;  %v15614_v19 = vld [vmem:[#allocation49_spill] sm:$0xff]  ;;  %11370 = vmatprep.subr.mxu1 %v15416_v55  ;;  %v14837_v34 = vpop.f32.mrf.mxu0 }
 0x42c   :  { %v5425_v2 = vpop.f32.mrf.mxu1  ;;  %v5227_v33 = vadd.f32 %v15614_v19, %v14735_v7  ;;  %15616 = vst [vmem:[#allocation27_spill] sm:$0xff] %v14837_v34  ;;  %v15618_v7 = vld [vmem:[#allocation52_spill] sm:$0xff] }
 0x42d   :  { %v14815_v29 = vadd.f32 %v5425_v2, %v5225_v17  ;;  %v15615_v17 = vld [vmem:[#allocation50_spill] sm:$0xff]  ;;  %v5678_v19 = vadd.f32 %v15618_v7, %v14750_v57  ;;  %v14845_v55 = vpop.f32.mrf.mxu0 }
 0x42e   :  { %v11113_v37 = vpop.f32.mrf.mxu1  ;;  %v5676_v2 = vadd.f32 %v15615_v17, %v14741_v45  ;;  %v5677_v45 = vadd.f32 %v15619_v1, %v14754_v11  ;;  %v7574_v57 = vld [vmem:[%s15393_s5] sm:$0xff]  ;;  %v5679_v1 = vadd.f32 %v14400_v22, %v14764_v25  ;;  %v5681_v25 = vadd.f32 %v14424_v12, %v14774_v59 }
 0x42f   :  { %v14827_v16 = vadd.f32 %v11113_v37, %v5228_v8  ;;  %v15617_v8 = vld [vmem:[#allocation51_spill] sm:$0xff]  ;;  %11380 = vmatpush3.msra.mxu0 %v7574_v57  ;;  %v5683_v57 = vadd.f32 %v14457_v28, %v14790_v4 }
 0x430   :  { %v5435_v60 = vpop.f32.mrf.mxu1  ;;  %v5675_v50 = vadd.f32 %v15617_v8, %v14744_v56  ;;  %v9691_v56 = vld [vmem:[%s15393_s5 + $0x18] sm:$0xff]  ;;  %v14859_v8 = vpop.f32.mrf.mxu0 }
 0x431   :  { %v14833_v48 = vadd.f32 %v5435_v60, %v5227_v33  ;;  %11371 = vmatpush3.msra.mxu1 %v9691_v56 }
 0x432   :  { %v11148_v44 = vpop.f32.mrf.mxu1 }
 0x433   :  { %v5907_v42 = vadd.f32 %v11148_v44, %v5676_v2  ;;  %v15620_v44 = vld [vmem:[#allocation54_spill] sm:$0xff] }
 0x434   :  { %v5827_v37 = vpop.f32.mrf.mxu1  ;;  %v5680_v2 = vadd.f32 %v15620_v44, %v14760_v58 }
 0x435   :  { %v14841_v54 = vadd.f32 %v5827_v37, %v5675_v50  ;;  %v15621_v37 = vmov 0.0  }
 0x436   :  { %v11151_v33 = vpop.f32.mrf.mxu1  ;;  %11384 = vmatprep.subr.mxu1 %v15621_v37  ;;  %11393 = vmatprep.subr.mxu0 %v15621_v37 }
 0x437   :  { %v5909_v60 = vadd.f32 %v11151_v33, %v5678_v19  ;;  %v5682_v19 = vadd.f32 %v14410_v53, %v14770_v24  ;;  %v14867_v33 = vpop.f32.mrf.mxu0  ;;  %11372 = vmatprep.mubr.msk.f32.mxu1 %vm11562_vm7, %v15621_v37  ;;  %11381 = vmatprep.mubr.msk.f32.mxu0 %vm11562_vm7, %v15621_v37 }
 0x438   :  { %v5837_v17 = vpop.f32.mrf.mxu1 }
 0x439   :  { %v14849_v34 = vadd.f32 %v5837_v17, %v5677_v45  ;;  %v14877_v53 = vpop.f32.mrf.mxu0 }
 0x43a   :  { %v11154_v50 = vpop.f32.mrf.mxu1 }
 0x43b   :  { %v5911_v11 = vadd.f32 %v11154_v50, %v5680_v2  ;;  %v5684_v2 = vadd.f32 %v14443_v46, %v14784_v63  ;;  %v14887_v12 = vpop.f32.mrf.mxu0  ;;  %v5685_v46 = vadd.f32 %v14479_v51, %v14805_v61 }
 0x43c   :  { %v5847_v58 = vpop.f32.mrf.mxu1 }
 0x43d   :  { %v5910_v7 = vadd.f32 %v5847_v58, %v5679_v1  ;;  %v5686_v58 = vadd.f32 %v14468_v26, %v14800_v43 }
 0x43e   :  { %v11157_v45 = vpop.f32.mrf.mxu1 }
 0x43f   :  { %v5913_v22 = vadd.f32 %v11157_v45, %v5682_v19 }
 0x440   :  { %v5857_v17 = vpop.f32.mrf.mxu1 }
 0x441   :  { %v5912_v44 = vadd.f32 %v5857_v17, %v5681_v25  ;;  %v5688_v25 = vadd.f32 %v14491_v49, %v14811_v21  ;;  %v14893_v17 = vpop.f32.mrf.mxu0 }
 0x442   :  { %v11160_v24 = vpop.f32.mrf.mxu1 }
 0x443   :  { %v14879_v56 = vadd.f32 %v11160_v24, %v5684_v2  ;;  %v5687_v2 = vadd.f32 %v14503_v20, %v14815_v29  ;;  %v5690_v24 = vadd.f32 %v14514_v6, %v14827_v16  ;;  %v6137_v29 = vadd.f32 %v14546_v38, %v14841_v54 }
 0x444   :  { %v5867_v50 = vpop.f32.mrf.mxu1 }
 0x445   :  { %v14883_v1 = vadd.f32 %v5867_v50, %v5683_v57  ;;  %v14899_v57 = vpop.f32.mrf.mxu0  ;;  %v5689_v50 = vadd.f32 %v14527_v14, %v14833_v48 }
 0x446   :  { %v11163_v59 = vpop.f32.mrf.mxu1 }
 0x447   :  { %v5917_v19 = vadd.f32 %v11163_v59, %v5686_v58  ;;  %v6138_v58 = vadd.f32 %v14537_v9, %v5907_v42  ;;  %v14904_v59 = vpop.f32.mrf.mxu0  ;;  %v6139_v9 = vadd.f32 %v14564_v13, %v14849_v34  ;;  %v6143_v13 = vadd.f32 %v14603_v35, %v5912_v44 }
 0x448   :  { %v5877_v63 = vpop.f32.mrf.mxu1 }
 0x449   :  { %v5916_v45 = vadd.f32 %v5877_v63, %v5685_v46  ;;  %v6140_v63 = vadd.f32 %v14555_v3, %v5909_v60 }
 0x44a   :  { %v11166_v28 = vpop.f32.mrf.mxu1 }
 0x44b   :  { %v5919_v4 = vadd.f32 %v11166_v28, %v5688_v25  ;;  %v14913_v25 = vpop.f32.mrf.mxu0 }
 0x44c   :  { %v5887_v26 = vpop.f32.mrf.mxu1 }
 0x44d   :  { %v5918_v43 = vadd.f32 %v5887_v26, %v5687_v2  ;;  %v6142_v2 = vadd.f32 %v14574_v52, %v5911_v11  ;;  %v14922_v26 = vpop.f32.mrf.mxu0  ;;  %v6150_v35 = vadd.f32 %v14638_v5, %v5919_v4 }
 0x44e   :  { %v11169_v51 = vpop.f32.mrf.mxu1 }
 0x44f   :  { %v5921_v61 = vadd.f32 %v11169_v51, %v5690_v24  ;;  %v6141_v24 = vadd.f32 %v14584_v36, %v5910_v7  ;;  %v6144_v51 = vadd.f32 %v14593_v30, %v5913_v22  ;;  %v6148_v36 = vadd.f32 %v14625_v40, %v5917_v19 }
 0x450   :  { %v5897_v49 = vpop.f32.mrf.mxu1  ;;  %v6147_v22 = vadd.f32 %v14631_v15, %v5916_v45  ;;  %v15626_v45 = vld [vmem:[#allocation26_spill] sm:$0xff] }
 0x451   :  { %v5920_v21 = vadd.f32 %v5897_v49, %v5689_v50  ;;  %v14926_v50 = vpop.f32.mrf.mxu0 }
 0x452   :  { %v11204_v46 = vpop.f32.mrf.mxu1 }
 0x453   :  { %v14906_v20 = vadd.f32 %v11204_v46, %v6138_v58 }
 0x454   :  { %v6289_v6 = vpop.f32.mrf.mxu1 }
 0x455   :  { %v14910_v16 = vadd.f32 %v6289_v6, %v6137_v29  ;;  %v14929_v29 = vpop.f32.mrf.mxu0 }
 0x456   :  { %v11207_v14 = vpop.f32.mrf.mxu1  ;;  %15622 = vst [vmem:[#allocation17_spill] sm:$0xff] %v14929_v29 }
 0x457   :  { %v14915_v48 = vadd.f32 %v11207_v14, %v6140_v63  ;;  %v14936_v7 = vpop.f32.mrf.mxu0 }
 0x458   :  { %v6299_v42 = vpop.f32.mrf.mxu1  ;;  %15623 = vst [vmem:[#allocation21_spill] sm:$0xff] %v14936_v7 }
 0x459   :  { %v14919_v28 = vadd.f32 %v6299_v42, %v6139_v9  ;;  %v14944_v44 = vpop.f32.mrf.mxu0 }
 0x45a   :  { %v11210_v38 = vpop.f32.mrf.mxu1  ;;  %15624 = vst [vmem:[#allocation18_spill] sm:$0xff] %v14944_v44 }
 0x45b   :  { %v6373_v54 = vadd.f32 %v11210_v38, %v6142_v2  ;;  %v6149_v2 = vadd.f32 %v14645_v32, %v5918_v43  ;;  %v15625_v38 = vld [vmem:[#allocation39_spill] sm:$0xff] }
 0x45c   :  { %v6309_v3 = vpop.f32.mrf.mxu1 }
 0x45d   :  { %v6372_v60 = vadd.f32 %v6309_v3, %v6141_v24  ;;  %v6152_v24 = vadd.f32 %v15625_v38, %v5921_v61  ;;  %v11309_v3 = vpop.f32.mrf.mxu0  ;;  %v6604_v43 = vadd.f32 %v14706_v39, %v6373_v54 }
 0x45e   :  { %v11213_v49 = vpop.f32.mrf.mxu1 }
 0x45f   :  { %v6375_v58 = vadd.f32 %v11213_v49, %v6144_v51  ;;  %v6151_v49 = vadd.f32 %v15626_v45, %v5920_v21  ;;  %v14955_v5 = vpop.f32.mrf.mxu0 }
 0x460   :  { %v6319_v34 = vpop.f32.mrf.mxu1  ;;  %15627 = vst [vmem:[#allocation10_spill] sm:$0xff] %v14955_v5 }
 0x461   :  { %v6374_v46 = vadd.f32 %v6319_v34, %v6143_v13  ;;  %v6606_v21 = vadd.f32 %v14730_v0, %v6375_v58  ;;  %v6600_v58 = vadd.f32 %v14668_v41, %v14906_v20  ;;  %v6601_v41 = vadd.f32 %v14698_v62, %v14919_v28 }
 0x462   :  { %v14931_v52 = vpop.f32.mrf.mxu1 }
 0x463   :  { %v6605_v45 = vadd.f32 %v14739_v10, %v6374_v46  ;;  %v6599_v46 = vadd.f32 %v14678_v27, %v14910_v16 }
 0x464   :  { %v14933_v11 = vpop.f32.mrf.mxu1 }
 0x466   :  { %v11219_v6 = vpop.f32.mrf.mxu1 }
 0x467   :  { %v14938_v30 = vadd.f32 %v11219_v6, %v6148_v36  ;;  %v11344_v6 = vpop.f32.mrf.mxu0 }
 0x468   :  { %v6339_v63 = vpop.f32.mrf.mxu1 }
 0x469   :  { %v14941_v14 = vadd.f32 %v6339_v63, %v6147_v22  ;;  %v7444_v63 = vpop.f32.mrf.mxu0 }
 0x46a   :  { %v11222_v9 = vpop.f32.mrf.mxu1 }
 0x46b   :  { %v14946_v42 = vadd.f32 %v11222_v9, %v6150_v35  ;;  %v6603_v9 = vadd.f32 %v14720_v47, %v6372_v60  ;;  %v11347_v38 = vpop.f32.mrf.mxu0 }
 0x46c   :  { %v6349_v40 = vpop.f32.mrf.mxu1 }
 0x46d   :  { %v14949_v19 = vadd.f32 %v6349_v40, %v6149_v2  ;;  %v7454_v37 = vpop.f32.mrf.mxu0 }
 0x46e   :  { %v11225_v51 = vpop.f32.mrf.mxu1 }
 0x46f   :  { %v6383_v15 = vadd.f32 %v11225_v51, %v6152_v24 }
 0x470   :  { %v6359_v13 = vpop.f32.mrf.mxu1 }
 0x471   :  { %v14953_v34 = vadd.f32 %v6359_v13, %v6151_v49 }
 0x472   :  { %v11260_v4 = vpop.f32.mrf.mxu1 }
 0x473   :  { %v6831_v10 = vadd.f32 %v11260_v4, %v6600_v58  ;;  %v15629_v58 = vld [vmem:[#allocation24_spill] sm:$0xff] }
 0x474   :  { %v6751_v36 = vpop.f32.mrf.mxu1 }
 0x475   :  { %v7062_v20 = vadd.f32 %v14845_v55, %v6831_v10  ;;  %v15001_v55 = vld [vmem:[%s15392_s4] ss:$0 sm:$0xff] }
 0x476   :  { %v11263_v22 = vpop.f32.mrf.mxu1 }
 0x478   :  { %v6761_v32 = vpop.f32.mrf.mxu1 }
 0x479   :  { %v6832_v16 = vadd.f32 %v6761_v32, %v6601_v41 }
 0x47a   :  { %v11266_v35 = vpop.f32.mrf.mxu1 }
 0x47b   :  { %v6835_v61 = vadd.f32 %v11266_v35, %v6604_v43  ;;  %v11350_v43 = vpop.f32.mrf.mxu0 }
 0x47c   :  { %v6771_v2 = vpop.f32.mrf.mxu1 }
 0x47d   :  { %v6834_v40 = vadd.f32 %v6771_v2, %v6603_v9  ;;  %v7464_v60 = vpop.f32.mrf.mxu0  ;;  %v6614_v2 = vadd.f32 %v14825_v23, %v6383_v15 }
 0x47e   :  { %v11269_v24 = vpop.f32.mrf.mxu1 }
 0x47f   :  { %v14960_v51 = vadd.f32 %v11269_v24, %v6606_v21  ;;  %v14980_v21 = vpop.f32.mrf.mxu0 }
 0x480   :  { %v6781_v49 = vpop.f32.mrf.mxu1 }
 0x481   :  { %v14963_v13 = vadd.f32 %v6781_v49, %v6605_v45  ;;  %v6830_v45 = vadd.f32 %v6751_v36, %v6599_v46  ;;  %v15628_v49 = vld [vmem:[#allocation14_spill] sm:$0xff]  ;;  %v7474_v27 = vpop.f32.mrf.mxu0 }
 0x482   :  { %v11272_v39 = vpop.f32.mrf.mxu1  ;;  %v6602_v5 = vadd.f32 %v15628_v49, %v14915_v48  ;;  %v6146_v48 = vadd.f32 %v15629_v58, %v14879_v56  ;;  %v15630_v56 = vld [vmem:[#allocation25_spill] sm:$0xff] }
 0x483   :  { %v7061_v36 = vadd.f32 %v14859_v8, %v6830_v45 }
 0x484   :  { %v14965_v54 = vpop.f32.mrf.mxu1  ;;  %v6833_v29 = vadd.f32 %v11263_v22, %v6602_v5  ;;  %v14995_v22 = vpop.f32.mrf.mxu0  ;;  %v6377_v62 = vadd.f32 %v14931_v52, %v6146_v48 }
 0x486   :  { %v14967_v35 = vpop.f32.mrf.mxu1  ;;  %v7064_v5 = vadd.f32 %v14867_v33, %v6833_v29  ;;  %v7066_v33 = vadd.f32 %v14887_v12, %v6835_v61  ;;  %v7484_v49 = vpop.f32.mrf.mxu0 }
 0x488   :  { %v14969_v47 = vpop.f32.mrf.mxu1  ;;  %v11359_v48 = vpop.f32.mrf.mxu0 }
 0x48a   :  { %v14971_v0 = vpop.f32.mrf.mxu1 }
 0x48c   :  { %v14975_v9 = vpop.f32.mrf.mxu1 }
 0x48e   :  { %v11281_v24 = vpop.f32.mrf.mxu1 }
 0x48f   :  { %v6845_v44 = vadd.f32 %v11281_v24, %v6614_v2 }
 0x490   :  { %v14984_v7 = vpop.f32.mrf.mxu1 }
 0x491   :  { %v14989_v4 = vadd.f32 %v11309_v3, %v6845_v44  ;;  %v7063_v3 = vadd.f32 %v14877_v53, %v6832_v16 }
 0x492   :  { %v11316_v23 = vpop.f32.mrf.mxu1 }
 0x493   :  { %v7293_v15 = vadd.f32 %v11316_v23, %v7062_v20 }
 0x494   :  { %v7213_v46 = vpop.f32.mrf.mxu1 }
 0x495   :  { %v7524_v2 = vadd.f32 %v11344_v6, %v7293_v15  ;;  %v7292_v24 = vadd.f32 %v7213_v46, %v7061_v36  ;;  %v6145_v6 = vadd.f32 %v15630_v56, %v14883_v1  ;;  %v7065_v1 = vadd.f32 %v14893_v17, %v6834_v40  ;;  %v15632_v17 = vld [vmem:[#allocation15_spill] sm:$0xff] }
 0x496   :  { %v11319_v28 = vpop.f32.mrf.mxu1  ;;  %v6609_v40 = vadd.f32 %v15632_v17, %v14941_v14  ;;  %v7494_v14 = vpop.f32.mrf.mxu0 }
 0x497   :  { %v7523_v44 = vadd.f32 %v7444_v63, %v7292_v24  ;;  %v7295_v8 = vadd.f32 %v11319_v28, %v7064_v5  ;;  %v7547_v29 = vadd.f32 %v15001_v55, %v7524_v2  ;;  %v6376_v41 = vadd.f32 %v14933_v11, %v6145_v6  ;;  %v15631_v11 = vld [vmem:[#allocation9_spill] sm:$0xff] }
 0x498   :  { %v7223_v32 = vpop.f32.mrf.mxu1  ;;  %v6608_v63 = vadd.f32 %v14748_v31, %v6377_v62  ;;  %v6610_v31 = vadd.f32 %v15631_v11, %v14938_v30  ;;  %v7067_v5 = vadd.f32 %v14904_v59, %v14963_v13 }
 0x499   :  { %v7546_v52 = vadd.f32 %v15001_v55, %v7523_v44  ;;  %v7526_v10 = vadd.f32 %v11347_v38, %v7295_v8  ;;  %v7294_v45 = vadd.f32 %v7223_v32, %v7063_v3  ;;  %v6607_v46 = vadd.f32 %v14758_v18, %v6376_v41  ;;  %v11362_v41 = vpop.f32.mrf.mxu0 }
 0x49a   :  { %v11322_v20 = vpop.f32.mrf.mxu1  ;;  %v6839_v15 = vadd.f32 %v11272_v39, %v6608_v63  ;;  %v6841_v62 = vadd.f32 %v14967_v35, %v6610_v31 }
 0x49b   :  { %v7562_v23 = vmax.f32 %v7546_v52, %v7547_v29  ;;  %v7525_v53 = vadd.f32 %v7454_v37, %v7294_v45  ;;  %v7297_v16 = vadd.f32 %v11322_v20, %v7066_v33  ;;  %v7549_v12 = vadd.f32 %v15001_v55, %v7526_v10 }
 0x49c   :  { %v7233_v36 = vpop.f32.mrf.mxu1  ;;  %v7068_v37 = vadd.f32 %v14899_v57, %v14960_v51  ;;  %v7070_v30 = vadd.f32 %v14913_v25, %v6839_v15  ;;  %v15634_v25 = vld [vmem:[#allocation6_spill] sm:$0xff]  ;;  %v7072_v52 = vadd.f32 %v14926_v50, %v6841_v62 }
 0x49d   :  { %v7548_v61 = vadd.f32 %v15001_v55, %v7525_v53  ;;  %v7528_v58 = vadd.f32 %v11350_v43, %v7297_v16  ;;  %v7296_v38 = vadd.f32 %v7233_v36, %v7065_v1  ;;  %v6838_v43 = vadd.f32 %v14965_v54, %v6607_v46  ;;  %v15636_v1 = vld [vmem:[#allocation17_spill] sm:$0xff]  ;;  %v7504_v46 = vpop.f32.mrf.mxu0 }
 0x49e   :  { %v11325_v2 = vpop.f32.mrf.mxu1  ;;  %v7566_v44 = vrot.slane %v7562_v23, 1  ;;  %v6840_v54 = vadd.f32 %v14969_v47, %v6609_v40  ;;  %v6611_v32 = vadd.f32 %v15634_v25, %v14949_v19  ;;  %v15635_v47 = vld [vmem:[#allocation27_spill] sm:$0xff]  ;;  %v15638_v40 = vld [vmem:[#allocation18_spill] sm:$0xff] }
 0x49f   :  { %v7907_v39 = vmax.f32 %v7548_v61, %v7549_v12  ;;  %v7527_v24 = vadd.f32 %v7464_v60, %v7296_v38  ;;  %v7299_v18 = vadd.f32 %v11325_v2, %v7068_v37  ;;  %v7551_v57 = vadd.f32 %v15001_v55, %v7528_v58  ;;  %v15633_v60 = vld [vmem:[#allocation20_spill] sm:$0xff] }
 0x4a0   :  { %v7243_v28 = vpop.f32.mrf.mxu1  ;;  %v6612_v3 = vadd.f32 %v15633_v60, %v14946_v42  ;;  %v7069_v33 = vadd.f32 %v14922_v26, %v6838_v43  ;;  %v7570_v45 = vmax.f32 %v7562_v23, %v7566_v44  ;;  %v6842_v26 = vadd.f32 %v14975_v9, %v6611_v32 }
 0x4a1   :  { %v7550_v51 = vadd.f32 %v15001_v55, %v7527_v24  ;;  %v7298_v8 = vadd.f32 %v7243_v28, %v7067_v5  ;;  %v7530_v59 = vadd.f32 %v14980_v21, %v7299_v18  ;;  %v7911_v63 = vrot.slane %v7907_v39, 1  ;;  %v15639_v5 = vld [vmem:[#allocation10_spill] sm:$0xff]  ;;  %v11365_v28 = vpop.f32.mrf.mxu0 }
 0x4a2   :  { %v11328_v13 = vpop.f32.mrf.mxu1  ;;  %v6843_v10 = vadd.f32 %v14971_v0, %v6612_v3  ;;  %v7071_v0 = vadd.f32 %v15636_v1, %v6840_v54  ;;  %v15045_v12 = vmax.f32 %v7570_v45, 0.0 }
 0x4a3   :  { %v8252_v35 = vmax.f32 %v7550_v51, %v7551_v57  ;;  %v7529_v56 = vadd.f32 %v7474_v27, %v7298_v8  ;;  %v7301_v6 = vadd.f32 %v11328_v13, %v7070_v30  ;;  %v7553_v42 = vadd.f32 %v15001_v55, %v7530_v59 }
 0x4a4   :  { %v7253_v29 = vpop.f32.mrf.mxu1  ;;  %v6613_v27 = vadd.f32 %v15635_v47, %v14953_v34  ;;  %v15637_v34 = vld [vmem:[#allocation21_spill] sm:$0xff]  ;;  %v7583_v8 = vrot.slane %v15045_v12, 2  ;;  %v7828_v25 = vrot.slane %v15045_v12, 6 }
 0x4a5   :  { %v7552_v21 = vadd.f32 %v15001_v55, %v7529_v56  ;;  %v7532_v20 = vadd.f32 %v14995_v22, %v7301_v6  ;;  %v7300_v19 = vadd.f32 %v7253_v29, %v7069_v33  ;;  %v7074_v38 = vadd.f32 %v15637_v34, %v6843_v10 }
 0x4a6   :  { %v11331_v53 = vpop.f32.mrf.mxu1  ;;  %v6844_v23 = vadd.f32 %v14984_v7, %v6613_v27  ;;  %v7915_v22 = vmax.f32 %v7907_v39, %v7911_v63  ;;  %v8256_v11 = vrot.slane %v8252_v35, 1  ;;  %v7073_v7 = vadd.f32 %v15638_v40, %v6842_v26 }
 0x4a7   :  { %v8597_v16 = vmax.f32 %v7552_v21, %v7553_v42  ;;  %v7303_v50 = vadd.f32 %v11331_v53, %v7072_v52  ;;  %v7531_v15 = vadd.f32 %v7484_v49, %v7300_v19  ;;  %v7555_v31 = vadd.f32 %v15001_v55, %v7532_v20  ;;  %v7514_v52 = vpop.f32.mrf.mxu0 }
 0x4a8   :  { %v7263_v36 = vpop.f32.mrf.mxu1  ;;  %v7075_v43 = vadd.f32 %v15639_v5, %v6844_v23  ;;  %v15054_v30 = vmax.f32 %v7915_v22, 0.0  ;;  %v8260_v44 = vmax.f32 %v8252_v35, %v8256_v11  ;;  %v7745_v6 = vrot.slane %v15045_v12, 4  ;;  %v9700_v23 = vld [vmem:[%s15393_s5 + $0x40] sm:$0xf] }
 0x4a9   :  { %v7534_v61 = vadd.f32 %v11359_v48, %v7303_v50  ;;  %v7302_v58 = vadd.f32 %v7263_v36, %v7071_v0  ;;  %v7554_v9 = vadd.f32 %v15001_v55, %v7531_v15  ;;  %v15640_v40 = vmov 0.0  }
 0x4aa   :  { %v11334_v37 = vpop.f32.mrf.mxu1  ;;  %v15062_v10 = vmax.f32 %v8260_v44, 0.0  ;;  %v8007_v42 = vrot.slane %v15054_v30, 2 }
 0x4ab   :  { %v7533_v2 = vadd.f32 %v7494_v14, %v7302_v58  ;;  %v7305_v17 = vadd.f32 %v11334_v37, %v7074_v38  ;;  %v7563_v49 = vmax.f32 %v7554_v9, %v7555_v31  ;;  %v7557_v48 = vadd.f32 %v15001_v55, %v7534_v61 }
 0x4ac   :  { %v7273_v24 = vpop.f32.mrf.mxu1  ;;  %v8601_v14 = vrot.slane %v8597_v16, 1  ;;  %v8173_v31 = vrot.slane %v15054_v30, 6  ;;  %v8352_v37 = vrot.slane %v15062_v10, 2 }
 0x4ad   :  { %v7556_v39 = vadd.f32 %v15001_v55, %v7533_v2  ;;  %v7536_v62 = vadd.f32 %v11362_v41, %v7305_v17  ;;  %v7304_v18 = vadd.f32 %v7273_v24, %v7073_v7  ;;  %v7567_v57 = vrot.slane %v7563_v49, 1  ;;  %v9698_v7 = vld [vmem:[%s15393_s5 + $0x30] sm:$0xff] }
 0x4ae   :  { %v11337_v51 = vpop.f32.mrf.mxu1  ;;  %v8605_v21 = vmax.f32 %v8597_v16, %v8601_v14  ;;  %v9705_v16 = vld [vmem:[%s15393_s5 + $0x58] sm:$0xf]  ;;  %v9710_v14 = vld [vmem:[%s15393_s5 + $0x70] sm:$0xf] }
 0x4af   :  { %v7908_v60 = vmax.f32 %v7556_v39, %v7557_v48  ;;  %v7535_v3 = vadd.f32 %v7504_v46, %v7304_v18  ;;  %v7307_v59 = vadd.f32 %v11337_v51, %v14989_v4  ;;  %v7571_v13 = vmax.f32 %v7563_v49, %v7567_v57  ;;  %v9704_v46 = vld [vmem:[%s15393_s5 + $0x50] sm:$0xff] }
 0x4b0   :  { %v7559_v54 = vadd.f32 %v15001_v55, %v7536_v62  ;;  %v7283_v56 = vpop.f32.mrf.mxu1  ;;  %v8090_v4 = vrot.slane %v15054_v30, 4  ;;  %v8607_v5 = vmax.f32 %v8605_v21, 0.0  ;;  %v8435_v62 = vrot.slane %v15062_v10, 4 }
 0x4b1   :  { %v7912_v32 = vrot.slane %v7908_v60, 1  ;;  %v7558_v35 = vadd.f32 %v15001_v55, %v7535_v3  ;;  %v7538_v33 = vadd.f32 %v11365_v28, %v7307_v59  ;;  %v7306_v29 = vadd.f32 %v7283_v56, %v7075_v43  ;;  %v9703_v43 = vld [vmem:[%s15393_s5 + $0x48] sm:$0xff] }
 0x4b2   :  { %v7573_v45 = vmax.f32 %v7571_v13, 0.0  ;;  %v8518_v57 = vrot.slane %v15062_v10, 6  ;;  %v8697_v56 = vrot.slane %v8607_v5, 2 }
 0x4b3   :  { %v7916_v41 = vmax.f32 %v7908_v60, %v7912_v32  ;;  %v8253_v47 = vmax.f32 %v7558_v35, %v7559_v54  ;;  %v7537_v27 = vadd.f32 %v7514_v52, %v7306_v29  ;;  %v7561_v1 = vadd.f32 %v15001_v55, %v7538_v33  ;;  %v9715_v60 = vld [vmem:[%s15393_s5 + $0x88] sm:$0xf]  ;;  %v9714_v32 = vld [vmem:[%s15393_s5 + $0x80] sm:$0xff] }
 0x4b4   :  { %v7584_v63 = vrot.slane %v7573_v45, 1  ;;  %v7664_v20 = vrot.slane %v7573_v45, 7  ;;  %v7746_v19 = vrot.slane %v7573_v45, 3  ;;  %v7829_v53 = vrot.slane %v7573_v45, 5  ;;  %v9708_v45 = vld [vmem:[%s15393_s5 + $0x60] sm:$0xff] }
 0x4b5   :  { %v7918_v26 = vmax.f32 %v7916_v41, 0.0  ;;  %v8257_v50 = vrot.slane %v8253_v47, 1  ;;  %v7560_v0 = vadd.f32 %v15001_v55, %v7537_v27  ;;  %v9699_v55 = vld [vmem:[%s15393_s5 + $0x38] sm:$0xff]  ;;  %v9720_v27 = vld [vmem:[%s15393_s5 + $0xa0] sm:$0xf] }
 0x4b6   :  { %v7586_v15 = vsel %vm7585_vm8, %v7584_v63, %v7583_v8  ;;  %v7665_v36 = vsel %vm7585_vm8, %v7664_v20, %v15045_v12  ;;  %v7747_v61 = vsel %vm7585_vm8, %v7746_v19, %v7745_v6  ;;  %v7830_v58 = vsel %vm7585_vm8, %v7829_v53, %v7828_v25  ;;  %v9709_v25 = vld [vmem:[%s15393_s5 + $0x68] sm:$0xff]  ;;  %v9713_v41 = vld [vmem:[%s15393_s5 + $0x78] sm:$0xff]  ;;  %v9724_v19 = vld [vmem:[%s15393_s5 + $0xb0] sm:$0xff] }
 0x4b7   :  { %v8261_v34 = vmax.f32 %v8253_v47, %v8257_v50  ;;  %v8598_v38 = vmax.f32 %v7560_v0, %v7561_v1  ;;  %11373 = vmatmul.mubr.msk.f32.vlgmr.msra.gmra.mxu1 %vm7587_vm9, %v7586_v15  ;;  %11382 = vmatmul.mubr.msk.f32.vlgmr.msra.gmra.mxu0 %vm7587_vm9, %v7665_v36  ;;  %v7925_v22 = vrot.slane %v7918_v26, 7  ;;  %v8008_v12 = vrot.slane %v7918_v26, 1  ;;  %v9725_v63 = vld [vmem:[%s15393_s5 + $0xb8] sm:$0xf]  ;;  %v9718_v53 = vld [vmem:[%s15393_s5 + $0x90] sm:$0xff]  ;;  %v9729_v0 = vld [vmem:[%s15393_s5 + $0xc8] sm:$0xff] }
 0x4b8   :  { %11385 = vmatpush3.msk.msra.mxu1 %vm7590_vm6, %v9700_v23  ;;  %11394 = vmatpush3.msk.msra.mxu0 %vm7590_vm6, %v9705_v16  ;;  %v8091_v11 = vrot.slane %v7918_v26, 3  ;;  %v8174_v9 = vrot.slane %v7918_v26, 5  ;;  %v8780_v6 = vrot.slane %v8607_v5, 4  ;;  %v9719_v20 = vld [vmem:[%s15393_s5 + $0x98] sm:$0xff]  ;;  %v9723_v26 = vld [vmem:[%s15393_s5 + $0xa8] sm:$0xff]  ;;  %v9734_v23 = vld [vmem:[%s15393_s5 + $0xe0] sm:$0xff] }
 0x4b9   :  { %v8263_v2 = vmax.f32 %v8261_v34, 0.0  ;;  %v8602_v17 = vrot.slane %v8598_v38, 1  ;;  %11386 = vmatprep.subr.mxu1 %v15640_v40  ;;  %11395 = vmatprep.subr.mxu0 %v15640_v40  ;;  %v7926_v49 = vsel %vm7585_vm8, %v7925_v22, %v15054_v30  ;;  %v8009_v24 = vsel %vm7585_vm8, %v8008_v12, %v8007_v42  ;;  %v9730_v50 = vld [vmem:[%s15393_s5 + $0xd0] sm:$0xf]  ;;  %v9735_v1 = vld [vmem:[%s15393_s5 + $0xe8] sm:$0xf] }
 0x4ba   :  { %11387 = vmatpush3.msra.mxu1 %v9699_v55  ;;  %11396 = vmatpush3.msra.mxu0 %v9704_v46  ;;  %v15103_v48 = vsel %vm7585_vm8, %v8091_v11, %v8090_v4  ;;  %v15106_v39 = vsel %vm7585_vm8, %v8174_v9, %v8173_v31  ;;  %v9728_v16 = vld [vmem:[%s15393_s5 + $0xc0] sm:$0xff]  ;;  %v9733_v15 = vld [vmem:[%s15393_s5 + $0xd8] sm:$0xff]  ;;  %v9744_v34 = vld [vmem:[%s15393_s5 + $0x110] sm:$0xff] }
 0x4bb   :  { %v8606_v18 = vmax.f32 %v8598_v38, %v8602_v17  ;;  %11388 = vmatprep.subr.mxu1 %v15640_v40  ;;  %11397 = vmatprep.subr.mxu0 %v15640_v40  ;;  %v8270_v28 = vrot.slane %v8263_v2, 7  ;;  %v8353_v30 = vrot.slane %v8263_v2, 1  ;;  %v8436_v44 = vrot.slane %v8263_v2, 3  ;;  %v9740_v36 = vld [vmem:[%s15393_s5 + $0x100] sm:$0xf]  ;;  %v9738_v38 = vld [vmem:[%s15393_s5 + $0xf0] sm:$0xff] }
 0x4bc   :  { %11389 = vmatpush3.msra.mxu1 %v9698_v7  ;;  %11390 = vmatprep.mubr.msk.f32.mxu1 %vm11562_vm7, %v15640_v40  ;;  %v8519_v51 = vrot.slane %v8263_v2, 5  ;;  %v9743_v55 = vld [vmem:[%s15393_s5 + $0x108] sm:$0xff]  ;;  %v9750_v46 = vld [vmem:[%s15393_s5 + $0x130] sm:$0xf]  ;;  %v9754_v11 = vld [vmem:[%s15393_s5 + $0x140] sm:$0xff] }
 0x4bd   :  { %v8608_v8 = vmax.f32 %v8606_v18, 0.0  ;;  %11398 = vmatpush3.msra.mxu0 %v9703_v43  ;;  %11399 = vmatprep.mubr.msk.f32.mxu0 %vm11562_vm7, %v15640_v40  ;;  %v15124_v3 = vsel %vm7585_vm8, %v8270_v28, %v15062_v10  ;;  %v15127_v59 = vsel %vm7585_vm8, %v8353_v30, %v8352_v37  ;;  %v15130_v13 = vsel %vm7585_vm8, %v8436_v44, %v8435_v62  ;;  %v9755_v22 = vld [vmem:[%s15393_s5 + $0x148] sm:$0xf]  ;;  %v9748_v31 = vld [vmem:[%s15393_s5 + $0x120] sm:$0xff]  ;;  %v9753_v9 = vld [vmem:[%s15393_s5 + $0x138] sm:$0xff] }
 0x4be   :  { %11391 = vmatmul.mubr.msk.f32.vlgmr.msra.gmra.mxu1 %vm7587_vm9, %v7747_v61  ;;  %11400 = vmatmul.mubr.msk.f32.vlgmr.msra.gmra.mxu0 %vm7587_vm9, %v7830_v58  ;;  %v15135_v54 = vsel %vm7585_vm8, %v8519_v51, %v8518_v57  ;;  %v8863_v10 = vrot.slane %v8607_v5, 6  ;;  %v9745_v61 = vld [vmem:[%s15393_s5 + $0x118] sm:$0xf]  ;;  %v9749_v12 = vld [vmem:[%s15393_s5 + $0x128] sm:$0xff]  ;;  %v9760_v37 = vld [vmem:[%s15393_s5 + $0x160] sm:$0xf] }
 0x4bf   :  { %11402 = vmatprep.subr.mxu1 %v15640_v40  ;;  %11411 = vmatprep.subr.mxu0 %v15640_v40  ;;  %v8615_v35 = vrot.slane %v8608_v8, 7  ;;  %v8698_v33 = vrot.slane %v8608_v8, 1  ;;  %v8781_v29 = vrot.slane %v8608_v8, 3  ;;  %v8864_v52 = vrot.slane %v8608_v8, 5  ;;  %v9739_v58 = vld [vmem:[%s15393_s5 + $0xf8] sm:$0xff]  ;;  %v9764_v7 = vld [vmem:[%s15393_s5 + $0x170] sm:$0xff] }
 0x4c0   :  { %11403 = vmatpush3.msk.msra.mxu1 %vm7590_vm6, %v9710_v14  ;;  %11412 = vmatpush3.msk.msra.mxu0 %vm7590_vm6, %v9715_v60  ;;  %v9765_v2 = vld [vmem:[%s15393_s5 + $0x178] sm:$0xf]  ;;  %v8956_v43 = vld [vmem:[%s15395_s7 + $0x28] sm:$0xff]  ;;  %v8953_v62 = vld [vmem:[%s15395_s7 + $0x10] sm:$0xff] }
 0x4c1   :  { %11404 = vmatprep.subr.mxu1 %v15640_v40  ;;  %11413 = vmatprep.subr.mxu0 %v15640_v40  ;;  %v15153_v42 = vsel %vm7585_vm8, %v8615_v35, %v8607_v5  ;;  %v15156_v4 = vsel %vm7585_vm8, %v8698_v33, %v8697_v56  ;;  %v15159_v21 = vsel %vm7585_vm8, %v8781_v29, %v8780_v6  ;;  %v9759_v17 = vld [vmem:[%s15393_s5 + $0x158] sm:$0xff]  ;;  %v8957_v5 = vld [vmem:[%s15395_s7 + $0x30] sm:$0x3]  ;;  %v8952_v18 = vld [vmem:[%s15395_s7 + $0x8] sm:$0xff] }
 0x4c2   :  { %11405 = vmatpush3.msra.mxu1 %v9709_v25  ;;  %11414 = vmatpush3.msra.mxu0 %v9714_v32  ;;  %v15165_v47 = vsel %vm7585_vm8, %v8864_v52, %v8863_v10  ;;  %v8951_v28 = vld [vmem:[%s15395_s7] sm:$0xff] }
 0x4c3   :  { %11406 = vmatprep.subr.mxu1 %v15640_v40  ;;  %11415 = vmatprep.subr.mxu0 %v15640_v40 }
 0x4c4   :  { %11407 = vmatpush3.msra.mxu1 %v9708_v45  ;;  %11408 = vmatprep.mubr.msk.f32.mxu1 %vm11562_vm7, %v15640_v40 }
 0x4c5   :  { %11416 = vmatpush3.msra.mxu0 %v9713_v41  ;;  %11417 = vmatprep.mubr.msk.f32.mxu0 %vm11562_vm7, %v15640_v40 }
 0x4c6   :  { %11409 = vmatmul.mubr.msk.f32.vlgmr.msra.gmra.mxu1 %vm7587_vm9, %v7926_v49  ;;  %11418 = vmatmul.mubr.msk.f32.vlgmr.msra.gmra.mxu0 %vm7587_vm9, %v8009_v24  ;;  %v9758_v49 = vld [vmem:[%s15393_s5 + $0x150] sm:$0xff]  ;;  %v9763_v24 = vld [vmem:[%s15393_s5 + $0x168] sm:$0xff] }
 0x4c7   :  { %11420 = vmatprep.subr.mxu1 %v15640_v40  ;;  %11429 = vmatprep.subr.mxu0 %v15640_v40 }
 0x4c8   :  { %11421 = vmatpush3.msk.msra.mxu1 %vm7590_vm6, %v9720_v27  ;;  %11430 = vmatpush3.msk.msra.mxu0 %vm7590_vm6, %v9725_v63 }
 0x4c9   :  { %11422 = vmatprep.subr.mxu1 %v15640_v40  ;;  %11431 = vmatprep.subr.mxu0 %v15640_v40 }
 0x4ca   :  { %11423 = vmatpush3.msra.mxu1 %v9719_v20  ;;  %11432 = vmatpush3.msra.mxu0 %v9724_v19 }
 0x4cb   :  { %11424 = vmatprep.subr.mxu1 %v15640_v40  ;;  %11433 = vmatprep.subr.mxu0 %v15640_v40 }
 0x4cc   :  { %11425 = vmatpush3.msra.mxu1 %v9718_v53  ;;  %11426 = vmatprep.mubr.msk.f32.mxu1 %vm11562_vm7, %v15640_v40 }
 0x4cd   :  { %11434 = vmatpush3.msra.mxu0 %v9723_v26  ;;  %11435 = vmatprep.mubr.msk.f32.mxu0 %vm11562_vm7, %v15640_v40 }
 0x4ce   :  { %11427 = vmatmul.mubr.msk.f32.vlgmr.msra.gmra.mxu1 %vm7587_vm9, %v15103_v48  ;;  %11436 = vmatmul.mubr.msk.f32.vlgmr.msra.gmra.mxu0 %vm7587_vm9, %v15106_v39  ;;  %v8955_v48 = vld [vmem:[%s15395_s7 + $0x20] sm:$0xff]  ;;  %v8954_v39 = vld [vmem:[%s15395_s7 + $0x18] sm:$0xff] }
 0x4cf   :  { %11438 = vmatprep.subr.mxu1 %v15640_v40  ;;  %11447 = vmatprep.subr.mxu0 %v15640_v40 }
 0x4d0   :  { %11439 = vmatpush3.msk.msra.mxu1 %vm7590_vm6, %v9730_v50  ;;  %11448 = vmatpush3.msk.msra.mxu0 %vm7590_vm6, %v9735_v1 }
 0x4d1   :  { %11440 = vmatprep.subr.mxu1 %v15640_v40  ;;  %11449 = vmatprep.subr.mxu0 %v15640_v40 }
 0x4d2   :  { %11441 = vmatpush3.msra.mxu1 %v9729_v0  ;;  %11450 = vmatpush3.msra.mxu0 %v9734_v23 }
 0x4d3   :  { %11442 = vmatprep.subr.mxu1 %v15640_v40  ;;  %11451 = vmatprep.subr.mxu0 %v15640_v40 }
 0x4d4   :  { %11443 = vmatpush3.msra.mxu1 %v9728_v16  ;;  %11444 = vmatprep.mubr.msk.f32.mxu1 %vm11562_vm7, %v15640_v40 }
 0x4d5   :  { %11452 = vmatpush3.msra.mxu0 %v9733_v15  ;;  %11453 = vmatprep.mubr.msk.f32.mxu0 %vm11562_vm7, %v15640_v40 }
 0x4d6   :  { %11445 = vmatmul.mubr.msk.f32.vlgmr.msra.gmra.mxu1 %vm7587_vm9, %v15124_v3  ;;  %11454 = vmatmul.mubr.msk.f32.vlgmr.msra.gmra.mxu0 %vm7587_vm9, %v15127_v59 }
 0x4d7   :  { %11456 = vmatprep.subr.mxu1 %v15640_v40  ;;  %11465 = vmatprep.subr.mxu0 %v15640_v40 }
 0x4d8   :  { %11457 = vmatpush3.msk.msra.mxu1 %vm7590_vm6, %v9740_v36  ;;  %11466 = vmatpush3.msk.msra.mxu0 %vm7590_vm6, %v9745_v61 }
 0x4d9   :  { %11458 = vmatprep.subr.mxu1 %v15640_v40  ;;  %11467 = vmatprep.subr.mxu0 %v15640_v40 }
 0x4da   :  { %11459 = vmatpush3.msra.mxu1 %v9739_v58  ;;  %11468 = vmatpush3.msra.mxu0 %v9744_v34 }
 0x4db   :  { %11460 = vmatprep.subr.mxu1 %v15640_v40  ;;  %11469 = vmatprep.subr.mxu0 %v15640_v40 }
 0x4dc   :  { %11461 = vmatpush3.msra.mxu1 %v9738_v38  ;;  %11462 = vmatprep.mubr.msk.f32.mxu1 %vm11562_vm7, %v15640_v40 }
 0x4dd   :  { %11470 = vmatpush3.msra.mxu0 %v9743_v55  ;;  %11471 = vmatprep.mubr.msk.f32.mxu0 %vm11562_vm7, %v15640_v40  ;;  %v9768_v55 = vld [vmem:[%s15394_s6] ss:$0 sm:$0xff]  ;;  %s11563_s6 = smov [#allocation3]  }
 0x4de   :  { %11463 = vmatmul.mubr.msk.f32.vlgmr.msra.gmra.mxu1 %vm7587_vm9, %v15130_v13  ;;  %11472 = vmatmul.mubr.msk.f32.vlgmr.msra.gmra.mxu0 %vm7587_vm9, %v15135_v54 }
 0x4df   :  { %11474 = vmatprep.subr.mxu1 %v15640_v40  ;;  %11483 = vmatprep.subr.mxu0 %v15640_v40 }
 0x4e0   :  { %11475 = vmatpush3.msk.msra.mxu1 %vm7590_vm6, %v9750_v46  ;;  %11484 = vmatpush3.msk.msra.mxu0 %vm7590_vm6, %v9755_v22 }
 0x4e1   :  { %11476 = vmatprep.subr.mxu1 %v15640_v40  ;;  %11485 = vmatprep.subr.mxu0 %v15640_v40 }
 0x4e2   :  { %11477 = vmatpush3.msra.mxu1 %v9749_v12  ;;  %11486 = vmatpush3.msra.mxu0 %v9754_v11 }
 0x4e3   :  { %11478 = vmatprep.subr.mxu1 %v15640_v40  ;;  %11487 = vmatprep.subr.mxu0 %v15640_v40 }
 0x4e4   :  { %11479 = vmatpush3.msra.mxu1 %v9748_v31  ;;  %11480 = vmatprep.mubr.msk.f32.mxu1 %vm11562_vm7, %v15640_v40 }
 0x4e5   :  { %11488 = vmatpush3.msra.mxu0 %v9753_v9  ;;  %11489 = vmatprep.mubr.msk.f32.mxu0 %vm11562_vm7, %v15640_v40  ;;  %v9769_v9 = vld [vmem:[%s15396_s8] ss:$0 sm:$0xff]  ;;  %s9063_s8 = sshll.u32 %s11563_s6, 4  ;;  %s9064_s8 = int_to_ptr.vmem [resolvable:$true] %s9063_s8 }
 0x4e6   :  { %11481 = vmatmul.mubr.msk.f32.vlgmr.msra.gmra.mxu1 %vm7587_vm9, %v15153_v42  ;;  %11490 = vmatmul.mubr.msk.f32.vlgmr.msra.gmra.mxu0 %vm7587_vm9, %v15156_v4  ;;  %s11539_s10 = scalar_lea.vmem %s9064_s8, 32  ;;  %p11544_p1 = scmp.lt.s32.totalorder %s9064_s8, %s9064_s8 }
 0x4e7   :  { %11492 = vmatprep.subr.mxu1 %v15640_v40  ;;  %11501 = vmatprep.subr.mxu0 %v15640_v40  ;;  %p11540_p0 = scmp.ne.s32.totalorder %s9064_s8, %s11539_s10  ;;  %p11545_p2 = scmp.lt.s32.totalorder %s11539_s10, %s11539_s10 }
 0x4e8   :  { %11493 = vmatpush3.msk.msra.mxu1 %vm7590_vm6, %v9760_v37  ;;  %11502 = vmatpush3.msk.msra.mxu0 %vm7590_vm6, %v9765_v2 }
 0x4e9   :  { %11494 = vmatprep.subr.mxu1 %v15640_v40  ;;  %11503 = vmatprep.subr.mxu0 %v15640_v40  ;;  %p11546_p3 = por %p11545_p2, %p11544_p1 }
 0x4ea   :  { %11495 = vmatpush3.msra.mxu1 %v9759_v17  ;;  %11504 = vmatpush3.msra.mxu0 %v9764_v7 }
 0x4eb   :  { %11496 = vmatprep.subr.mxu1 %v15640_v40  ;;  %11505 = vmatprep.subr.mxu0 %v15640_v40  ;;  %p11547_p4 = pnand %p11546_p3, %p11540_p0 }
 0x4ec   :  { %11497 = vmatpush3.msra.mxu1 %v9758_v49  ;;  %11498 = vmatprep.mubr.msk.f32.mxu1 %vm11562_vm7, %v15640_v40 }
 0x4ed   :  { %11506 = vmatpush3.msra.mxu0 %v9763_v24  ;;  %11507 = vmatprep.mubr.msk.f32.mxu0 %vm11562_vm7, %v15640_v40 }
 0x4ee   :  { %11499 = vmatmul.mubr.msk.f32.vlgmr.msra.gmra.mxu1 %vm7587_vm9, %v15159_v21  ;;  %11508 = vmatmul.mubr.msk.f32.vlgmr.msra.gmra.mxu0 %vm7587_vm9, %v15165_v47 }
 0x4ef   :  { %11510 = vmatprep.subr.mxu1 %v15640_v40  ;;  %11524 = vmatprep.mubr.msk.f32.mxu1 %vm11562_vm7, %v15640_v40 }
 0x4f0   :  { %11511 = vmatpush3.msk.msra.mxu1 %vm1881_vm3, %v8957_v5 }
 0x4f1   :  { %11512 = vmatprep.subr.mxu1 %v15640_v40 }
 0x4f2   :  { %11513 = vmatpush3.msra.mxu1 %v8956_v43 }
 0x4f3   :  { %11514 = vmatprep.subr.mxu1 %v15640_v40 }
 0x4f4   :  { %11515 = vmatpush3.msra.mxu1 %v8955_v48 }
 0x4f5   :  { %11516 = vmatprep.subr.mxu1 %v15640_v40 }
 0x4f6   :  { %11517 = vmatpush3.msra.mxu1 %v8954_v39 }
 0x4f7   :  { %11518 = vmatprep.subr.mxu1 %v15640_v40 }
 0x4f8   :  { %11519 = vmatpush3.msra.mxu1 %v8953_v62 }
 0x4f9   :  { %11520 = vmatprep.subr.mxu1 %v15640_v40 }
 0x4fa   :  { %11521 = vmatpush3.msra.mxu1 %v8952_v18 }
 0x4fb   :  { %11522 = vmatprep.subr.mxu1 %v15640_v40 }
 0x4fc   :  { %11523 = vmatpush3.msra.mxu1 %v8951_v28 }
 0x577   :  { %v7660_v30 = vpop.f32.mrf.mxu1  ;;  %v7737_v44 = vpop.f32.mrf.mxu0 }
 0x578   :  { %v7738_v6 = vadd.f32 %v7737_v44, %v7660_v30 }
 0x579   :  { %v11374_v57 = vpop.f32.mrf.mxu1  ;;  %v11383_v51 = vpop.f32.mrf.mxu0 }
 0x57e   :  { %v7819_v8 = vpop.f32.mrf.mxu1  ;;  %v7902_v14 = vpop.f32.mrf.mxu0 }
 0x57f   :  { %v7823_v25 = vadd.f32 %v7819_v8, %v7738_v6 }
 0x580   :  { %v11392_v60 = vpop.f32.mrf.mxu1  ;;  %v11401_v3 = vpop.f32.mrf.mxu0 }
 0x581   :  { %v7906_v33 = vadd.f32 %v7902_v14, %v7823_v25 }
 0x586   :  { %v7998_v59 = vpop.f32.mrf.mxu1  ;;  %v8081_v13 = vpop.f32.mrf.mxu0 }
 0x587   :  { %v8002_v52 = vadd.f32 %v7998_v59, %v7906_v33 }
 0x588   :  { %v11410_v54 = vpop.f32.mrf.mxu1  ;;  %v11419_v56 = vpop.f32.mrf.mxu0 }
 0x589   :  { %v8085_v10 = vadd.f32 %v8081_v13, %v8002_v52 }
 0x58e   :  { %v8164_v32 = vpop.f32.mrf.mxu1  ;;  %v8247_v35 = vpop.f32.mrf.mxu0 }
 0x58f   :  { %v8168_v4 = vadd.f32 %v8164_v32, %v8085_v10 }
 0x590   :  { %v11428_v29 = vpop.f32.mrf.mxu1  ;;  %v11437_v40 = vpop.f32.mrf.mxu0 }
 0x591   :  { %v8251_v47 = vadd.f32 %v8247_v35, %v8168_v4 }
 0x596   :  { %v8343_v45 = vpop.f32.mrf.mxu1  ;;  %v8426_v42 = vpop.f32.mrf.mxu0 }
 0x597   :  { %v8347_v27 = vadd.f32 %v8343_v45, %v8251_v47 }
 0x598   :  { %v11446_v21 = vpop.f32.mrf.mxu1  ;;  %v11455_v41 = vpop.f32.mrf.mxu0 }
 0x599   :  { %v8430_v26 = vadd.f32 %v8426_v42, %v8347_v27 }
 0x59e   :  { %v8509_v63 = vpop.f32.mrf.mxu1  ;;  %v8592_v20 = vpop.f32.mrf.mxu0 }
 0x59f   :  { %v8513_v50 = vadd.f32 %v8509_v63, %v8430_v26 }
 0x5a0   :  { %v11464_v19 = vpop.f32.mrf.mxu1  ;;  %v11473_v53 = vpop.f32.mrf.mxu0 }
 0x5a1   :  { %v8596_v23 = vadd.f32 %v8592_v20, %v8513_v50 }
 0x5a6   :  { %v8688_v1 = vpop.f32.mrf.mxu1  ;;  %v8771_v0 = vpop.f32.mrf.mxu0 }
 0x5a7   :  { %v8692_v36 = vadd.f32 %v8688_v1, %v8596_v23 }
 0x5a8   :  { %v11482_v16 = vpop.f32.mrf.mxu1  ;;  %v11491_v15 = vpop.f32.mrf.mxu0 }
 0x5a9   :  { %v8775_v61 = vadd.f32 %v8771_v0, %v8692_v36 }
 0x5ae   :  { %v8854_v58 = vpop.f32.mrf.mxu1  ;;  %v8937_v34 = vpop.f32.mrf.mxu0 }
 0x5af   :  { %v8858_v38 = vadd.f32 %v8854_v58, %v8775_v61 }
 0x5b0   :  { %v11500_v46 = vpop.f32.mrf.mxu1  ;;  %v11509_v22 = vpop.f32.mrf.mxu0 }
 0x5b1   :  { %v8941_v12 = vadd.f32 %v8937_v34, %v8858_v38 }
 0x5b3   :  { %v8949_v11 = vadd.f32 %v9768_v55, %v8941_v12 }
 0x5b5   :  { %v8950_v31 = vmax.f32 %v8949_v11, 0.0 }
 0x5b7   :  { %11525 = vmatmul.mubr.msk.f32.vlgmr.msra.gmra.mxu1 %vm8965_vm10, %v8950_v31 }
 0x677   :  { %v9038_v37 = vpop.f32.mrf.mxu1 }
 0x678   :  { %v9039_v2 = vadd.f32 %v9769_v9, %v9038_v37 }
 0x679   :  { %v11526_v17 = vpop.f32.mrf.mxu1 }
 0x67a   :  { %v9043_v7 = vsel %vm9042_vm11, %v9039_v2, -inf }
 0x67b   :  { %9044 = vmax.xlane.f32.xlu0 %v9043_v7 }
 0x704   :  { %v9045_v49 = vpop.xlane.xlu0 %9044 }
 0x705   :  { %v9046_v24 = vsub.f32 %v9039_v2, %v9045_v49 }
 0x707   :  { %v9047_v5 = vmul.f32 1.442695, %v9046_v24 }
 0x709   :  { %11534 = vpow2.f32 %v9047_v5 }
 0x716   :  { %v11535_v43 = vpop.eup %11534 }
 0x717   :  { %v9049_v48 = vsel %vm9042_vm11, %v11535_v43, 0.0 }
 0x718   :  { %9050 = vadd.xlane.f32.xlu0 %v9049_v48 }
 0x7a1   :  { %v9051_v39 = vpop.xlane.xlu0 %9050 }
 0x7a2   :  { %11536 = vlog2.f32 %v9051_v39 }
 0x7af   :  { %v11537_v62 = vpop.eup %11536 }
 0x7b0   :  { %v9053_v18 = vmul.f32 0.6931472, %v11537_v62 }
 0x7b2   :  { %v9054_v28 = vadd.f32 %v9053_v18, %v9045_v49 }
 0x7b4   :  { %v9055_v30 = vsub.f32 %v9039_v2, %v9054_v28 }
 0x7b6   :  { %9056 = vst.msk [vmem:[#allocation3] sm:$0x3] %vm9042_vm11, %v9055_v30 }
 0x7b7   :  { %11550 = shalt.err (!%p11547_p4)
}
 0x7b8   :  { %9066 = dma.vmem_to_hbm [thread:$0]  %s9064_s8, 32, %s15397_s9, [#allocation4]  }
 0x7b9   :  { %11559 = dma.done.wait [#allocation4], 32  }
 0x7ba   :  { %11560 = vsyncadd [#allocation4], 4294967264 }
 0x7bb   :  { %9070 = vsyncpa [#allocation4], 1 }

</bundles_post_ra>
